<compile_context>
chip_gen: v7x
topology: tpu7x:2x2x1
jax: 0.10.0
libtpu: 0.0.40
codegen_flags: <defaults>
</compile_context>

<pallas_src>
import jax
import jax.numpy as jnp
import numpy as np
from jax.experimental import pallas as pl
from jax.experimental.pallas import tpu as pltpu


# --------------------------------------------------------------------------- fused kernel

def make_fused_kernel(H, W, Cout, C8):
    HW = H * W
    # Per-tap lane shift so that rolled[p] == y[p + dh*W + dw]  (roll(a, s)[i] = a[(i - s) % n]).
    tap_shifts = []
    for kh in range(7):
        for kw in range(7):
            dh, dw = kh - 3, kw - 3
            tap_shifts.append((-(dh * W + dw)) % HW)

    def kernel(x_ref, w1_ref, bns_ref, bnb_ref, w2_ref,
               wqkv_ref, bqkv_ref, wtap_ref, mask_ref,
               gca_ref, gsa_ref, bmap_ref,
               sab_ref, map_ref):
        x = x_ref[0]                                                       # (Cin, HW)

        # ---- LRASPP: 1x1 conv + folded BN + ReLU, gated by sigmoid(1x1 conv(global pool)) ----
        a1 = jnp.dot(w1_ref[...], x, preferred_element_type=jnp.float32)  # (Cout, HW)  MXU
        a1 = jnp.maximum(a1 * bns_ref[...] + bnb_ref[...], 0.0)
        pooled = jnp.mean(x, axis=-1, keepdims=True)                      # (Cin, 1) lane reduce
        g = jax.nn.sigmoid(
            jnp.dot(w2_ref[...], pooled, preferred_element_type=jnp.float32))  # (Cout, 1)
        y = a1 * g                                                         # (Cout, HW)

        # ---- CA_Block: channel attention ----
        e1 = jax.lax.dot_general(y, y, (((1,), (1,)), ((), ())),
                                 preferred_element_type=jnp.float32)       # (Cout, Cout)
        e1 = e1 - jnp.max(e1, axis=-1, keepdims=True)
        p1 = jnp.exp(e1)
        attn1 = p1 * pl.reciprocal(jnp.sum(p1, axis=-1, keepdims=True), approx=True)
        ca = gca_ref[0] * jnp.dot(attn1, y, preferred_element_type=jnp.float32) + y

        # ---- SA_Block: spatial attention (fused q/k/v projection) ----
        qkv = jnp.dot(wqkv_ref[...], ca, preferred_element_type=jnp.float32) + bqkv_ref[...]
        q = qkv[:C8]                                                        # (C8, HW)
        k = qkv[C8:2 * C8]                                                  # (C8, HW)
        v = qkv[2 * C8:]                                                    # (Cout, HW)
        e2 = jax.lax.dot_general(q, k, (((0,), (0,)), ((), ())),
                                 preferred_element_type=jnp.float32)        # (HW, HW)
        e2 = e2 - jnp.max(e2, axis=-1, keepdims=True)
        p2 = jnp.exp(e2)
        attn2 = p2 * pl.reciprocal(jnp.sum(p2, axis=-1, keepdims=True), approx=True)
        # out[c, s] = sum_t v[c, t] * attn2[s, t]
        out = jax.lax.dot_general(v, attn2, (((1,), (1,)), ((), ())),
                                  preferred_element_type=jnp.float32)       # (Cout, HW)
        sab = gsa_ref[0] * out + ca
        sab_ref[...] = sab[None]                                            # lane-dense store

        # ---- 7x7 map conv (Cout -> 1, pad=3): channel reduce on MXU, taps via lane rolls ----
        y49 = jnp.dot(wtap_ref[...], sab,
                      preferred_element_type=jnp.float32) * mask_ref[...]   # (49, HW), pre-masked
        acc = jnp.zeros((1, HW), jnp.float32)
        # Live set is only y49 + acc, so a static unrolled loop keeps vreg pressure tiny.
        for kidx, shift in enumerate(tap_shifts):
            row = y49[kidx:kidx + 1, :]                                     # (1, HW)
            acc = acc + (pltpu.roll(row, shift, axis=1) if shift else row)
        map_ref[...] = (acc + bmap_ref[0])[None]                            # (1, 1, HW)

    return kernel


# --------------------------------------------------------------------------- wrapper

def _bcast_spec(shape):
    zeros = (0,) * len(shape)
    return pl.BlockSpec(shape, lambda b: zeros)


def _tap_source_mask(H, W):
    """mask[k, q] = 1 if source pixel q is a valid (in-image) contributor for tap k."""
    HW = H * W
    k = np.arange(49)
    dh = (k // 7 - 3)[:, None]
    dw = (k % 7 - 3)[:, None]
    q = np.arange(HW)
    hs, ws = (q // W)[None, :], (q % W)[None, :]
    ok = (hs - dh >= 0) & (hs - dh < H) & (ws - dw >= 0) & (ws - dw < W)
    return ok.astype(np.float32)


def la_position_forward(x, p):
    B, Cin, H, W = x.shape
    HW = H * W
    Cout = p["w1"].shape[0]
    C8 = p["wq"].shape[0]
    assert H >= 4 and W >= 4, "7x7 map-conv roll/mask formulation assumes H, W >= 4"

    # NCHW -> (B, Cin, HW) is a pure reshape (no relayout).
    x_l = x.reshape(B, Cin, HW).astype(jnp.float32)

    # Fold eval-mode BatchNorm into scale/bias.
    eps = 1e-5
    inv_std = 1.0 / jnp.sqrt(p["bn_var"] + eps)
    bn_scale = (p["bn_w"] * inv_std).reshape(Cout, 1)
    bn_bias = (p["bn_b"] - p["bn_mean"] * p["bn_w"] * inv_std).reshape(Cout, 1)

    # Fused q/k/v projection weights, map-conv tap matrix and tap validity mask.
    wqkv = jnp.concatenate([p["wq"], p["wk"], p["wv"]], axis=0)            # (2*C8+Cout, Cout)
    bqkv = jnp.concatenate([p["bq"], p["bk"], p["bv"]], axis=0).reshape(-1, 1)
    wtap = p["w_map"].reshape(Cout, 49).T                                  # (49, Cout)
    mask = jnp.asarray(_tap_source_mask(H, W))                             # (49, HW) constant

    smem_scalar = pl.BlockSpec(memory_space=pltpu.MemorySpace.SMEM)
    kernel = make_fused_kernel(H, W, Cout, C8)

    sab, mp = pl.pallas_call(
        kernel,
        out_shape=(jax.ShapeDtypeStruct((B, Cout, HW), jnp.float32),
                   jax.ShapeDtypeStruct((B, 1, HW), jnp.float32)),
        grid=(B,),
        in_specs=[
            pl.BlockSpec((1, Cin, HW), lambda b: (b, 0, 0)),               # x
            _bcast_spec((Cout, Cin)),                                      # w1
            _bcast_spec((Cout, 1)),                                        # bn scale
            _bcast_spec((Cout, 1)),                                        # bn bias
            _bcast_spec((Cout, Cin)),                                      # w2
            _bcast_spec((2 * C8 + Cout, Cout)),                            # wqkv
            _bcast_spec((2 * C8 + Cout, 1)),                               # bqkv
            _bcast_spec((49, Cout)),                                       # map taps
            _bcast_spec((49, HW)),                                         # tap mask
            smem_scalar,                                                   # gamma_ca
            smem_scalar,                                                   # gamma_sa
            smem_scalar,                                                   # b_map
        ],
        out_specs=(pl.BlockSpec((1, Cout, HW), lambda b: (b, 0, 0)),
                   pl.BlockSpec((1, 1, HW), lambda b: (b, 0, 0))),
        compiler_params=pltpu.CompilerParams(dimension_semantics=("parallel",)),
    )(x_l, p["w1"], bn_scale, bn_bias, p["w2"], wqkv, bqkv, wtap, mask,
      p["gamma_ca"], p["gamma_sa"], p["b_map"])

    return sab.reshape(B, Cout, H, W), mp.reshape(B, 1, H, W)


# --------------------------------------------------------------------------- params & reference

def init_params(key, cin, cout):
    ks = jax.random.split(key, 12)
    f = lambda k, shape, s=0.1: jax.random.normal(k, shape, jnp.float32) * s
    c8 = cout // 8
    return dict(
        w1=f(ks[0], (cout, cin)),                         # aspp1 1x1 conv (no bias)
        bn_w=1.0 + f(ks[1], (cout,)),
        bn_b=f(ks[2], (cout,)),
        bn_mean=jnp.zeros((cout,), jnp.float32),          # fresh eval-mode running stats
        bn_var=jnp.ones((cout,), jnp.float32),
        w2=f(ks[3], (cout, cin)),                         # aspp2 1x1 conv (no bias)
        gamma_ca=jnp.ones((1,), jnp.float32),
        wq=f(ks[4], (c8, cout)), bq=f(ks[5], (c8,)),
        wk=f(ks[6], (c8, cout)), bk=f(ks[7], (c8,)),
        wv=f(ks[8], (cout, cout)), bv=f(ks[9], (cout,)),
        gamma_sa=jnp.ones((1,), jnp.float32),
        w_map=f(ks[10], (cout, 7, 7)),
        b_map=f(ks[11], (1,)),
    )


def reference_forward(x, p):
    B, Cin, H, W = x.shape
    HW = H * W
    xf = x.reshape(B, Cin, HW).astype(jnp.float32)
    eps = 1e-5
    scale = p["bn_w"] / jnp.sqrt(p["bn_var"] + eps)
    bias = p["bn_b"] - p["bn_mean"] * scale
    a1 = jnp.einsum("oc,bcs->bos", p["w1"], xf)
    a1 = jnp.maximum(a1 * scale[None, :, None] + bias[None, :, None], 0.0)
    pooled = xf.mean(axis=2)
    g = jax.nn.sigmoid(jnp.einsum("oc,bc->bo", p["w2"], pooled))
    y = a1 * g[:, :, None]
    # CA
    energy = jnp.einsum("bcs,bds->bcd", y, y)
    attn = jax.nn.softmax(energy, axis=-1)
    ca = p["gamma_ca"][0] * jnp.einsum("bcd,bds->bcs", attn, y) + y
    # SA
    q = jnp.einsum("oc,bcs->bos", p["wq"], ca) + p["bq"][None, :, None]
    k = jnp.einsum("oc,bcs->bos", p["wk"], ca) + p["bk"][None, :, None]
    v = jnp.einsum("oc,bcs->bos", p["wv"], ca) + p["bv"][None, :, None]
    energy2 = jnp.einsum("bos,bot->bst", q, k)
    attn2 = jax.nn.softmax(energy2, axis=-1)
    sa = p["gamma_sa"][0] * jnp.einsum("bct,bst->bcs", v, attn2) + ca
    sab = sa.reshape(B, -1, H, W)
    m = jax.lax.conv_general_dilated(
        sab, p["w_map"][None], (1, 1), ((3, 3), (3, 3)),
        dimension_numbers=("NCHW", "OIHW", "NCHW")) + p["b_map"][0]
    return sab, m


# --------------------------------------------------------------------------- main

if __name__ == "__main__":
    key = jax.random.PRNGKey(0)
    kx, kp = jax.random.split(key)
    B, Cin, Cout, H, W = 2, 8, 16, 16, 16
    x = jax.random.normal(kx, (B, Cin, H, W), jnp.float32)
    params = init_params(kp, Cin, Cout)

    sab, mp = jax.jit(la_position_forward)(x, params)
    jax.block_until_ready((sab, mp))

    assert sab.shape == (B, Cout, H, W) and mp.shape == (B, 1, H, W)
    sab_ref, mp_ref = reference_forward(x, params)
    np.testing.assert_allclose(np.asarray(sab), np.asarray(sab_ref), rtol=5e-2, atol=5e-2)
    np.testing.assert_allclose(np.asarray(mp), np.asarray(mp_ref), rtol=5e-2, atol=5e-2)
    print("KERNEL_OK")
</pallas_src>

<mosaic_0001>
module attributes {stable_mosaic.version = 11 : i64} {
  func.func @kernel(%arg0: i32, %arg1: memref<1x8x256xf32, #tpu.memory_space<vmem>>, %arg2: memref<16x8xf32, #tpu.memory_space<vmem>>, %arg3: memref<16x1xf32, #tpu.memory_space<vmem>>, %arg4: memref<16x1xf32, #tpu.memory_space<vmem>>, %arg5: memref<16x8xf32, #tpu.memory_space<vmem>>, %arg6: memref<20x16xf32, #tpu.memory_space<vmem>>, %arg7: memref<20x1xf32, #tpu.memory_space<vmem>>, %arg8: memref<49x16xf32, #tpu.memory_space<vmem>>, %arg9: memref<49x256xf32, #tpu.memory_space<vmem>>, %arg10: memref<1xf32, #tpu.memory_space<smem>>, %arg11: memref<1xf32, #tpu.memory_space<smem>>, %arg12: memref<1xf32, #tpu.memory_space<smem>>, %arg13: memref<1x16x256xf32, #tpu.memory_space<vmem>>, %arg14: memref<1x1x256xf32, #tpu.memory_space<vmem>>) attributes {dimension_semantics = [#tpu.dimension_semantics<parallel>], iteration_bounds = array<i64: 2>, scalar_prefetch = 0 : i64, scratch_operands = 0 : i64, tpu.core_type = #tpu.core_type<tc>, window_params = [{transform_indices = @transform_0, window_bounds = array<i64: 1, 8, 256>}, {pipeline_mode = #tpu.pipeline_mode<synchronous>, transform_indices = @transform_1, window_bounds = array<i64: 16, 8>}, {pipeline_mode = #tpu.pipeline_mode<synchronous>, transform_indices = @transform_2, window_bounds = array<i64: 16, 1>}, {pipeline_mode = #tpu.pipeline_mode<synchronous>, transform_indices = @transform_3, window_bounds = array<i64: 16, 1>}, {pipeline_mode = #tpu.pipeline_mode<synchronous>, transform_indices = @transform_4, window_bounds = array<i64: 16, 8>}, {pipeline_mode = #tpu.pipeline_mode<synchronous>, transform_indices = @transform_5, window_bounds = array<i64: 20, 16>}, {pipeline_mode = #tpu.pipeline_mode<synchronous>, transform_indices = @transform_6, window_bounds = array<i64: 20, 1>}, {pipeline_mode = #tpu.pipeline_mode<synchronous>, transform_indices = @transform_7, window_bounds = array<i64: 49, 16>}, {pipeline_mode = #tpu.pipeline_mode<synchronous>, transform_indices = @transform_8, window_bounds = array<i64: 49, 256>}, {transform_indices = @transform_9, window_bounds = array<i64: 1>}, {transform_indices = @transform_10, window_bounds = array<i64: 1>}, {transform_indices = @transform_11, window_bounds = array<i64: 1>}, {transform_indices = @transform_12, window_bounds = array<i64: 1, 16, 256>}, {transform_indices = @transform_13, window_bounds = array<i64: 1, 1, 256>}]} {
    %c0 = arith.constant 0 : index
    %c0_0 = arith.constant 0 : index
    %c0_1 = arith.constant 0 : index
    %0 = vector.load %arg1[%c0, %c0_0, %c0_1] : memref<1x8x256xf32, #tpu.memory_space<vmem>>, vector<1x8x256xf32>
    %1 = vector.shape_cast %0 : vector<1x8x256xf32> to vector<8x256xf32>
    %c0_2 = arith.constant 0 : index
    %c0_3 = arith.constant 0 : index
    %2 = vector.load %arg2[%c0_2, %c0_3] : memref<16x8xf32, #tpu.memory_space<vmem>>, vector<16x8xf32>
    %cst = arith.constant dense<0.000000e+00> : vector<16x256xf32>
    %3 = tpu.matmul %2, %1, %cst {dimension_numbers = #tpu.dot_dimension_numbers<[1], [0], [0], [1], [0, 0, 1, 1], [], []>} : vector<16x8xf32>, vector<8x256xf32>, vector<16x256xf32> -> vector<16x256xf32>
    %c0_4 = arith.constant 0 : index
    %c0_5 = arith.constant 0 : index
    %4 = vector.load %arg3[%c0_4, %c0_5] : memref<16x1xf32, #tpu.memory_space<vmem>>, vector<16x1xf32>
    %5 = vector.broadcast %4 : vector<16x1xf32> to vector<16x256xf32>
    %6 = arith.mulf %3, %5 : vector<16x256xf32>
    %c0_6 = arith.constant 0 : index
    %c0_7 = arith.constant 0 : index
    %7 = vector.load %arg4[%c0_6, %c0_7] : memref<16x1xf32, #tpu.memory_space<vmem>>, vector<16x1xf32>
    %8 = vector.broadcast %7 : vector<16x1xf32> to vector<16x256xf32>
    %9 = arith.addf %6, %8 : vector<16x256xf32>
    %cst_8 = arith.constant 0.000000e+00 : f32
    %10 = vector.broadcast %cst_8 : f32 to vector<16x256xf32>
    %11 = arith.maximumf %9, %10 : vector<16x256xf32>
    %cst_9 = arith.constant dense<0.000000e+00> : vector<8xf32>
    %12 = vector.multi_reduction <add>, %1, %cst_9 [1] : vector<8x256xf32> to vector<8xf32>
    %13 = vector.shape_cast %12 : vector<8xf32> to vector<8x1xf32>
    %cst_10 = arith.constant 2.560000e+02 : f32
    %14 = vector.broadcast %cst_10 : f32 to vector<8x1xf32>
    %15 = arith.divf %13, %14 : vector<8x1xf32>
    %c0_11 = arith.constant 0 : index
    %c0_12 = arith.constant 0 : index
    %16 = vector.load %arg5[%c0_11, %c0_12] : memref<16x8xf32, #tpu.memory_space<vmem>>, vector<16x8xf32>
    %cst_13 = arith.constant dense<0.000000e+00> : vector<16x1xf32>
    %17 = tpu.matmul %16, %15, %cst_13 {dimension_numbers = #tpu.dot_dimension_numbers<[1], [0], [0], [1], [0, 0, 1, 1], [], []>} : vector<16x8xf32>, vector<8x1xf32>, vector<16x1xf32> -> vector<16x1xf32>
    %18 = arith.negf %17 : vector<16x1xf32>
    %19 = math.exp %18 : vector<16x1xf32>
    %cst_14 = arith.constant 1.000000e+00 : f32
    %20 = vector.broadcast %cst_14 : f32 to vector<16x1xf32>
    %21 = arith.addf %20, %19 : vector<16x1xf32>
    %22 = arith.divf %20, %21 : vector<16x1xf32>
    %23 = vector.broadcast %22 : vector<16x1xf32> to vector<16x256xf32>
    %24 = arith.mulf %11, %23 : vector<16x256xf32>
    %cst_15 = arith.constant dense<0.000000e+00> : vector<16x16xf32>
    %25 = tpu.matmul %24, %24, %cst_15 {dimension_numbers = #tpu.dot_dimension_numbers<[1], [1], [0], [0], [0, 0, 1, 0], [], []>} : vector<16x256xf32>, vector<16x256xf32>, vector<16x16xf32> -> vector<16x16xf32>
    %cst_16 = arith.constant dense<0xFF800000> : vector<16xf32>
    %26 = vector.multi_reduction <maximumf>, %25, %cst_16 [1] : vector<16x16xf32> to vector<16xf32>
    %27 = vector.shape_cast %26 : vector<16xf32> to vector<16x1xf32>
    %28 = vector.broadcast %27 : vector<16x1xf32> to vector<16x16xf32>
    %29 = arith.subf %25, %28 : vector<16x16xf32>
    %30 = math.exp %29 : vector<16x16xf32>
    %cst_17 = arith.constant dense<0.000000e+00> : vector<16xf32>
    %31 = vector.multi_reduction <add>, %30, %cst_17 [1] : vector<16x16xf32> to vector<16xf32>
    %32 = vector.shape_cast %31 : vector<16xf32> to vector<16x1xf32>
    %33 = tpu.reciprocal %32 {approx = true} : vector<16x1xf32> -> vector<16x1xf32>
    %34 = vector.broadcast %33 : vector<16x1xf32> to vector<16x16xf32>
    %35 = arith.mulf %30, %34 : vector<16x16xf32>
    %c0_18 = arith.constant 0 : index
    %36 = memref.load %arg10[%c0_18] : memref<1xf32, #tpu.memory_space<smem>>
    %cst_19 = arith.constant dense<0.000000e+00> : vector<16x256xf32>
    %37 = tpu.matmul %35, %24, %cst_19 {dimension_numbers = #tpu.dot_dimension_numbers<[1], [0], [0], [1], [0, 0, 1, 1], [], []>} : vector<16x16xf32>, vector<16x256xf32>, vector<16x256xf32> -> vector<16x256xf32>
    %38 = vector.broadcast %36 : f32 to vector<16x256xf32>
    %39 = arith.mulf %38, %37 : vector<16x256xf32>
    %40 = arith.addf %39, %24 : vector<16x256xf32>
    %c0_20 = arith.constant 0 : index
    %c0_21 = arith.constant 0 : index
    %41 = vector.load %arg6[%c0_20, %c0_21] : memref<20x16xf32, #tpu.memory_space<vmem>>, vector<20x16xf32>
    %cst_22 = arith.constant dense<0.000000e+00> : vector<20x256xf32>
    %42 = tpu.matmul %41, %40, %cst_22 {dimension_numbers = #tpu.dot_dimension_numbers<[1], [0], [0], [1], [0, 0, 1, 1], [], []>} : vector<20x16xf32>, vector<16x256xf32>, vector<20x256xf32> -> vector<20x256xf32>
    %c0_23 = arith.constant 0 : index
    %c0_24 = arith.constant 0 : index
    %43 = vector.load %arg7[%c0_23, %c0_24] : memref<20x1xf32, #tpu.memory_space<vmem>>, vector<20x1xf32>
    %44 = vector.broadcast %43 : vector<20x1xf32> to vector<20x256xf32>
    %45 = arith.addf %42, %44 : vector<20x256xf32>
    %46 = vector.extract_strided_slice %45 {offsets = [0, 0], sizes = [2, 256], strides = [1, 1]} : vector<20x256xf32> to vector<2x256xf32>
    %47 = vector.extract_strided_slice %45 {offsets = [2, 0], sizes = [2, 256], strides = [1, 1]} : vector<20x256xf32> to vector<2x256xf32>
    %48 = vector.extract_strided_slice %45 {offsets = [4, 0], sizes = [16, 256], strides = [1, 1]} : vector<20x256xf32> to vector<16x256xf32>
    %cst_25 = arith.constant dense<0.000000e+00> : vector<256x256xf32>
    %49 = tpu.matmul %46, %47, %cst_25 {dimension_numbers = #tpu.dot_dimension_numbers<[0], [0], [1], [1], [0, 1, 1, 1], [], []>} : vector<2x256xf32>, vector<2x256xf32>, vector<256x256xf32> -> vector<256x256xf32>
    %cst_26 = arith.constant dense<0xFF800000> : vector<256xf32>
    %50 = vector.multi_reduction <maximumf>, %49, %cst_26 [1] : vector<256x256xf32> to vector<256xf32>
    %51 = vector.shape_cast %50 : vector<256xf32> to vector<256x1xf32>
    %52 = vector.broadcast %51 : vector<256x1xf32> to vector<256x256xf32>
    %53 = arith.subf %49, %52 : vector<256x256xf32>
    %54 = math.exp %53 : vector<256x256xf32>
    %cst_27 = arith.constant dense<0.000000e+00> : vector<256xf32>
    %55 = vector.multi_reduction <add>, %54, %cst_27 [1] : vector<256x256xf32> to vector<256xf32>
    %56 = vector.shape_cast %55 : vector<256xf32> to vector<256x1xf32>
    %57 = tpu.reciprocal %56 {approx = true} : vector<256x1xf32> -> vector<256x1xf32>
    %58 = vector.broadcast %57 : vector<256x1xf32> to vector<256x256xf32>
    %59 = arith.mulf %54, %58 : vector<256x256xf32>
    %cst_28 = arith.constant dense<0.000000e+00> : vector<16x256xf32>
    %60 = tpu.matmul %48, %59, %cst_28 {dimension_numbers = #tpu.dot_dimension_numbers<[1], [1], [0], [0], [0, 0, 1, 0], [], []>} : vector<16x256xf32>, vector<256x256xf32>, vector<16x256xf32> -> vector<16x256xf32>
    %c0_29 = arith.constant 0 : index
    %61 = memref.load %arg11[%c0_29] : memref<1xf32, #tpu.memory_space<smem>>
    %62 = vector.broadcast %61 : f32 to vector<16x256xf32>
    %63 = arith.mulf %62, %60 : vector<16x256xf32>
    %64 = arith.addf %63, %40 : vector<16x256xf32>
    %65 = vector.shape_cast %64 : vector<16x256xf32> to vector<1x16x256xf32>
    %c0_30 = arith.constant 0 : index
    %c0_31 = arith.constant 0 : index
    %c0_32 = arith.constant 0 : index
    %66 = vector.load %arg13[%c0_30, %c0_31, %c0_32] : memref<1x16x256xf32, #tpu.memory_space<vmem>>, vector<1x16x256xf32>
    tpu.vector_store %arg13[%c0_30, %c0_31, %c0_32], %65 {strides = array<i32>} : memref<1x16x256xf32, #tpu.memory_space<vmem>>, vector<1x16x256xf32>,
    %c0_33 = arith.constant 0 : index
    %c0_34 = arith.constant 0 : index
    %67 = vector.load %arg8[%c0_33, %c0_34] : memref<49x16xf32, #tpu.memory_space<vmem>>, vector<49x16xf32>
    %cst_35 = arith.constant dense<0.000000e+00> : vector<49x256xf32>
    %68 = tpu.matmul %67, %64, %cst_35 {dimension_numbers = #tpu.dot_dimension_numbers<[1], [0], [0], [1], [0, 0, 1, 1], [], []>} : vector<49x16xf32>, vector<16x256xf32>, vector<49x256xf32> -> vector<49x256xf32>
    %c0_36 = arith.constant 0 : index
    %c0_37 = arith.constant 0 : index
    %69 = vector.load %arg9[%c0_36, %c0_37] : memref<49x256xf32, #tpu.memory_space<vmem>>, vector<49x256xf32>
    %70 = arith.mulf %68, %69 : vector<49x256xf32>
    %cst_38 = arith.constant 0.000000e+00 : f32
    %71 = vector.broadcast %cst_38 : f32 to vector<1x256xf32>
    %72 = vector.extract_strided_slice %70 {offsets = [0, 0], sizes = [1, 256], strides = [1, 1]} : vector<49x256xf32> to vector<1x256xf32>
    %c51_i32 = arith.constant 51 : i32
    %73 = tpu.dynamic_rotate %72 by %c51_i32 dim 1 : vector<1x256xf32>, i32 -> vector<1x256xf32>
    %74 = arith.addf %71, %73 : vector<1x256xf32>
    %75 = vector.extract_strided_slice %70 {offsets = [1, 0], sizes = [1, 256], strides = [1, 1]} : vector<49x256xf32> to vector<1x256xf32>
    %c50_i32 = arith.constant 50 : i32
    %76 = tpu.dynamic_rotate %75 by %c50_i32 dim 1 : vector<1x256xf32>, i32 -> vector<1x256xf32>
    %77 = arith.addf %74, %76 : vector<1x256xf32>
    %78 = vector.extract_strided_slice %70 {offsets = [2, 0], sizes = [1, 256], strides = [1, 1]} : vector<49x256xf32> to vector<1x256xf32>
    %c49_i32 = arith.constant 49 : i32
    %79 = tpu.dynamic_rotate %78 by %c49_i32 dim 1 : vector<1x256xf32>, i32 -> vector<1x256xf32>
    %80 = arith.addf %77, %79 : vector<1x256xf32>
    %81 = vector.extract_strided_slice %70 {offsets = [3, 0], sizes = [1, 256], strides = [1, 1]} : vector<49x256xf32> to vector<1x256xf32>
    %c48_i32 = arith.constant 48 : i32
    %82 = tpu.dynamic_rotate %81 by %c48_i32 dim 1 : vector<1x256xf32>, i32 -> vector<1x256xf32>
    %83 = arith.addf %80, %82 : vector<1x256xf32>
    %84 = vector.extract_strided_slice %70 {offsets = [4, 0], sizes = [1, 256], strides = [1, 1]} : vector<49x256xf32> to vector<1x256xf32>
    %c47_i32 = arith.constant 47 : i32
    %85 = tpu.dynamic_rotate %84 by %c47_i32 dim 1 : vector<1x256xf32>, i32 -> vector<1x256xf32>
    %86 = arith.addf %83, %85 : vector<1x256xf32>
    %87 = vector.extract_strided_slice %70 {offsets = [5, 0], sizes = [1, 256], strides = [1, 1]} : vector<49x256xf32> to vector<1x256xf32>
    %c46_i32 = arith.constant 46 : i32
    %88 = tpu.dynamic_rotate %87 by %c46_i32 dim 1 : vector<1x256xf32>, i32 -> vector<1x256xf32>
    %89 = arith.addf %86, %88 : vector<1x256xf32>
    %90 = vector.extract_strided_slice %70 {offsets = [6, 0], sizes = [1, 256], strides = [1, 1]} : vector<49x256xf32> to vector<1x256xf32>
    %c45_i32 = arith.constant 45 : i32
    %91 = tpu.dynamic_rotate %90 by %c45_i32 dim 1 : vector<1x256xf32>, i32 -> vector<1x256xf32>
    %92 = arith.addf %89, %91 : vector<1x256xf32>
    %93 = vector.extract_strided_slice %70 {offsets = [7, 0], sizes = [1, 256], strides = [1, 1]} : vector<49x256xf32> to vector<1x256xf32>
    %c35_i32 = arith.constant 35 : i32
    %94 = tpu.dynamic_rotate %93 by %c35_i32 dim 1 : vector<1x256xf32>, i32 -> vector<1x256xf32>
    %95 = arith.addf %92, %94 : vector<1x256xf32>
    %96 = vector.extract_strided_slice %70 {offsets = [8, 0], sizes = [1, 256], strides = [1, 1]} : vector<49x256xf32> to vector<1x256xf32>
    %c34_i32 = arith.constant 34 : i32
    %97 = tpu.dynamic_rotate %96 by %c34_i32 dim 1 : vector<1x256xf32>, i32 -> vector<1x256xf32>
    %98 = arith.addf %95, %97 : vector<1x256xf32>
    %99 = vector.extract_strided_slice %70 {offsets = [9, 0], sizes = [1, 256], strides = [1, 1]} : vector<49x256xf32> to vector<1x256xf32>
    %c33_i32 = arith.constant 33 : i32
    %100 = tpu.dynamic_rotate %99 by %c33_i32 dim 1 : vector<1x256xf32>, i32 -> vector<1x256xf32>
    %101 = arith.addf %98, %100 : vector<1x256xf32>
    %102 = vector.extract_strided_slice %70 {offsets = [10, 0], sizes = [1, 256], strides = [1, 1]} : vector<49x256xf32> to vector<1x256xf32>
    %c32_i32 = arith.constant 32 : i32
    %103 = tpu.dynamic_rotate %102 by %c32_i32 dim 1 : vector<1x256xf32>, i32 -> vector<1x256xf32>
    %104 = arith.addf %101, %103 : vector<1x256xf32>
    %105 = vector.extract_strided_slice %70 {offsets = [11, 0], sizes = [1, 256], strides = [1, 1]} : vector<49x256xf32> to vector<1x256xf32>
    %c31_i32 = arith.constant 31 : i32
    %106 = tpu.dynamic_rotate %105 by %c31_i32 dim 1 : vector<1x256xf32>, i32 -> vector<1x256xf32>
    %107 = arith.addf %104, %106 : vector<1x256xf32>
    %108 = vector.extract_strided_slice %70 {offsets = [12, 0], sizes = [1, 256], strides = [1, 1]} : vector<49x256xf32> to vector<1x256xf32>
    %c30_i32 = arith.constant 30 : i32
    %109 = tpu.dynamic_rotate %108 by %c30_i32 dim 1 : vector<1x256xf32>, i32 -> vector<1x256xf32>
    %110 = arith.addf %107, %109 : vector<1x256xf32>
    %111 = vector.extract_strided_slice %70 {offsets = [13, 0], sizes = [1, 256], strides = [1, 1]} : vector<49x256xf32> to vector<1x256xf32>
    %c29_i32 = arith.constant 29 : i32
    %112 = tpu.dynamic_rotate %111 by %c29_i32 dim 1 : vector<1x256xf32>, i32 -> vector<1x256xf32>
    %113 = arith.addf %110, %112 : vector<1x256xf32>
    %114 = vector.extract_strided_slice %70 {offsets = [14, 0], sizes = [1, 256], strides = [1, 1]} : vector<49x256xf32> to vector<1x256xf32>
    %c19_i32 = arith.constant 19 : i32
    %115 = tpu.dynamic_rotate %114 by %c19_i32 dim 1 : vector<1x256xf32>, i32 -> vector<1x256xf32>
    %116 = arith.addf %113, %115 : vector<1x256xf32>
    %117 = vector.extract_strided_slice %70 {offsets = [15, 0], sizes = [1, 256], strides = [1, 1]} : vector<49x256xf32> to vector<1x256xf32>
    %c18_i32 = arith.constant 18 : i32
    %118 = tpu.dynamic_rotate %117 by %c18_i32 dim 1 : vector<1x256xf32>, i32 -> vector<1x256xf32>
    %119 = arith.addf %116, %118 : vector<1x256xf32>
    %120 = vector.extract_strided_slice %70 {offsets = [16, 0], sizes = [1, 256], strides = [1, 1]} : vector<49x256xf32> to vector<1x256xf32>
    %c17_i32 = arith.constant 17 : i32
    %121 = tpu.dynamic_rotate %120 by %c17_i32 dim 1 : vector<1x256xf32>, i32 -> vector<1x256xf32>
    %122 = arith.addf %119, %121 : vector<1x256xf32>
    %123 = vector.extract_strided_slice %70 {offsets = [17, 0], sizes = [1, 256], strides = [1, 1]} : vector<49x256xf32> to vector<1x256xf32>
    %c16_i32 = arith.constant 16 : i32
    %124 = tpu.dynamic_rotate %123 by %c16_i32 dim 1 : vector<1x256xf32>, i32 -> vector<1x256xf32>
    %125 = arith.addf %122, %124 : vector<1x256xf32>
    %126 = vector.extract_strided_slice %70 {offsets = [18, 0], sizes = [1, 256], strides = [1, 1]} : vector<49x256xf32> to vector<1x256xf32>
    %c15_i32 = arith.constant 15 : i32
    %127 = tpu.dynamic_rotate %126 by %c15_i32 dim 1 : vector<1x256xf32>, i32 -> vector<1x256xf32>
    %128 = arith.addf %125, %127 : vector<1x256xf32>
    %129 = vector.extract_strided_slice %70 {offsets = [19, 0], sizes = [1, 256], strides = [1, 1]} : vector<49x256xf32> to vector<1x256xf32>
    %c14_i32 = arith.constant 14 : i32
    %130 = tpu.dynamic_rotate %129 by %c14_i32 dim 1 : vector<1x256xf32>, i32 -> vector<1x256xf32>
    %131 = arith.addf %128, %130 : vector<1x256xf32>
    %132 = vector.extract_strided_slice %70 {offsets = [20, 0], sizes = [1, 256], strides = [1, 1]} : vector<49x256xf32> to vector<1x256xf32>
    %c13_i32 = arith.constant 13 : i32
    %133 = tpu.dynamic_rotate %132 by %c13_i32 dim 1 : vector<1x256xf32>, i32 -> vector<1x256xf32>
    %134 = arith.addf %131, %133 : vector<1x256xf32>
    %135 = vector.extract_strided_slice %70 {offsets = [21, 0], sizes = [1, 256], strides = [1, 1]} : vector<49x256xf32> to vector<1x256xf32>
    %c3_i32 = arith.constant 3 : i32
    %136 = tpu.dynamic_rotate %135 by %c3_i32 dim 1 : vector<1x256xf32>, i32 -> vector<1x256xf32>
    %137 = arith.addf %134, %136 : vector<1x256xf32>
    %138 = vector.extract_strided_slice %70 {offsets = [22, 0], sizes = [1, 256], strides = [1, 1]} : vector<49x256xf32> to vector<1x256xf32>
    %c2_i32 = arith.constant 2 : i32
    %139 = tpu.dynamic_rotate %138 by %c2_i32 dim 1 : vector<1x256xf32>, i32 -> vector<1x256xf32>
    %140 = arith.addf %137, %139 : vector<1x256xf32>
    %141 = vector.extract_strided_slice %70 {offsets = [23, 0], sizes = [1, 256], strides = [1, 1]} : vector<49x256xf32> to vector<1x256xf32>
    %c1_i32 = arith.constant 1 : i32
    %142 = tpu.dynamic_rotate %141 by %c1_i32 dim 1 : vector<1x256xf32>, i32 -> vector<1x256xf32>
    %143 = arith.addf %140, %142 : vector<1x256xf32>
    %144 = vector.extract_strided_slice %70 {offsets = [24, 0], sizes = [1, 256], strides = [1, 1]} : vector<49x256xf32> to vector<1x256xf32>
    %145 = arith.addf %143, %144 : vector<1x256xf32>
    %146 = vector.extract_strided_slice %70 {offsets = [25, 0], sizes = [1, 256], strides = [1, 1]} : vector<49x256xf32> to vector<1x256xf32>
    %c255_i32 = arith.constant 255 : i32
    %147 = tpu.dynamic_rotate %146 by %c255_i32 dim 1 : vector<1x256xf32>, i32 -> vector<1x256xf32>
    %148 = arith.addf %145, %147 : vector<1x256xf32>
    %149 = vector.extract_strided_slice %70 {offsets = [26, 0], sizes = [1, 256], strides = [1, 1]} : vector<49x256xf32> to vector<1x256xf32>
    %c254_i32 = arith.constant 254 : i32
    %150 = tpu.dynamic_rotate %149 by %c254_i32 dim 1 : vector<1x256xf32>, i32 -> vector<1x256xf32>
    %151 = arith.addf %148, %150 : vector<1x256xf32>
    %152 = vector.extract_strided_slice %70 {offsets = [27, 0], sizes = [1, 256], strides = [1, 1]} : vector<49x256xf32> to vector<1x256xf32>
    %c253_i32 = arith.constant 253 : i32
    %153 = tpu.dynamic_rotate %152 by %c253_i32 dim 1 : vector<1x256xf32>, i32 -> vector<1x256xf32>
    %154 = arith.addf %151, %153 : vector<1x256xf32>
    %155 = vector.extract_strided_slice %70 {offsets = [28, 0], sizes = [1, 256], strides = [1, 1]} : vector<49x256xf32> to vector<1x256xf32>
    %c243_i32 = arith.constant 243 : i32
    %156 = tpu.dynamic_rotate %155 by %c243_i32 dim 1 : vector<1x256xf32>, i32 -> vector<1x256xf32>
    %157 = arith.addf %154, %156 : vector<1x256xf32>
    %158 = vector.extract_strided_slice %70 {offsets = [29, 0], sizes = [1, 256], strides = [1, 1]} : vector<49x256xf32> to vector<1x256xf32>
    %c242_i32 = arith.constant 242 : i32
    %159 = tpu.dynamic_rotate %158 by %c242_i32 dim 1 : vector<1x256xf32>, i32 -> vector<1x256xf32>
    %160 = arith.addf %157, %159 : vector<1x256xf32>
    %161 = vector.extract_strided_slice %70 {offsets = [30, 0], sizes = [1, 256], strides = [1, 1]} : vector<49x256xf32> to vector<1x256xf32>
    %c241_i32 = arith.constant 241 : i32
    %162 = tpu.dynamic_rotate %161 by %c241_i32 dim 1 : vector<1x256xf32>, i32 -> vector<1x256xf32>
    %163 = arith.addf %160, %162 : vector<1x256xf32>
    %164 = vector.extract_strided_slice %70 {offsets = [31, 0], sizes = [1, 256], strides = [1, 1]} : vector<49x256xf32> to vector<1x256xf32>
    %c240_i32 = arith.constant 240 : i32
    %165 = tpu.dynamic_rotate %164 by %c240_i32 dim 1 : vector<1x256xf32>, i32 -> vector<1x256xf32>
    %166 = arith.addf %163, %165 : vector<1x256xf32>
    %167 = vector.extract_strided_slice %70 {offsets = [32, 0], sizes = [1, 256], strides = [1, 1]} : vector<49x256xf32> to vector<1x256xf32>
    %c239_i32 = arith.constant 239 : i32
    %168 = tpu.dynamic_rotate %167 by %c239_i32 dim 1 : vector<1x256xf32>, i32 -> vector<1x256xf32>
    %169 = arith.addf %166, %168 : vector<1x256xf32>
    %170 = vector.extract_strided_slice %70 {offsets = [33, 0], sizes = [1, 256], strides = [1, 1]} : vector<49x256xf32> to vector<1x256xf32>
    %c238_i32 = arith.constant 238 : i32
    %171 = tpu.dynamic_rotate %170 by %c238_i32 dim 1 : vector<1x256xf32>, i32 -> vector<1x256xf32>
    %172 = arith.addf %169, %171 : vector<1x256xf32>
    %173 = vector.extract_strided_slice %70 {offsets = [34, 0], sizes = [1, 256], strides = [1, 1]} : vector<49x256xf32> to vector<1x256xf32>
    %c237_i32 = arith.constant 237 : i32
    %174 = tpu.dynamic_rotate %173 by %c237_i32 dim 1 : vector<1x256xf32>, i32 -> vector<1x256xf32>
    %175 = arith.addf %172, %174 : vector<1x256xf32>
    %176 = vector.extract_strided_slice %70 {offsets = [35, 0], sizes = [1, 256], strides = [1, 1]} : vector<49x256xf32> to vector<1x256xf32>
    %c227_i32 = arith.constant 227 : i32
    %177 = tpu.dynamic_rotate %176 by %c227_i32 dim 1 : vector<1x256xf32>, i32 -> vector<1x256xf32>
    %178 = arith.addf %175, %177 : vector<1x256xf32>
    %179 = vector.extract_strided_slice %70 {offsets = [36, 0], sizes = [1, 256], strides = [1, 1]} : vector<49x256xf32> to vector<1x256xf32>
    %c226_i32 = arith.constant 226 : i32
    %180 = tpu.dynamic_rotate %179 by %c226_i32 dim 1 : vector<1x256xf32>, i32 -> vector<1x256xf32>
    %181 = arith.addf %178, %180 : vector<1x256xf32>
    %182 = vector.extract_strided_slice %70 {offsets = [37, 0], sizes = [1, 256], strides = [1, 1]} : vector<49x256xf32> to vector<1x256xf32>
    %c225_i32 = arith.constant 225 : i32
    %183 = tpu.dynamic_rotate %182 by %c225_i32 dim 1 : vector<1x256xf32>, i32 -> vector<1x256xf32>
    %184 = arith.addf %181, %183 : vector<1x256xf32>
    %185 = vector.extract_strided_slice %70 {offsets = [38, 0], sizes = [1, 256], strides = [1, 1]} : vector<49x256xf32> to vector<1x256xf32>
    %c224_i32 = arith.constant 224 : i32
    %186 = tpu.dynamic_rotate %185 by %c224_i32 dim 1 : vector<1x256xf32>, i32 -> vector<1x256xf32>
    %187 = arith.addf %184, %186 : vector<1x256xf32>
    %188 = vector.extract_strided_slice %70 {offsets = [39, 0], sizes = [1, 256], strides = [1, 1]} : vector<49x256xf32> to vector<1x256xf32>
    %c223_i32 = arith.constant 223 : i32
    %189 = tpu.dynamic_rotate %188 by %c223_i32 dim 1 : vector<1x256xf32>, i32 -> vector<1x256xf32>
    %190 = arith.addf %187, %189 : vector<1x256xf32>
    %191 = vector.extract_strided_slice %70 {offsets = [40, 0], sizes = [1, 256], strides = [1, 1]} : vector<49x256xf32> to vector<1x256xf32>
    %c222_i32 = arith.constant 222 : i32
    %192 = tpu.dynamic_rotate %191 by %c222_i32 dim 1 : vector<1x256xf32>, i32 -> vector<1x256xf32>
    %193 = arith.addf %190, %192 : vector<1x256xf32>
    %194 = vector.extract_strided_slice %70 {offsets = [41, 0], sizes = [1, 256], strides = [1, 1]} : vector<49x256xf32> to vector<1x256xf32>
    %c221_i32 = arith.constant 221 : i32
    %195 = tpu.dynamic_rotate %194 by %c221_i32 dim 1 : vector<1x256xf32>, i32 -> vector<1x256xf32>
    %196 = arith.addf %193, %195 : vector<1x256xf32>
    %197 = vector.extract_strided_slice %70 {offsets = [42, 0], sizes = [1, 256], strides = [1, 1]} : vector<49x256xf32> to vector<1x256xf32>
    %c211_i32 = arith.constant 211 : i32
    %198 = tpu.dynamic_rotate %197 by %c211_i32 dim 1 : vector<1x256xf32>, i32 -> vector<1x256xf32>
    %199 = arith.addf %196, %198 : vector<1x256xf32>
    %200 = vector.extract_strided_slice %70 {offsets = [43, 0], sizes = [1, 256], strides = [1, 1]} : vector<49x256xf32> to vector<1x256xf32>
    %c210_i32 = arith.constant 210 : i32
    %201 = tpu.dynamic_rotate %200 by %c210_i32 dim 1 : vector<1x256xf32>, i32 -> vector<1x256xf32>
    %202 = arith.addf %199, %201 : vector<1x256xf32>
    %203 = vector.extract_strided_slice %70 {offsets = [44, 0], sizes = [1, 256], strides = [1, 1]} : vector<49x256xf32> to vector<1x256xf32>
    %c209_i32 = arith.constant 209 : i32
    %204 = tpu.dynamic_rotate %203 by %c209_i32 dim 1 : vector<1x256xf32>, i32 -> vector<1x256xf32>
    %205 = arith.addf %202, %204 : vector<1x256xf32>
    %206 = vector.extract_strided_slice %70 {offsets = [45, 0], sizes = [1, 256], strides = [1, 1]} : vector<49x256xf32> to vector<1x256xf32>
    %c208_i32 = arith.constant 208 : i32
    %207 = tpu.dynamic_rotate %206 by %c208_i32 dim 1 : vector<1x256xf32>, i32 -> vector<1x256xf32>
    %208 = arith.addf %205, %207 : vector<1x256xf32>
    %209 = vector.extract_strided_slice %70 {offsets = [46, 0], sizes = [1, 256], strides = [1, 1]} : vector<49x256xf32> to vector<1x256xf32>
    %c207_i32 = arith.constant 207 : i32
    %210 = tpu.dynamic_rotate %209 by %c207_i32 dim 1 : vector<1x256xf32>, i32 -> vector<1x256xf32>
    %211 = arith.addf %208, %210 : vector<1x256xf32>
    %212 = vector.extract_strided_slice %70 {offsets = [47, 0], sizes = [1, 256], strides = [1, 1]} : vector<49x256xf32> to vector<1x256xf32>
    %c206_i32 = arith.constant 206 : i32
    %213 = tpu.dynamic_rotate %212 by %c206_i32 dim 1 : vector<1x256xf32>, i32 -> vector<1x256xf32>
    %214 = arith.addf %211, %213 : vector<1x256xf32>
    %215 = vector.extract_strided_slice %70 {offsets = [48, 0], sizes = [1, 256], strides = [1, 1]} : vector<49x256xf32> to vector<1x256xf32>
    %c205_i32 = arith.constant 205 : i32
    %216 = tpu.dynamic_rotate %215 by %c205_i32 dim 1 : vector<1x256xf32>, i32 -> vector<1x256xf32>
    %217 = arith.addf %214, %216 : vector<1x256xf32>
    %c0_39 = arith.constant 0 : index
    %218 = memref.load %arg12[%c0_39] : memref<1xf32, #tpu.memory_space<smem>>
    %219 = vector.broadcast %218 : f32 to vector<1x256xf32>
    %220 = arith.addf %217, %219 : vector<1x256xf32>
    %221 = vector.shape_cast %220 : vector<1x256xf32> to vector<1x1x256xf32>
    %c0_40 = arith.constant 0 : index
    %c0_41 = arith.constant 0 : index
    %c0_42 = arith.constant 0 : index
    %222 = vector.load %arg14[%c0_40, %c0_41, %c0_42] : memref<1x1x256xf32, #tpu.memory_space<vmem>>, vector<1x1x256xf32>
    tpu.vector_store %arg14[%c0_40, %c0_41, %c0_42], %221 {strides = array<i32>} : memref<1x1x256xf32, #tpu.memory_space<vmem>>, vector<1x1x256xf32>,
    return
  }
  func.func @transform_0(%arg0: i32) -> (i32, i32, i32) {
    %c0_i32 = arith.constant 0 : i32
    %c0_i32_0 = arith.constant 0 : i32
    %c0_i32_1 = arith.constant 0 : i32
    return %arg0, %c0_i32, %c0_i32_0 : i32, i32, i32
  }
  func.func @transform_1(%arg0: i32) -> (i32, i32) {
    %c0_i32 = arith.constant 0 : i32
    %c0_i32_0 = arith.constant 0 : i32
    %c0_i32_1 = arith.constant 0 : i32
    return %c0_i32, %c0_i32_0 : i32, i32
  }
  func.func @transform_2(%arg0: i32) -> (i32, i32) {
    %c0_i32 = arith.constant 0 : i32
    %c0_i32_0 = arith.constant 0 : i32
    %c0_i32_1 = arith.constant 0 : i32
    return %c0_i32, %c0_i32_0 : i32, i32
  }
  func.func @transform_3(%arg0: i32) -> (i32, i32) {
    %c0_i32 = arith.constant 0 : i32
    %c0_i32_0 = arith.constant 0 : i32
    %c0_i32_1 = arith.constant 0 : i32
    return %c0_i32, %c0_i32_0 : i32, i32
  }
  func.func @transform_4(%arg0: i32) -> (i32, i32) {
    %c0_i32 = arith.constant 0 : i32
    %c0_i32_0 = arith.constant 0 : i32
    %c0_i32_1 = arith.constant 0 : i32
    return %c0_i32, %c0_i32_0 : i32, i32
  }
  func.func @transform_5(%arg0: i32) -> (i32, i32) {
    %c0_i32 = arith.constant 0 : i32
    %c0_i32_0 = arith.constant 0 : i32
    %c0_i32_1 = arith.constant 0 : i32
    return %c0_i32, %c0_i32_0 : i32, i32
  }
  func.func @transform_6(%arg0: i32) -> (i32, i32) {
    %c0_i32 = arith.constant 0 : i32
    %c0_i32_0 = arith.constant 0 : i32
    %c0_i32_1 = arith.constant 0 : i32
    return %c0_i32, %c0_i32_0 : i32, i32
  }
  func.func @transform_7(%arg0: i32) -> (i32, i32) {
    %c0_i32 = arith.constant 0 : i32
    %c0_i32_0 = arith.constant 0 : i32
    %c0_i32_1 = arith.constant 0 : i32
    return %c0_i32, %c0_i32_0 : i32, i32
  }
  func.func @transform_8(%arg0: i32) -> (i32, i32) {
    %c0_i32 = arith.constant 0 : i32
    %c0_i32_0 = arith.constant 0 : i32
    %c0_i32_1 = arith.constant 0 : i32
    return %c0_i32, %c0_i32_0 : i32, i32
  }
  func.func @transform_9(%arg0: i32) -> i32 {
    %c0_i32 = arith.constant 0 : i32
    %c0_i32_0 = arith.constant 0 : i32
    return %c0_i32 : i32
  }
  func.func @transform_10(%arg0: i32) -> i32 {
    %c0_i32 = arith.constant 0 : i32
    %c0_i32_0 = arith.constant 0 : i32
    return %c0_i32 : i32
  }
  func.func @transform_11(%arg0: i32) -> i32 {
    %c0_i32 = arith.constant 0 : i32
    %c0_i32_0 = arith.constant 0 : i32
    return %c0_i32 : i32
  }
  func.func @transform_12(%arg0: i32) -> (i32, i32, i32) {
    %c0_i32 = arith.constant 0 : i32
    %c0_i32_0 = arith.constant 0 : i32
    %c0_i32_1 = arith.constant 0 : i32
    return %arg0, %c0_i32, %c0_i32_0 : i32, i32, i32
  }
  func.func @transform_13(%arg0: i32) -> (i32, i32, i32) {
    %c0_i32 = arith.constant 0 : i32
    %c0_i32_0 = arith.constant 0 : i32
    %c0_i32_1 = arith.constant 0 : i32
    return %arg0, %c0_i32, %c0_i32_0 : i32, i32, i32
  }
}

</mosaic_0001>

<bundles_post_ra>
// kernel: la_position_forward.1
= control target key start
LH: loop header
LB: loop body
LE: loop exit
PB: predicated region body
PF: predicated region fallthrough
CT: control target
= control target key end

     0   :  { %s3467_s14 = smov 0   ;;  %s4546_s0 = inlined_call_operand.vmem [shape: f32[2,8,256], index: 0, kind: input, shape index: {}]   ;;  %s4547_s1 = inlined_call_operand.vmem [shape: f32[16,8], index: 1, kind: input, shape index: {}]   ;;  %s4548_s2 = inlined_call_operand.vmem [shape: f32[16,1], index: 2, kind: input, shape index: {}]   ;;  %s4549_s3 = inlined_call_operand.vmem [shape: f32[16,1], index: 3, kind: input, shape index: {}]   ;;  %s4550_s4 = inlined_call_operand.vmem [shape: f32[16,8], index: 4, kind: input, shape index: {}]   ;;  %s4551_s5 = inlined_call_operand.vmem [shape: f32[20,16], index: 5, kind: input, shape index: {}]   ;;  %s4552_s6 = inlined_call_operand.vmem [shape: f32[20,1], index: 6, kind: input, shape index: {}]   ;;  %s4553_s7 = inlined_call_operand.vmem [shape: f32[49,16], index: 7, kind: input, shape index: {}]   ;;  %s4554_s8 = inlined_call_operand.vmem [shape: f32[49,256], index: 8, kind: input, shape index: {}]   ;;  %s4555_s9 = inlined_call_operand.<no memory space> [shape: f32[1], index: 9, kind: input, shape index: {}]   ;;  %s4556_s10 = inlined_call_operand.<no memory space> [shape: f32[1], index: 10, kind: input, shape index: {}]   ;;  %s4557_s11 = inlined_call_operand.<no memory space> [shape: f32[1], index: 11, kind: input, shape index: {}]   ;;  %s4558_s12 = inlined_call_operand.vmem [shape: f32[2,16,256], index: 12, kind: output, shape index: {0}]   ;;  %s4559_s13 = inlined_call_operand.vmem [shape: f32[2,1,256], index: 13, kind: output, shape index: {1}]  }
   0x1   :  { %19 = sst [smem:[#allocation2]] %s4555_s9 }
   0x2   :  { %20 = sst [smem:[#allocation3]] %s4556_s10 }
   0x3   :  { %21 = sst [smem:[#allocation4]] %s4557_s11 }
   0x4 LB: > { %s2906_s15 = sadd.s32 4294967295, %s3335_s14   ;;  %p2910_p0 = scmp.ge.s32.totalorder %s3335_s14, 1  ;;  %s3335_s14 = sphi %s3467_s14, %s27_s14  }
   0x5   : > { %p393_p1 = scmp.lt.s32.totalorder %s3335_s14, 3 }
   0x7   : > { %p394_p2 = pnand %p2910_p0, %p393_p1 }
   0x9   : > { %397 = sbr.rel (%p394_p2) target bundleno = 3141 (0xc45), region = 68 }
  0x10   : > { %p441_p3 = scmp.lt.s32.totalorder %s2906_s15, 1  ;;  %v4560_v0 = vmov 0.0   ;;  %v457_v3 = vld [vmem:[%s4547_s1] sm:$0xff]  ;;  %vm459_vm0 = vcmask 64512   ;;  %v458_v5 = vld [vmem:[%s4547_s1 + $0x8] sm:$0xff]  ;;  %v3338_v8 = vmov 0  }
  0x11   : > { %530 = vmatprep.mubr.f32.mxu0 %v4560_v0  ;;  %1231 = vmatprep.mubr.f32.mxu1 %v4560_v0  ;;  %v584_v6 = vld [vmem:[%s4550_s4] sm:$0xff]  ;;  %v544_v7 = vld [vmem:[%s4548_s2 + $0x8] sm:$0xff]  ;;  %vm768_vm1 = vcmask 130048   ;;  %s791_s17 = sld [smem:[#allocation2]]  ;;  %vm1162_vm2 = vcmask 1041408   ;;  %vm1065_vm3 = vcmask 15360  }
  0x12   : > { %s4673_s15 = smov (!%p441_p3, %s2906_s15), 1  ;;  %3120 = vset.pattern.permute.xlu1 %v3338_v8  ;;  %3119 = vset.pattern.permute.xlu0 %v3338_v8  ;;  %v543_v9 = vld [vmem:[%s4548_s2] sm:$0xff]  ;;  %v560_v11 = vld [vmem:[%s4549_s3 + $0x8] sm:$0xff]  ;;  %vm1908_vm4 = vcmask 1043456   ;;  %s2000_s28 = sld [smem:[#allocation3]] }
  0x13   : > { %s2970_s9 = sshll.u32 %s4673_s15, 4  ;;  %552 = vperm.xlu1 %3120, %v544_v7   ;;  %v559_v10 = vld [vmem:[%s4549_s3] sm:$0xff]  ;;  %v585_v14 = vld [vmem:[%s4550_s4 + $0x8] sm:$0xff]  ;;  %s2971_s29 = sshll.u32 %s4673_s15, 5 }
  0x14   : > { %s445_s16 = scalar_lea.vmem %s4546_s0, %s2970_s9  ;;  %s450_s10 = scalar_lea.vmem %s4558_s12, %s2971_s29 }
  0x15   : > { %v455_v1 = vld [vmem:[%s445_s16] sm:$0xff]  ;;  %v456_v2 = vld [vmem:[%s445_s16 + $0x8] sm:$0xff]  ;;  %s3339_s11 = smov 51   ;;  %s3340_s16 = smov 50  }
  0x16   : > { %v579_v4 = vadd.f32 %v456_v2, %v455_v1  ;;  %466 = vmatprep.subr.mxu0 %v456_v2  ;;  %s3342_s18 = smov 48   ;;  %s3343_s19 = smov 47  }
  0x17   : > { %467 = vmatpush1.msra.mxu0 %v455_v1  ;;  %563 = vperm.xlu1 %3120, %v559_v10   ;;  %s3344_s20 = smov 46   ;;  %s3345_s21 = smov 45  }
  0x18   : > { %580 = vadd.xlane.f32.xlu0 %v579_v4  ;;  %2916 = vmatmul.mubr.msk.f32.vlgmr.msra.gmra.mrb[0].mxu0 %vm459_vm0, %v457_v3  ;;  %s3346_s24 = smov 35   ;;  %s3347_s27 = smov 34  }
  0x19   : > { %536 = vmatprep.mubr.f32.mxu0 %v4560_v0  ;;  %s3349_s29 = smov 32   ;;  %s3350_s30 = smov 31  }
  0x1a   : > { %s3351_s9 = smov 30   ;;  %s3356_s22 = smov 16  }
  0x1b   : > { %568 = vperm.xlu1 %3120, %v560_v11   ;;  %s3357_s23 = smov 15   ;;  %s3359_s25 = smov 13  }
  0x1c   : > { %2917 = vmatmul.mubr.msk.f32.gmra.mrb[2].mxu0 %vm459_vm0, %v458_v5  ;;  %s3360_s26 = smov 3  }
  0x1d   : > { %2977 = vmatprep.mubr.msk.f32.mxu0 %vm459_vm0, %v584_v6  ;;  %v887_v6 = vld [vmem:[%s4552_s6] sm:$0xff] }
  0x2e   : > { %547 = vperm.xlu0 %3119, %v543_v9  }
  0x92   : > { %v553_v29 = vpop.permute.xlu1 %552 }
  0x96   : > { %v564_v31 = vpop.permute.xlu1 %563 }
  0x9a   : > { %v569_v37 = vpop.permute.xlu1 %568 }
  0xa5   : > { %v581_v12 = vpop.xlane.xlu0 %580 }
  0xa6   : > { %v583_v13 = vmul.f32 0.00390625, %v581_v12 }
  0xa8   : > { %2975 = vmatprep.subr.mxu0 %v583_v13 }
  0xa9   : > { %2976 = vmatpush3.msra.mxu0 %v583_v13 }
  0xaa   : > { %2978 = vmatmul.mubr.msk.f32.vlgmr.msra.gmra.mrb[4].mxu0 %vm459_vm0, %v585_v14  ;;  %v875_v14 = vstv %s791_s17  ;;  %s3341_s17 = smov 49  }
  0xad   : > { %v548_v30 = vpop.permute.xlu0 %547 }
  0xeb   : > { %v532_v15 = vpop.f32.mrb[0].mxu0 }
  0xec   : > { %v534_v16 = vpop.f32.mrb[1].mxu0  ;;  %v555_v33 = vmul.f32 %v548_v30, %v532_v15 }
  0xed   : > { %v556_v32 = vmul.f32 %v548_v30, %v534_v16 }
  0xee   : > { %v571_v38 = vadd.f32 %v564_v31, %v555_v33 }
  0xef   : > { %v538_v17 = vpop.f32.mrb[2].mxu0  ;;  %v572_v34 = vadd.f32 %v564_v31, %v556_v32 }
  0xf0   : > { %v540_v18 = vpop.f32.mrb[3].mxu0  ;;  %v557_v35 = vmul.f32 %v553_v29, %v538_v17  ;;  %v575_v44 = vmax.f32 %v571_v38, 0.0 }
  0xf1   : > { %v558_v36 = vmul.f32 %v553_v29, %v540_v18  ;;  %v576_v39 = vmax.f32 %v572_v34, 0.0 }
  0xf2   : > { %v573_v40 = vadd.f32 %v569_v37, %v557_v35 }
  0xf3   : > { %v574_v41 = vadd.f32 %v569_v37, %v558_v36 }
  0xf4   : > { %v577_v45 = vmax.f32 %v573_v40, 0.0 }
  0xf5   : > { %v578_v46 = vmax.f32 %v574_v41, 0.0 }
 0x17d   : > { %v2979_v19 = vpop.f32.mrb[4].mxu0 }
 0x17e   : > { %v2921_v20 = vmul.f32 -1.442695, %v2979_v19  ;;  %v658_v21 = vpop.f32.mrb[5].mxu0 }
 0x17f   : > { %v2920_v22 = vmul.f32 -1.442695, %v658_v21 }
 0x180   : > { %3121 = vpow2.f32 %v2921_v20 }
 0x181   : > { %3123 = vpow2.f32 %v2920_v22 }
 0x18a   : > { %v3122_v23 = vpop.eup %3121 }
 0x18b   : > { %v3124_v24 = vpop.eup %3123  ;;  %v674_v26 = vadd.f32 1.0, %v3122_v23 }
 0x18c   : > { %v673_v25 = vadd.f32 1.0, %v3124_v24 }
 0x18e   : > { %3125 = vrcp.f32 %v673_v25 }
 0x18f   : > { %3127 = vrcp.f32 %v674_v26 }
 0x198   : > { %v3126_v27 = vpop.eup %3125 }
 0x199   : > { %681 = vperm.xlu1 %3120, %v3126_v27   ;;  %v3128_v28 = vpop.eup %3127 }
 0x19d   : > { %686 = vperm.xlu1 %3120, %v3128_v28   ;;  %v884_v28 = vld [vmem:[%s4551_s5] sm:$0xff] }
 0x218   : > { %v682_v42 = vpop.permute.xlu1 %681 }
 0x219   : > { %v3512_v43 = vmul.f32 %v682_v42, %v576_v39  ;;  %v3515_v48 = vmul.f32 %v682_v42, %v575_v44 }
 0x21b   : > { %757 = vmatprep.mubr.f32.mxu0 %v3512_v43 }
 0x21c   : > { %v687_v47 = vpop.permute.xlu1 %686 }
 0x21d   : > { %v691_v49 = vmul.f32 %v687_v47, %v577_v45  ;;  %v692_v50 = vmul.f32 %v687_v47, %v578_v46 }
 0x21f   : > { %v2980_v51 = vpack.c.bf16 %v692_v50, %v3512_v43  ;;  %v2982_v52 = vpack.c.bf16 %v691_v49, %v3515_v48 }
 0x221   : > { %2981 = vmatprep.subr.bf16.mxu0 %v2980_v51 }
 0x222   : > { %2983 = vmatpush1.bf16.xpose.msra.mxu0 %v2982_v52 }
 0x223   : > { %2985 = vmatprep.subr.bf16.mxu0 %v2980_v51 }
 0x229   : > { %758 = vmatmul.mubr.f32.vlgmr.msra.gmra.mrb[6].mxu0 %v3515_v48 }
 0x22a   : > { %762 = vmatprep.mubr.f32.mxu0 %v692_v50  ;;  %2987 = vmatpush1.bf16.msra.mxu0 %v2982_v52 }
 0x22d   : > { %763 = vmatmul.mubr.f32.gmra.mrb[8].mxu0 %v691_v49 }
 0x22e   : > { %862 = vmatprep.mubr.f32.mxu0 %v4560_v0 }
 0x2fc   : > { %v759_v53 = vpop.f32.mrb[6].mxu0 }
 0x2fd   : > { %v761_v54 = vpop.f32.mrb[7].mxu0  ;;  %v769_v55 = vsel %vm768_vm1, %v759_v53, -inf }
 0x2fe   : > { %770 = vmax.xlane.f32.xlu1 %v769_v55 }
 0x300   : > { %v764_v56 = vpop.f32.mrb[8].mxu0 }
 0x301   : > { %v766_v57 = vpop.f32.mrb[9].mxu0  ;;  %v772_v58 = vsel %vm768_vm1, %v764_v56, -inf }
 0x302   : > { %773 = vmax.xlane.f32.xlu0 %v772_v58 }
 0x38b   : > { %v771_v59 = vpop.xlane.xlu1 %770 }
 0x38c   : > { %v775_v60 = vsub.f32 %v759_v53, %v771_v59 }
 0x38e   : > { %v777_v61 = vmul.f32 1.442695, %v775_v60 }
 0x38f   : > { %v774_v62 = vpop.xlane.xlu0 %773 }
 0x390   : > { %3129 = vpow2.f32 %v777_v61  ;;  %v776_v63 = vsub.f32 %v764_v56, %v774_v62 }
 0x392   : > { %v779_v1 = vmul.f32 1.442695, %v776_v63 }
 0x394   : > { %3131 = vpow2.f32 %v779_v1 }
 0x39a   : > { %v3130_v2 = vpop.eup %3129 }
 0x39b   : > { %v781_v3 = vsel %vm768_vm1, %v3130_v2, 0.0 }
 0x39c   : > { %782 = vadd.xlane.f32.xlu1 %v781_v3 }
 0x39e   : > { %v3132_v4 = vpop.eup %3131 }
 0x39f   : > { %v784_v5 = vsel %vm768_vm1, %v3132_v4, 0.0 }
 0x3a0   : > { %785 = vadd.xlane.f32.xlu1 %v784_v5 }
 0x3b1   : > { %892 = vperm.xlu1 %3120, %v887_v6  }
 0x429   : > { %v783_v7 = vpop.xlane.xlu1 %782 }
 0x42a   : > { %3133 = vrcp.f32 %v783_v7 }
 0x42d   : > { %v786_v8 = vpop.xlane.xlu1 %785 }
 0x42e   : > { %3135 = vrcp.f32 %v786_v8 }
 0x431   : > { %v893_v29 = vpop.permute.xlu1 %892 }
 0x434   : > { %v3134_v9 = vpop.eup %3133 }
 0x435   : > { %v789_v10 = vmul.f32 %v3134_v9, %v3130_v2 }
 0x437   : > { %2922 = vmatmul.mubr.msk.f32.vlgmr.msra.gmra.mrb[10].mxu0 %vm768_vm1, %v789_v10 }
 0x438   : > { %v3136_v11 = vpop.eup %3135  ;;  %868 = vmatprep.mubr.f32.mxu0 %v4560_v0 }
 0x439   : > { %v790_v12 = vmul.f32 %v3136_v11, %v3132_v4 }
 0x43b   : > { %2923 = vmatmul.mubr.msk.f32.gmra.mrb[12].mxu0 %vm768_vm1, %v790_v12 }
 0x43c   : > { %978 = vmatprep.mubr.f32.mxu0 %v4560_v0 }
 0x50a   : > { %v864_v13 = vpop.f32.mrb[10].mxu0 }
 0x50b   : > { %v866_v15 = vpop.f32.mrb[11].mxu0  ;;  %v876_v18 = vmul.f32 %v875_v14, %v864_v13 }
 0x50c   : > { %v877_v16 = vmul.f32 %v875_v14, %v866_v15 }
 0x50d   : > { %v3540_v25 = vadd.f32 %v876_v18, %v3515_v48 }
 0x50e   : > { %v870_v17 = vpop.f32.mrb[12].mxu0  ;;  %v3535_v23 = vadd.f32 %v877_v16, %v3512_v43 }
 0x50f   : > { %v878_v19 = vmul.f32 %v875_v14, %v870_v17  ;;  %v872_v20 = vpop.f32.mrb[13].mxu0  ;;  %4599 = vst [vmem:[#allocation8_spill] sm:$0xff] %v3540_v25 }
 0x510   : > { %v879_v21 = vmul.f32 %v875_v14, %v872_v20  ;;  %4597 = vst [vmem:[#allocation6_spill] sm:$0xff] %v3535_v23 }
 0x511   : > { %v3532_v22 = vadd.f32 %v878_v19, %v691_v49 }
 0x512   : > { %v3537_v24 = vadd.f32 %v879_v21, %v692_v50 }
 0x513   : > { %4596 = vst [vmem:[#allocation5_spill] sm:$0xff] %v3532_v22  ;;  %v2990_v27 = vpack.c.bf16 %v3532_v22, %v3540_v25 }
 0x514   : > { %4598 = vst [vmem:[#allocation7_spill] sm:$0xff] %v3537_v24  ;;  %v2988_v26 = vpack.c.bf16 %v3537_v24, %v3535_v23 }
 0x516   : > { %2989 = vmatprep.subr.bf16.mxu0 %v2988_v26 }
 0x517   : > { %2991 = vmatpush1.bf16.msra.mxu0 %v2990_v27 }
 0x51a   : > { %2924 = vmatmul.mubr.msk.f32.vlgmr.msra.gmra.mrb[14].mxu0 %vm768_vm1, %v884_v28 }
 0x51b   : > { %984 = vmatprep.mubr.f32.mxu0 %v4560_v0 }
 0x5ed   : > { %v980_v30 = vpop.f32.mrb[14].mxu0 }
 0x5ee   : > { %v3551_v31 = vadd.f32 %v980_v30, %v893_v29  ;;  %v982_v32 = vpop.f32.mrb[15].mxu0 }
 0x5ef   : > { %v3553_v33 = vadd.f32 %v982_v32, %v893_v29 }
 0x5f0   : > { %4600 = vst [vmem:[#allocation9_spill] sm:$0xff] %v3551_v31  ;;  %997 = vxpose.xlu0.b32.start.end [1/1] (short) %v3551_v31, 128  ;;  %v1063_v35 = vrot.slane %v3551_v31, 2 }
 0x5f1   : > { %4601 = vst [vmem:[#allocation10_spill] sm:$0xff] %v3553_v33  ;;  %1029 = vxpose.xlu1.b32.start.end [1/1] (short) %v3553_v33, 128  ;;  %v1064_v34 = vrot.slane %v3553_v33, 2 }
 0x5f3   : > { %2927 = vmatprep.subr.msk.mxu1 %vm1162_vm2, %v1064_v34 }
 0x5f4   : > { %2928 = vmatpush1.msk.msra.mxu1 %vm1162_vm2, %v1063_v35 }
 0x670   : > { %v1013_v36 = vpop.trf.xlu0 }
 0x671   : > { %2929 = vmatmul.mubr.msk.f32.vlgmr.msra.gmra.mrb[0].mxu1 %vm1065_vm3, %v1013_v36  ;;  %v1045_v45 = vpop.trf.xlu1 }
 0x672   : > { %1237 = vmatprep.mubr.f32.mxu1 %v4560_v0 }
 0x674   : > { %v1014_v37 = vpop.trf.xlu0 }
 0x675   : > { %2930 = vmatmul.mubr.msk.f32.gmra.mrb[2].mxu1 %vm1065_vm3, %v1014_v37  ;;  %v1046_v48 = vpop.trf.xlu1 }
 0x676   : > { %1243 = vmatprep.mubr.f32.mxu1 %v4560_v0 }
 0x678   : > { %v1015_v38 = vpop.trf.xlu0 }
 0x679   : > { %2931 = vmatmul.mubr.msk.f32.gmra.mrb[4].mxu1 %vm1065_vm3, %v1015_v38  ;;  %v1047_v50 = vpop.trf.xlu1 }
 0x67a   : > { %1249 = vmatprep.mubr.f32.mxu1 %v4560_v0 }
 0x67c   : > { %v1016_v39 = vpop.trf.xlu0 }
 0x67d   : > { %2932 = vmatmul.mubr.msk.f32.gmra.mrb[6].mxu1 %vm1065_vm3, %v1016_v39  ;;  %v1048_v53 = vpop.trf.xlu1 }
 0x67e   : > { %1255 = vmatprep.mubr.f32.mxu1 %v4560_v0 }
 0x680   : > { %v1017_v40 = vpop.trf.xlu0 }
 0x681   : > { %2933 = vmatmul.mubr.msk.f32.gmra.mrb[8].mxu1 %vm1065_vm3, %v1017_v40  ;;  %v1049_v55 = vpop.trf.xlu1 }
 0x682   : > { %1261 = vmatprep.mubr.f32.mxu1 %v4560_v0 }
 0x684   : > { %v1018_v41 = vpop.trf.xlu0 }
 0x685   : > { %2934 = vmatmul.mubr.msk.f32.gmra.mrb[10].mxu1 %vm1065_vm3, %v1018_v41  ;;  %v1050_v57 = vpop.trf.xlu1 }
 0x686   : > { %1267 = vmatprep.mubr.f32.mxu1 %v4560_v0 }
 0x688   : > { %v1019_v42 = vpop.trf.xlu0 }
 0x689   : > { %2935 = vmatmul.mubr.msk.f32.gmra.mrb[12].mxu1 %vm1065_vm3, %v1019_v42  ;;  %v1051_v58 = vpop.trf.xlu1 }
 0x68a   : > { %1273 = vmatprep.mubr.f32.mxu1 %v4560_v0 }
 0x68c   : > { %v1020_v43 = vpop.trf.xlu0 }
 0x68d   : > { %2936 = vmatmul.mubr.msk.f32.gmra.mrb[14].mxu1 %vm1065_vm3, %v1020_v43  ;;  %v1052_v59 = vpop.trf.xlu1 }
 0x68e   : > { %1279 = vmatprep.mubr.f32.mxu1 %v4560_v0 }
 0x690   : > { %v1021_v44 = vpop.trf.xlu0 }
 0x691   : > { %2937 = vmatmul.mubr.msk.f32.gmra.mrb[16].mxu1 %vm1065_vm3, %v1021_v44  ;;  %v1053_v60 = vpop.trf.xlu1 }
 0x692   : > { %1285 = vmatprep.mubr.f32.mxu1 %v4560_v0 }
 0x694   : > { %v1022_v46 = vpop.trf.xlu0 }
 0x695   : > { %2938 = vmatmul.mubr.msk.f32.gmra.mrb[18].mxu1 %vm1065_vm3, %v1022_v46  ;;  %v1054_v61 = vpop.trf.xlu1 }
 0x696   : > { %1291 = vmatprep.mubr.f32.mxu1 %v4560_v0 }
 0x698   : > { %v1023_v47 = vpop.trf.xlu0 }
 0x699   : > { %2939 = vmatmul.mubr.msk.f32.gmra.mrb[20].mxu1 %vm1065_vm3, %v1023_v47  ;;  %v1055_v62 = vpop.trf.xlu1 }
 0x69a   : > { %1297 = vmatprep.mubr.f32.mxu1 %v4560_v0 }
 0x69c   : > { %v1024_v49 = vpop.trf.xlu0 }
 0x69d   : > { %2940 = vmatmul.mubr.msk.f32.gmra.mrb[22].mxu1 %vm1065_vm3, %v1024_v49  ;;  %v1056_v63 = vpop.trf.xlu1 }
 0x69e   : > { %1303 = vmatprep.mubr.f32.mxu1 %v4560_v0 }
 0x6a0   : > { %v1025_v51 = vpop.trf.xlu0 }
 0x6a1   : > { %2941 = vmatmul.mubr.msk.f32.gmra.mrb[24].mxu1 %vm1065_vm3, %v1025_v51  ;;  %v1057_v1 = vpop.trf.xlu1 }
 0x6a2   : > { %1309 = vmatprep.mubr.f32.mxu1 %v4560_v0 }
 0x6a4   : > { %v1026_v52 = vpop.trf.xlu0 }
 0x6a5   : > { %2942 = vmatmul.mubr.msk.f32.gmra.mrb[26].mxu1 %vm1065_vm3, %v1026_v52  ;;  %v1058_v2 = vpop.trf.xlu1 }
 0x6a6   : > { %1315 = vmatprep.mubr.f32.mxu1 %v4560_v0 }
 0x6a8   : > { %v1027_v54 = vpop.trf.xlu0 }
 0x6a9   : > { %2943 = vmatmul.mubr.msk.f32.gmra.mrb[28].mxu1 %vm1065_vm3, %v1027_v54  ;;  %v1059_v3 = vpop.trf.xlu1 }
 0x6aa   : > { %1321 = vmatprep.mubr.f32.mxu1 %v4560_v0 }
 0x6ac   : > { %v1028_v56 = vpop.trf.xlu0 }
 0x6ad   : > { %2944 = vmatmul.mubr.msk.f32.gmra.mrb[30].mxu1 %vm1065_vm3, %v1028_v56  ;;  %v1060_v4 = vpop.trf.xlu1 }
 0x6ae   : > { %1327 = vmatprep.mubr.f32.mxu1 %v4560_v0 }
 0x6b1   : > { %2945 = vmatmul.mubr.msk.f32.gmra.mrb[32].mxu1 %vm1065_vm3, %v1045_v45 }
 0x6b2   : > { %1333 = vmatprep.mubr.f32.mxu1 %v4560_v0 }
 0x6b5   : > { %2946 = vmatmul.mubr.msk.f32.gmra.mrb[34].mxu1 %vm1065_vm3, %v1046_v48 }
 0x6b6   : > { %1339 = vmatprep.mubr.f32.mxu1 %v4560_v0 }
 0x6b9   : > { %2947 = vmatmul.mubr.msk.f32.gmra.mrb[36].mxu1 %vm1065_vm3, %v1047_v50 }
 0x6ba   : > { %1345 = vmatprep.mubr.f32.mxu1 %v4560_v0 }
 0x6bd   : > { %2948 = vmatmul.mubr.msk.f32.gmra.mrb[38].mxu1 %vm1065_vm3, %v1048_v53 }
 0x6be   : > { %1351 = vmatprep.mubr.f32.mxu1 %v4560_v0 }
 0x6c1   : > { %2949 = vmatmul.mubr.msk.f32.gmra.mrb[40].mxu1 %vm1065_vm3, %v1049_v55 }
 0x6c2   : > { %1357 = vmatprep.mubr.f32.mxu1 %v4560_v0 }
 0x6c5   : > { %2950 = vmatmul.mubr.msk.f32.gmra.mrb[42].mxu1 %vm1065_vm3, %v1050_v57 }
 0x6c6   : > { %1363 = vmatprep.mubr.f32.mxu1 %v4560_v0 }
 0x6c9   : > { %2951 = vmatmul.mubr.msk.f32.gmra.mrb[44].mxu1 %vm1065_vm3, %v1051_v58 }
 0x6ca   : > { %1369 = vmatprep.mubr.f32.mxu1 %v4560_v0 }
 0x6cd   : > { %2952 = vmatmul.mubr.msk.f32.gmra.mrb[46].mxu1 %vm1065_vm3, %v1052_v59 }
 0x6ce   : > { %1375 = vmatprep.mubr.f32.mxu1 %v4560_v0 }
 0x6d1   : > { %2953 = vmatmul.mubr.msk.f32.gmra.mrb[48].mxu1 %vm1065_vm3, %v1053_v60 }
 0x6d2   : > { %1381 = vmatprep.mubr.f32.mxu1 %v4560_v0 }
 0x6d5   : > { %2954 = vmatmul.mubr.msk.f32.gmra.mrb[50].mxu1 %vm1065_vm3, %v1054_v61 }
 0x6d6   : > { %1387 = vmatprep.mubr.f32.mxu1 %v4560_v0 }
 0x6d9   : > { %2955 = vmatmul.mubr.msk.f32.gmra.mrb[52].mxu1 %vm1065_vm3, %v1055_v62 }
 0x6da   : > { %1393 = vmatprep.mubr.f32.mxu1 %v4560_v0 }
 0x6dd   : > { %2956 = vmatmul.mubr.msk.f32.gmra.mrb[54].mxu1 %vm1065_vm3, %v1056_v63 }
 0x6de   : > { %1399 = vmatprep.mubr.f32.mxu1 %v4560_v0 }
 0x6e1   : > { %2957 = vmatmul.mubr.msk.f32.gmra.mrb[56].mxu1 %vm1065_vm3, %v1057_v1 }
 0x6e2   : > { %1405 = vmatprep.mubr.f32.mxu1 %v4560_v0 }
 0x6e5   : > { %2958 = vmatmul.mubr.msk.f32.gmra.mrb[58].mxu1 %vm1065_vm3, %v1058_v2 }
 0x6e6   : > { %1411 = vmatprep.mubr.f32.mxu1 %v4560_v0 }
 0x6e9   : > { %2959 = vmatmul.mubr.msk.f32.gmra.mrb[60].mxu1 %vm1065_vm3, %v1059_v3 }
 0x6ea   : > { %1417 = vmatprep.mubr.f32.mxu1 %v4560_v0 }
 0x6ed   : > { %2960 = vmatmul.mubr.msk.f32.gmra.mrb[62].mxu1 %vm1065_vm3, %v1060_v4 }
 0x744   : > { %v3622_v5 = vpop.f32.mrb[0].mxu1 }
 0x745   : > { %v3624_v6 = vpop.f32.mrb[1].mxu1 }
 0x746   : > { %v1424_v7 = vmax.f32 %v3622_v5, %v3624_v6 }
 0x748   : > { %1425 = vmax.xlane.f32.xlu1 %v1424_v7  ;;  %v3628_v8 = vpop.f32.mrb[2].mxu1 }
 0x749   : > { %v3630_v9 = vpop.f32.mrb[3].mxu1 }
 0x74a   : > { %v1427_v10 = vmax.f32 %v3628_v8, %v3630_v9 }
 0x74c   : > { %1428 = vmax.xlane.f32.xlu0 %v1427_v10  ;;  %v3634_v11 = vpop.f32.mrb[4].mxu1 }
 0x74d   : > { %v3636_v12 = vpop.f32.mrb[5].mxu1 }
 0x74e   : > { %v1430_v13 = vmax.f32 %v3634_v11, %v3636_v12 }
 0x750   : > { %1431 = vmax.xlane.f32.xlu1 %v1430_v13  ;;  %v3640_v14 = vpop.f32.mrb[6].mxu1 }
 0x751   : > { %v3642_v15 = vpop.f32.mrb[7].mxu1 }
 0x752   : > { %v1433_v16 = vmax.f32 %v3640_v14, %v3642_v15 }
 0x754   : > { %1434 = vmax.xlane.f32.xlu1 %v1433_v16  ;;  %v3646_v17 = vpop.f32.mrb[8].mxu1 }
 0x755   : > { %v3648_v18 = vpop.f32.mrb[9].mxu1 }
 0x756   : > { %v1436_v19 = vmax.f32 %v3646_v17, %v3648_v18 }
 0x758   : > { %1437 = vmax.xlane.f32.xlu0 %v1436_v19  ;;  %v3652_v20 = vpop.f32.mrb[10].mxu1 }
 0x759   : > { %v3654_v21 = vpop.f32.mrb[11].mxu1 }
 0x75a   : > { %v1439_v26 = vmax.f32 %v3652_v20, %v3654_v21 }
 0x75c   : > { %1440 = vmax.xlane.f32.xlu1 %v1439_v26  ;;  %v3658_v27 = vpop.f32.mrb[12].mxu1 }
 0x75d   : > { %v3660_v28 = vpop.f32.mrb[13].mxu1 }
 0x75e   : > { %v1442_v29 = vmax.f32 %v3658_v27, %v3660_v28 }
 0x760   : > { %1443 = vmax.xlane.f32.xlu0 %v1442_v29  ;;  %v3664_v30 = vpop.f32.mrb[14].mxu1 }
 0x761   : > { %v3666_v32 = vpop.f32.mrb[15].mxu1 }
 0x762   : > { %v1445_v34 = vmax.f32 %v3664_v30, %v3666_v32 }
 0x764   : > { %1446 = vmax.xlane.f32.xlu1 %v1445_v34  ;;  %v3670_v35 = vpop.f32.mrb[16].mxu1 }
 0x765   : > { %v3672_v36 = vpop.f32.mrb[17].mxu1 }
 0x766   : > { %v1448_v37 = vmax.f32 %v3670_v35, %v3672_v36 }
 0x768   : > { %1449 = vmax.xlane.f32.xlu0 %v1448_v37  ;;  %v3676_v38 = vpop.f32.mrb[18].mxu1 }
 0x769   : > { %v3678_v39 = vpop.f32.mrb[19].mxu1 }
 0x76a   : > { %v1451_v40 = vmax.f32 %v3676_v38, %v3678_v39 }
 0x76c   : > { %1452 = vmax.xlane.f32.xlu1 %v1451_v40  ;;  %v3682_v41 = vpop.f32.mrb[20].mxu1 }
 0x76d   : > { %v3684_v42 = vpop.f32.mrb[21].mxu1 }
 0x76e   : > { %v1454_v43 = vmax.f32 %v3682_v41, %v3684_v42 }
 0x770   : > { %1455 = vmax.xlane.f32.xlu0 %v1454_v43  ;;  %v3688_v44 = vpop.f32.mrb[22].mxu1 }
 0x771   : > { %v3690_v45 = vpop.f32.mrb[23].mxu1 }
 0x772   : > { %v1457_v46 = vmax.f32 %v3688_v44, %v3690_v45 }
 0x774   : > { %1458 = vmax.xlane.f32.xlu1 %v1457_v46  ;;  %v3694_v47 = vpop.f32.mrb[24].mxu1 }
 0x775   : > { %v3696_v48 = vpop.f32.mrb[25].mxu1 }
 0x776   : > { %v1460_v49 = vmax.f32 %v3694_v47, %v3696_v48 }
 0x778   : > { %1461 = vmax.xlane.f32.xlu0 %v1460_v49  ;;  %v3700_v50 = vpop.f32.mrb[26].mxu1 }
 0x779   : > { %v3702_v51 = vpop.f32.mrb[27].mxu1 }
 0x77a   : > { %v1463_v52 = vmax.f32 %v3700_v50, %v3702_v51 }
 0x77c   : > { %1464 = vmax.xlane.f32.xlu1 %v1463_v52  ;;  %v3706_v53 = vpop.f32.mrb[28].mxu1 }
 0x77d   : > { %v3708_v54 = vpop.f32.mrb[29].mxu1 }
 0x77e   : > { %v1466_v55 = vmax.f32 %v3706_v53, %v3708_v54 }
 0x780   : > { %1467 = vmax.xlane.f32.xlu0 %v1466_v55  ;;  %v3712_v56 = vpop.f32.mrb[30].mxu1 }
 0x781   : > { %v3714_v57 = vpop.f32.mrb[31].mxu1 }
 0x782   : > { %v1469_v58 = vmax.f32 %v3712_v56, %v3714_v57 }
 0x784   : > { %1470 = vmax.xlane.f32.xlu1 %v1469_v58  ;;  %v3718_v59 = vpop.f32.mrb[32].mxu1 }
 0x785   : > { %v3720_v60 = vpop.f32.mrb[33].mxu1 }
 0x786   : > { %v1472_v61 = vmax.f32 %v3718_v59, %v3720_v60 }
 0x788   : > { %1473 = vmax.xlane.f32.xlu0 %v1472_v61  ;;  %v3724_v62 = vpop.f32.mrb[34].mxu1 }
 0x789   : > { %v3726_v63 = vpop.f32.mrb[35].mxu1 }
 0x78a   : > { %4602 = vst [vmem:[#allocation11_spill] sm:$0xff] %v3726_v63  ;;  %v1475_v1 = vmax.f32 %v3724_v62, %v3726_v63 }
 0x78c   : > { %1476 = vmax.xlane.f32.xlu1 %v1475_v1  ;;  %v3730_v2 = vpop.f32.mrb[36].mxu1 }
 0x78d   : > { %4603 = vst [vmem:[#allocation12_spill] sm:$0xff] %v3730_v2  ;;  %v3732_v3 = vpop.f32.mrb[37].mxu1 }
 0x78e   : > { %4604 = vst [vmem:[#allocation13_spill] sm:$0xff] %v3732_v3  ;;  %v1478_v4 = vmax.f32 %v3730_v2, %v3732_v3 }
 0x790   : > { %1479 = vmax.xlane.f32.xlu0 %v1478_v4  ;;  %v3736_v7 = vpop.f32.mrb[38].mxu1 }
 0x791   : > { %4605 = vst [vmem:[#allocation14_spill] sm:$0xff] %v3736_v7  ;;  %v3738_v10 = vpop.f32.mrb[39].mxu1 }
 0x792   : > { %4606 = vst [vmem:[#allocation15_spill] sm:$0xff] %v3738_v10  ;;  %v1481_v13 = vmax.f32 %v3736_v7, %v3738_v10 }
 0x794   : > { %1482 = vmax.xlane.f32.xlu1 %v1481_v13  ;;  %v3742_v16 = vpop.f32.mrb[40].mxu1 }
 0x795   : > { %4607 = vst [vmem:[#allocation16_spill] sm:$0xff] %v3742_v16  ;;  %v3744_v19 = vpop.f32.mrb[41].mxu1 }
 0x796   : > { %4608 = vst [vmem:[#allocation17_spill] sm:$0xff] %v3744_v19  ;;  %v1484_v26 = vmax.f32 %v3742_v16, %v3744_v19 }
 0x798   : > { %1485 = vmax.xlane.f32.xlu0 %v1484_v26  ;;  %v3748_v29 = vpop.f32.mrb[42].mxu1 }
 0x799   : > { %4609 = vst [vmem:[#allocation18_spill] sm:$0xff] %v3748_v29  ;;  %v3750_v34 = vpop.f32.mrb[43].mxu1 }
 0x79a   : > { %4610 = vst [vmem:[#allocation19_spill] sm:$0xff] %v3750_v34  ;;  %v1487_v37 = vmax.f32 %v3748_v29, %v3750_v34  ;;  %v886_v34 = vld [vmem:[%s4551_s5 + $0x10] sm:$0xf] }
 0x79c   : > { %1488 = vmax.xlane.f32.xlu1 %v1487_v37  ;;  %v3754_v40 = vpop.f32.mrb[44].mxu1 }
 0x79d   : > { %4611 = vst [vmem:[#allocation20_spill] sm:$0xff] %v3754_v40  ;;  %v3756_v43 = vpop.f32.mrb[45].mxu1 }
 0x79e   : > { %4612 = vst [vmem:[#allocation21_spill] sm:$0xff] %v3756_v43  ;;  %v1490_v46 = vmax.f32 %v3754_v40, %v3756_v43  ;;  %v885_v40 = vld [vmem:[%s4551_s5 + $0x8] sm:$0xff] }
 0x79f   : > { %2925 = vmatmul.mubr.msk.f32.gmra.mrb[16].mxu0 %vm768_vm1, %v885_v40 }
 0x7a0   : > { %1491 = vmax.xlane.f32.xlu0 %v1490_v46  ;;  %v3760_v49 = vpop.f32.mrb[46].mxu1 }
 0x7a1   : > { %4613 = vst [vmem:[#allocation22_spill] sm:$0xff] %v3760_v49  ;;  %v3762_v52 = vpop.f32.mrb[47].mxu1 }
 0x7a2   : > { %4614 = vst [vmem:[#allocation23_spill] sm:$0xff] %v3762_v52  ;;  %v1493_v55 = vmax.f32 %v3760_v49, %v3762_v52 }
 0x7a4   : > { %1494 = vmax.xlane.f32.xlu1 %v1493_v55  ;;  %v3766_v58 = vpop.f32.mrb[48].mxu1  ;;  %v4615_v55 = vmov 0.0  }
 0x7a5   : > { %v3768_v61 = vpop.f32.mrb[49].mxu1  ;;  %990 = vmatprep.mubr.f32.mxu0 %v4615_v55 }
 0x7a6   : > { %2926 = vmatmul.mubr.msk.f32.gmra.mrb[18].mxu0 %vm768_vm1, %v886_v34 }
 0x7a7   : > { %2106 = vmatprep.mubr.f32.mxu0 %v4615_v55 }
 0x7a8   : > { %v3772_v4 = vpop.f32.mrb[50].mxu1 }
 0x7a9   : > { %v3774_v13 = vpop.f32.mrb[51].mxu1 }
 0x7ac   : > { %v3778_v37 = vpop.f32.mrb[52].mxu1 }
 0x7ad   : > { %v3780_v46 = vpop.f32.mrb[53].mxu1 }
 0x7b0   : > { %v3784_v0 = vpop.f32.mrb[54].mxu1 }
 0x7b1   : > { %v3786_v24 = vpop.f32.mrb[55].mxu1 }
 0x7b4   : > { %v3790_v22 = vpop.f32.mrb[56].mxu1 }
 0x7b5   : > { %v3792_v23 = vpop.f32.mrb[57].mxu1 }
 0x7b8   : > { %v3796_v25 = vpop.f32.mrb[58].mxu1 }
 0x7b9   : > { %v3798_v33 = vpop.f32.mrb[59].mxu1 }
 0x7bc   : > { %v3802_v31 = vpop.f32.mrb[60].mxu1 }
 0x7bd   : > { %v3804_v52 = vpop.f32.mrb[61].mxu1 }
 0x7c0   : > { %v3808_v49 = vpop.f32.mrb[62].mxu1 }
 0x7c1   : > { %v3810_v43 = vpop.f32.mrb[63].mxu1 }
 0x7d5   : > { %v1426_v1 = vpop.xlane.xlu1 %1425 }
 0x7d6   : > { %v1520_v29 = vsub.f32 %v3622_v5, %v1426_v1  ;;  %v1521_v26 = vsub.f32 %v3624_v6, %v1426_v1 }
 0x7d8   : > { %v1584_v19 = vmul.f32 1.442695, %v1520_v29  ;;  %v1586_v16 = vmul.f32 1.442695, %v1521_v26 }
 0x7d9   : > { %v1429_v10 = vpop.xlane.xlu0 %1428 }
 0x7da   : > { %3137 = vpow2.f32 %v1584_v19  ;;  %v1522_v40 = vsub.f32 %v3628_v8, %v1429_v10  ;;  %v1523_v7 = vsub.f32 %v3630_v9, %v1429_v10 }
 0x7db   : > { %3139 = vpow2.f32 %v1586_v16 }
 0x7dc   : > { %v1588_v3 = vmul.f32 1.442695, %v1522_v40  ;;  %v1590_v2 = vmul.f32 1.442695, %v1523_v7 }
 0x7dd   : > { %v1432_v63 = vpop.xlane.xlu1 %1431 }
 0x7de   : > { %3141 = vpow2.f32 %v1588_v3  ;;  %v1524_v34 = vsub.f32 %v3634_v11, %v1432_v63  ;;  %v1525_v55 = vsub.f32 %v3636_v12, %v1432_v63 }
 0x7df   : > { %3143 = vpow2.f32 %v1590_v2 }
 0x7e0   : > { %v1592_v5 = vmul.f32 1.442695, %v1524_v34  ;;  %v1594_v6 = vmul.f32 1.442695, %v1525_v55 }
 0x7e1   : > { %v1435_v29 = vpop.xlane.xlu1 %1434 }
 0x7e2   : > { %3145 = vpow2.f32 %v1592_v5  ;;  %v1526_v19 = vsub.f32 %v3640_v14, %v1435_v29  ;;  %v1527_v8 = vsub.f32 %v3642_v15, %v1435_v29 }
 0x7e3   : > { %3147 = vpow2.f32 %v1594_v6  ;;  %v4616_v6 = vmax.f32 %v3766_v58, %v3768_v61 }
 0x7e4   : > { %v3832_v9 = vpop.eup %3137  ;;  %v1596_v10 = vmul.f32 1.442695, %v1526_v19  ;;  %v1598_v7 = vmul.f32 1.442695, %v1527_v8 }
 0x7e5   : > { %v3834_v16 = vpop.eup %3139  ;;  %v1438_v3 = vpop.xlane.xlu0 %1437 }
 0x7e6   : > { %3149 = vpow2.f32 %v1596_v10  ;;  %v1528_v11 = vsub.f32 %v3646_v17, %v1438_v3  ;;  %v1529_v12 = vsub.f32 %v3648_v18, %v1438_v3  ;;  %v1712_v63 = vadd.f32 %v3834_v16, %v3832_v9 }
 0x7e7   : > { %3151 = vpow2.f32 %v1598_v7 }
 0x7e8   : > { %v3840_v14 = vpop.eup %3141  ;;  %v1600_v15 = vmul.f32 1.442695, %v1528_v11  ;;  %v1602_v2 = vmul.f32 1.442695, %v1529_v12  ;;  %1713 = vadd.xlane.f32.xlu0 %v1712_v63  ;;  %v4617_v11 = vmax.f32 %v3772_v4, %v3774_v13 }
 0x7e9   : > { %v3842_v1 = vpop.eup %3143  ;;  %v1441_v26 = vpop.xlane.xlu1 %1440 }
 0x7ea   : > { %3153 = vpow2.f32 %v1600_v15  ;;  %v1530_v55 = vsub.f32 %v3652_v20, %v1441_v26  ;;  %v1531_v40 = vsub.f32 %v3654_v21, %v1441_v26  ;;  %v1715_v17 = vadd.f32 %v3842_v1, %v3840_v14 }
 0x7eb   : > { %3155 = vpow2.f32 %v1602_v2 }
 0x7ec   : > { %v3848_v18 = vpop.eup %3145  ;;  %v1604_v34 = vmul.f32 1.442695, %v1530_v55  ;;  %v1606_v5 = vmul.f32 1.442695, %v1531_v40  ;;  %1716 = vadd.xlane.f32.xlu1 %v1715_v17  ;;  %1497 = vmax.xlane.f32.xlu0 %v4616_v6  ;;  %v4618_v40 = vmax.f32 %v3778_v37, %v3780_v46 }
 0x7ed   : > { %v3853_v29 = vpop.eup %3147  ;;  %v1444_v19 = vpop.xlane.xlu0 %1443 }
 0x7ee   : > { %3157 = vpow2.f32 %v1604_v34  ;;  %v1532_v20 = vsub.f32 %v3658_v27, %v1444_v19  ;;  %v1533_v21 = vsub.f32 %v3660_v28, %v1444_v19  ;;  %v1718_v8 = vadd.f32 %v3853_v29, %v3848_v18 }
 0x7ef   : > { %3159 = vpow2.f32 %v1606_v5 }
 0x7f0   : > { %v3859_v10 = vpop.eup %3149  ;;  %v1608_v7 = vmul.f32 1.442695, %v1532_v20  ;;  %v1610_v3 = vmul.f32 1.442695, %v1533_v21  ;;  %1719 = vadd.xlane.f32.xlu0 %v1718_v8  ;;  %1500 = vmax.xlane.f32.xlu1 %v4617_v11  ;;  %v4619_v21 = vmax.f32 %v3784_v0, %v3786_v24 }
 0x7f1   : > { %v3864_v12 = vpop.eup %3151  ;;  %v1447_v63 = vpop.xlane.xlu1 %1446 }
 0x7f2   : > { %3161 = vpow2.f32 %v1608_v7  ;;  %v1534_v27 = vsub.f32 %v3664_v30, %v1447_v63  ;;  %v1535_v28 = vsub.f32 %v3666_v32, %v1447_v63  ;;  %v1721_v15 = vadd.f32 %v3864_v12, %v3859_v10 }
 0x7f3   : > { %3163 = vpow2.f32 %v1610_v3 }
 0x7f4   : > { %v3870_v2 = vpop.eup %3153  ;;  %v1612_v26 = vmul.f32 1.442695, %v1534_v27  ;;  %v1614_v55 = vmul.f32 1.442695, %v1535_v28  ;;  %1722 = vadd.xlane.f32.xlu1 %v1721_v15  ;;  %1503 = vmax.xlane.f32.xlu0 %v4618_v40  ;;  %v4620_v28 = vmax.f32 %v3790_v22, %v3792_v23 }
 0x7f5   : > { %v3875_v17 = vpop.eup %3155  ;;  %v1450_v34 = vpop.xlane.xlu0 %1449 }
 0x7f6   : > { %3165 = vpow2.f32 %v1612_v26  ;;  %v1536_v30 = vsub.f32 %v3670_v35, %v1450_v34  ;;  %v1537_v32 = vsub.f32 %v3672_v36, %v1450_v34  ;;  %v1724_v5 = vadd.f32 %v3875_v17, %v3870_v2 }
 0x7f7   : > { %3167 = vpow2.f32 %v1614_v55 }
 0x7f8   : > { %v3881_v6 = vpop.eup %3157  ;;  %v1616_v19 = vmul.f32 1.442695, %v1536_v30  ;;  %v1618_v20 = vmul.f32 1.442695, %v1537_v32  ;;  %1725 = vadd.xlane.f32.xlu0 %v1724_v5  ;;  %1506 = vmax.xlane.f32.xlu1 %v4619_v21  ;;  %v4621_v32 = vmax.f32 %v3796_v25, %v3798_v33 }
 0x7f9   : > { %v3886_v8 = vpop.eup %3159  ;;  %v1453_v7 = vpop.xlane.xlu1 %1452 }
 0x7fa   : > { %3169 = vpow2.f32 %v1616_v19  ;;  %v1538_v35 = vsub.f32 %v3676_v38, %v1453_v7  ;;  %v1539_v36 = vsub.f32 %v3678_v39, %v1453_v7  ;;  %v1727_v3 = vadd.f32 %v3886_v8, %v3881_v6 }
 0x7fb   : > { %3171 = vpow2.f32 %v1618_v20 }
 0x7fc   : > { %v3892_v11 = vpop.eup %3161  ;;  %v1620_v63 = vmul.f32 1.442695, %v1538_v35  ;;  %v1622_v27 = vmul.f32 1.442695, %v1539_v36  ;;  %1728 = vadd.xlane.f32.xlu1 %v1727_v3  ;;  %1509 = vmax.xlane.f32.xlu0 %v4620_v28  ;;  %v4622_v36 = vmax.f32 %v3802_v31, %v3804_v52 }
 0x7fd   : > { %v3897_v15 = vpop.eup %3163  ;;  %v1456_v26 = vpop.xlane.xlu0 %1455 }
 0x7fe   : > { %3173 = vpow2.f32 %v1620_v63  ;;  %v1540_v38 = vsub.f32 %v3682_v41, %v1456_v26  ;;  %v1541_v39 = vsub.f32 %v3684_v42, %v1456_v26  ;;  %v1730_v55 = vadd.f32 %v3897_v15, %v3892_v11 }
 0x7ff   : > { %3175 = vpow2.f32 %v1622_v27 }
 0x800   : > { %v3903_v40 = vpop.eup %3165  ;;  %v1624_v34 = vmul.f32 1.442695, %v1540_v38  ;;  %v1626_v30 = vmul.f32 1.442695, %v1541_v39  ;;  %1731 = vadd.xlane.f32.xlu0 %v1730_v55  ;;  %1512 = vmax.xlane.f32.xlu1 %v4621_v32  ;;  %v4623_v39 = vmax.f32 %v3808_v49, %v3810_v43 }
 0x801   : > { %v3908_v5 = vpop.eup %3167  ;;  %v1459_v19 = vpop.xlane.xlu1 %1458 }
 0x802   : > { %3177 = vpow2.f32 %v1624_v34  ;;  %v1542_v41 = vsub.f32 %v3688_v44, %v1459_v19  ;;  %v1543_v42 = vsub.f32 %v3690_v45, %v1459_v19  ;;  %v1733_v20 = vadd.f32 %v3908_v5, %v3903_v40 }
 0x803   : > { %3179 = vpow2.f32 %v1626_v30 }
 0x804   : > { %v3914_v21 = vpop.eup %3169  ;;  %v1628_v7 = vmul.f32 1.442695, %v1542_v41  ;;  %v1630_v35 = vmul.f32 1.442695, %v1543_v42  ;;  %1734 = vadd.xlane.f32.xlu1 %v1733_v20  ;;  %1515 = vmax.xlane.f32.xlu0 %v4622_v36 }
 0x805   : > { %v3919_v3 = vpop.eup %3171  ;;  %v1462_v63 = vpop.xlane.xlu0 %1461 }
 0x806   : > { %3181 = vpow2.f32 %v1628_v7  ;;  %v1544_v44 = vsub.f32 %v3694_v47, %v1462_v63  ;;  %v1545_v45 = vsub.f32 %v3696_v48, %v1462_v63  ;;  %v1736_v27 = vadd.f32 %v3919_v3, %v3914_v21 }
 0x807   : > { %3183 = vpow2.f32 %v1630_v35 }
 0x808   : > { %v3925_v28 = vpop.eup %3173  ;;  %v1632_v26 = vmul.f32 1.442695, %v1544_v44  ;;  %v1634_v38 = vmul.f32 1.442695, %v1545_v45  ;;  %1737 = vadd.xlane.f32.xlu0 %v1736_v27  ;;  %1518 = vmax.xlane.f32.xlu1 %v4623_v39 }
 0x809   : > { %v3930_v55 = vpop.eup %3175  ;;  %v1465_v34 = vpop.xlane.xlu1 %1464 }
 0x80a   : > { %3185 = vpow2.f32 %v1632_v26  ;;  %v1546_v47 = vsub.f32 %v3700_v50, %v1465_v34  ;;  %v1547_v48 = vsub.f32 %v3702_v51, %v1465_v34  ;;  %v1739_v30 = vadd.f32 %v3930_v55, %v3925_v28 }
 0x80b   : > { %3187 = vpow2.f32 %v1634_v38 }
 0x80c   : > { %v3936_v32 = vpop.eup %3177  ;;  %v1636_v19 = vmul.f32 1.442695, %v1546_v47  ;;  %v1638_v41 = vmul.f32 1.442695, %v1547_v48  ;;  %1740 = vadd.xlane.f32.xlu1 %v1739_v30 }
 0x80d   : > { %v3938_v42 = vpop.eup %3179  ;;  %v1468_v20 = vpop.xlane.xlu0 %1467 }
 0x80e   : > { %3189 = vpow2.f32 %v1636_v19  ;;  %v1548_v7 = vsub.f32 %v3706_v53, %v1468_v20  ;;  %v1549_v35 = vsub.f32 %v3708_v54, %v1468_v20  ;;  %v1742_v50 = vadd.f32 %v3938_v42, %v3936_v32 }
 0x80f   : > { %3191 = vpow2.f32 %v1638_v41 }
 0x810   : > { %v3944_v51 = vpop.eup %3181  ;;  %v1640_v36 = vmul.f32 1.442695, %v1548_v7  ;;  %v1642_v63 = vmul.f32 1.442695, %v1549_v35  ;;  %1743 = vadd.xlane.f32.xlu0 %v1742_v50  ;;  %v4624_v50 = vld [vmem:[#allocation11_spill] sm:$0xff] }
 0x811   : > { %v3946_v44 = vpop.eup %3183  ;;  %v1471_v45 = vpop.xlane.xlu1 %1470 }
 0x812   : > { %3193 = vpow2.f32 %v1640_v36  ;;  %v1550_v27 = vsub.f32 %v3712_v56, %v1471_v45  ;;  %v1551_v26 = vsub.f32 %v3714_v57, %v1471_v45  ;;  %v1745_v53 = vadd.f32 %v3946_v44, %v3944_v51 }
 0x813   : > { %3195 = vpow2.f32 %v1642_v63 }
 0x814   : > { %v3952_v54 = vpop.eup %3185  ;;  %v1644_v38 = vmul.f32 1.442695, %v1550_v27  ;;  %v1646_v39 = vmul.f32 1.442695, %v1551_v26  ;;  %1746 = vadd.xlane.f32.xlu1 %v1745_v53  ;;  %v4626_v53 = vld [vmem:[#allocation12_spill] sm:$0xff] }
 0x815   : > { %v3954_v34 = vpop.eup %3187  ;;  %v1474_v47 = vpop.xlane.xlu0 %1473 }
 0x816   : > { %3197 = vpow2.f32 %v1644_v38  ;;  %v1552_v48 = vsub.f32 %v3718_v59, %v1474_v47  ;;  %v1553_v30 = vsub.f32 %v3720_v60, %v1474_v47  ;;  %v1748_v56 = vadd.f32 %v3954_v34, %v3952_v54 }
 0x817   : > { %3199 = vpow2.f32 %v1646_v39  ;;  %v4627_v39 = vld [vmem:[#allocation13_spill] sm:$0xff] }
 0x818   : > { %v3960_v57 = vpop.eup %3189  ;;  %v1648_v19 = vmul.f32 1.442695, %v1552_v48  ;;  %v1650_v41 = vmul.f32 1.442695, %v1553_v30  ;;  %1749 = vadd.xlane.f32.xlu0 %v1748_v56 }
 0x819   : > { %v3962_v20 = vpop.eup %3191  ;;  %v1477_v7 = vpop.xlane.xlu1 %1476 }
 0x81a   : > { %3201 = vpow2.f32 %v1648_v19  ;;  %v1554_v35 = vsub.f32 %v3724_v62, %v1477_v7  ;;  %v1555_v36 = vsub.f32 %v4624_v50, %v1477_v7  ;;  %v1751_v59 = vadd.f32 %v3962_v20, %v3960_v57  ;;  %v4629_v7 = vld [vmem:[#allocation14_spill] sm:$0xff]  ;;  %v4630_v50 = vld [vmem:[#allocation15_spill] sm:$0xff] }
 0x81b   : > { %3203 = vpow2.f32 %v1650_v41 }
 0x81c   : > { %v3968_v60 = vpop.eup %3193  ;;  %v1652_v63 = vmul.f32 1.442695, %v1554_v35  ;;  %v1654_v45 = vmul.f32 1.442695, %v1555_v36  ;;  %1752 = vadd.xlane.f32.xlu1 %v1751_v59 }
 0x81d   : > { %4625 = vst [vmem:[#allocation11_spill] sm:$0xff] %v3968_v60  ;;  %v3970_v27 = vpop.eup %3195  ;;  %v1480_v26 = vpop.xlane.xlu0 %1479 }
 0x81e   : > { %3205 = vpow2.f32 %v1652_v63  ;;  %v1556_v38 = vsub.f32 %v4626_v53, %v1480_v26  ;;  %v1557_v47 = vsub.f32 %v4627_v39, %v1480_v26  ;;  %v1754_v62 = vadd.f32 %v3970_v27, %v3968_v60  ;;  %v4633_v39 = vld [vmem:[#allocation16_spill] sm:$0xff] }
 0x81f   : > { %3207 = vpow2.f32 %v1654_v45 }
 0x820   : > { %v3976_v48 = vpop.eup %3197  ;;  %v1656_v30 = vmul.f32 1.442695, %v1556_v38  ;;  %v1658_v56 = vmul.f32 1.442695, %v1557_v47  ;;  %1755 = vadd.xlane.f32.xlu0 %v1754_v62  ;;  %v4634_v62 = vld [vmem:[#allocation17_spill] sm:$0xff] }
 0x821   : > { %4628 = vst [vmem:[#allocation12_spill] sm:$0xff] %v3976_v48  ;;  %v3978_v19 = vpop.eup %3199  ;;  %v1483_v41 = vpop.xlane.xlu1 %1482 }
 0x822   : > { %3209 = vpow2.f32 %v1656_v30  ;;  %v1558_v35 = vsub.f32 %v4629_v7, %v1483_v41  ;;  %v1559_v36 = vsub.f32 %v4630_v50, %v1483_v41  ;;  %v1757_v59 = vadd.f32 %v3978_v19, %v3976_v48 }
 0x823   : > { %3211 = vpow2.f32 %v1658_v56 }
 0x824   : > { %v3984_v63 = vpop.eup %3201  ;;  %v1660_v45 = vmul.f32 1.442695, %v1558_v35  ;;  %v1662_v26 = vmul.f32 1.442695, %v1559_v36  ;;  %1758 = vadd.xlane.f32.xlu1 %v1757_v59  ;;  %v4637_v59 = vld [vmem:[#allocation18_spill] sm:$0xff] }
 0x825   : > { %4631 = vst [vmem:[#allocation13_spill] sm:$0xff] %v3984_v63  ;;  %v3986_v53 = vpop.eup %3203  ;;  %v1486_v38 = vpop.xlane.xlu0 %1485 }
 0x826   : > { %4632 = vst [vmem:[#allocation14_spill] sm:$0xff] %v3986_v53  ;;  %3213 = vpow2.f32 %v1660_v45  ;;  %v1560_v47 = vsub.f32 %v4633_v39, %v1486_v38  ;;  %v1561_v30 = vsub.f32 %v4634_v62, %v1486_v38  ;;  %v1760_v41 = vadd.f32 %v3986_v53, %v3984_v63  ;;  %v4638_v45 = vld [vmem:[#allocation19_spill] sm:$0xff] }
 0x827   : > { %3215 = vpow2.f32 %v1662_v26 }
 0x828   : > { %v3992_v7 = vpop.eup %3205  ;;  %v1664_v56 = vmul.f32 1.442695, %v1560_v47  ;;  %v1666_v50 = vmul.f32 1.442695, %v1561_v30  ;;  %1761 = vadd.xlane.f32.xlu0 %v1760_v41  ;;  %v4639_v41 = vld [vmem:[#allocation20_spill] sm:$0xff] }
 0x829   : > { %4635 = vst [vmem:[#allocation15_spill] sm:$0xff] %v3992_v7  ;;  %v3994_v35 = vpop.eup %3207  ;;  %v1489_v36 = vpop.xlane.xlu1 %1488 }
 0x82a   : > { %4636 = vst [vmem:[#allocation16_spill] sm:$0xff] %v3994_v35  ;;  %3217 = vpow2.f32 %v1664_v56  ;;  %v1562_v60 = vsub.f32 %v4637_v59, %v1489_v36  ;;  %v1563_v48 = vsub.f32 %v4638_v45, %v1489_v36  ;;  %v1763_v38 = vadd.f32 %v3994_v35, %v3992_v7  ;;  %v4640_v56 = vld [vmem:[#allocation21_spill] sm:$0xff] }
 0x82b   : > { %3219 = vpow2.f32 %v1666_v50 }
 0x82c   : > { %v4000_v39 = vpop.eup %3209  ;;  %v1668_v26 = vmul.f32 1.442695, %v1562_v60  ;;  %v1670_v62 = vmul.f32 1.442695, %v1563_v48  ;;  %1764 = vadd.xlane.f32.xlu1 %v1763_v38  ;;  %v4641_v38 = vld [vmem:[#allocation22_spill] sm:$0xff] }
 0x82d   : > { %v4002_v47 = vpop.eup %3211  ;;  %v1492_v30 = vpop.xlane.xlu0 %1491 }
 0x82e   : > { %3221 = vpow2.f32 %v1668_v26  ;;  %v1564_v63 = vsub.f32 %v4639_v41, %v1492_v30  ;;  %v1565_v53 = vsub.f32 %v4640_v56, %v1492_v30  ;;  %v1766_v36 = vadd.f32 %v4002_v47, %v4000_v39  ;;  %v4642_v26 = vld [vmem:[#allocation23_spill] sm:$0xff] }
 0x82f   : > { %3223 = vpow2.f32 %v1670_v62 }
 0x830   : > { %v4008_v59 = vpop.eup %3213  ;;  %v1672_v50 = vmul.f32 1.442695, %v1564_v63  ;;  %v1674_v45 = vmul.f32 1.442695, %v1565_v53  ;;  %1767 = vadd.xlane.f32.xlu0 %v1766_v36 }
 0x831   : > { %v4010_v60 = vpop.eup %3215  ;;  %v1495_v48 = vpop.xlane.xlu1 %1494 }
 0x832   : > { %3225 = vpow2.f32 %v1672_v50  ;;  %v1566_v7 = vsub.f32 %v4641_v38, %v1495_v48  ;;  %v1567_v35 = vsub.f32 %v4642_v26, %v1495_v48  ;;  %v1769_v30 = vadd.f32 %v4010_v60, %v4008_v59 }
 0x833   : > { %3227 = vpow2.f32 %v1674_v45 }
 0x834   : > { %v4016_v41 = vpop.eup %3217  ;;  %v1676_v62 = vmul.f32 1.442695, %v1566_v7  ;;  %v1678_v56 = vmul.f32 1.442695, %v1567_v35  ;;  %1770 = vadd.xlane.f32.xlu1 %v1769_v30 }
 0x835   : > { %4643 = vst [vmem:[#allocation17_spill] sm:$0xff] %v4016_v41  ;;  %v4018_v63 = vpop.eup %3219 }
 0x836   : > { %4644 = vst [vmem:[#allocation18_spill] sm:$0xff] %v4018_v63  ;;  %3229 = vpow2.f32 %v1676_v62  ;;  %v1772_v53 = vadd.f32 %v4018_v63, %v4016_v41 }
 0x837   : > { %3231 = vpow2.f32 %v1678_v56 }
 0x838   : > { %v4022_v36 = vpop.eup %3221  ;;  %1773 = vadd.xlane.f32.xlu0 %v1772_v53 }
 0x839   : > { %4645 = vst [vmem:[#allocation19_spill] sm:$0xff] %v4022_v36  ;;  %v4024_v50 = vpop.eup %3223 }
 0x83a   : > { %4646 = vst [vmem:[#allocation20_spill] sm:$0xff] %v4024_v50  ;;  %v1775_v45 = vadd.f32 %v4024_v50, %v4022_v36 }
 0x83c   : > { %v4028_v48 = vpop.eup %3225  ;;  %1776 = vadd.xlane.f32.xlu1 %v1775_v45 }
 0x83d   : > { %4647 = vst [vmem:[#allocation21_spill] sm:$0xff] %v4028_v48  ;;  %v4030_v7 = vpop.eup %3227 }
 0x83e   : > { %4648 = vst [vmem:[#allocation22_spill] sm:$0xff] %v4030_v7  ;;  %v1778_v35 = vadd.f32 %v4030_v7, %v4028_v48 }
 0x840   : > { %v4034_v38 = vpop.eup %3229  ;;  %1779 = vadd.xlane.f32.xlu0 %v1778_v35 }
 0x841   : > { %4649 = vst [vmem:[#allocation23_spill] sm:$0xff] %v4034_v38  ;;  %v4036_v26 = vpop.eup %3231 }
 0x842   : > { %4650 = vst [vmem:[#allocation24_spill] sm:$0xff] %v4036_v26  ;;  %v1781_v30 = vadd.f32 %v4036_v26, %v4034_v38 }
 0x844   : > { %1782 = vadd.xlane.f32.xlu1 %v1781_v30 }
 0x875   : > { %v1714_v62 = vpop.xlane.xlu0 %1713 }
 0x876   : > { %3233 = vrcp.f32 %v1714_v62 }
 0x879   : > { %v1717_v56 = vpop.xlane.xlu1 %1716  ;;  %v1498_v53 = vpop.xlane.xlu0 %1497 }
 0x87a   : > { %3235 = vrcp.f32 %v1717_v56  ;;  %v1568_v45 = vsub.f32 %v3766_v58, %v1498_v53  ;;  %v1569_v41 = vsub.f32 %v3768_v61, %v1498_v53 }
 0x87c   : > { %v1680_v36 = vmul.f32 1.442695, %v1568_v45  ;;  %v1682_v48 = vmul.f32 1.442695, %v1569_v41 }
 0x87d   : > { %v1720_v7 = vpop.xlane.xlu0 %1719  ;;  %v1501_v50 = vpop.xlane.xlu1 %1500 }
 0x87e   : > { %3237 = vpow2.f32 %v1680_v36  ;;  %v1570_v35 = vsub.f32 %v3772_v4, %v1501_v50  ;;  %v1571_v63 = vsub.f32 %v3774_v13, %v1501_v50 }
 0x87f   : > { %3239 = vpow2.f32 %v1682_v48 }
 0x880   : > { %3241 = vrcp.f32 %v1720_v7  ;;  %v1684_v30 = vmul.f32 1.442695, %v1570_v35  ;;  %v1686_v62 = vmul.f32 1.442695, %v1571_v63  ;;  %v3234_v56 = vpop.eup %3233 }
 0x881   : > { %v1723_v38 = vpop.xlane.xlu1 %1722  ;;  %v1504_v26 = vpop.xlane.xlu0 %1503  ;;  %v1841_v13 = vmul.f32 %v3234_v56, %v3834_v16  ;;  %v1840_v63 = vmul.f32 %v3234_v56, %v3832_v9 }
 0x882   : > { %3243 = vpow2.f32 %v1684_v30  ;;  %v1572_v58 = vsub.f32 %v3778_v37, %v1504_v26  ;;  %v1573_v61 = vsub.f32 %v3780_v46, %v1504_v26 }
 0x883   : > { %3245 = vpow2.f32 %v1686_v62 }
 0x884   : > { %v3236_v41 = vpop.eup %3235  ;;  %3247 = vrcp.f32 %v1723_v38  ;;  %v1688_v36 = vmul.f32 1.442695, %v1572_v58  ;;  %v1690_v53 = vmul.f32 1.442695, %v1573_v61 }
 0x885   : > { %v1726_v4 = vpop.xlane.xlu0 %1725  ;;  %v1507_v45 = vpop.xlane.xlu1 %1506  ;;  %v1843_v50 = vmul.f32 %v3236_v41, %v3842_v1  ;;  %v1842_v48 = vmul.f32 %v3236_v41, %v3840_v14 }
 0x886   : > { %3249 = vpow2.f32 %v1688_v36  ;;  %v1574_v37 = vsub.f32 %v3784_v0, %v1507_v45  ;;  %v1575_v46 = vsub.f32 %v3786_v24, %v1507_v45 }
 0x887   : > { %3251 = vpow2.f32 %v1690_v53  ;;  %v2992_v7 = vpack.c.bf16 %v1843_v50, %v1841_v13  ;;  %v2994_v38 = vpack.c.bf16 %v1842_v48, %v1840_v63 }
 0x888   : > { %v4052_v26 = vpop.eup %3237  ;;  %3253 = vrcp.f32 %v1726_v4  ;;  %v1692_v35 = vmul.f32 1.442695, %v1574_v37  ;;  %v1694_v30 = vmul.f32 1.442695, %v1575_v46 }
 0x889   : > { %v4054_v16 = vpop.eup %3239  ;;  %2993 = vmatprep.subr.bf16.mxu1 %v2992_v7  ;;  %v1729_v1 = vpop.xlane.xlu1 %1728 }
 0x88a   : > { %v1510_v9 = vpop.xlane.xlu0 %1509  ;;  %v3242_v62 = vpop.eup %3241  ;;  %3255 = vpow2.f32 %v1692_v35  ;;  %2995 = vmatpush1.bf16.xpose.msra.mxu1 %v2994_v38  ;;  %v1784_v24 = vadd.f32 %v4054_v16, %v4052_v26 }
 0x88b   : > { %v1576_v14 = vsub.f32 %v3790_v22, %v1510_v9  ;;  %v1577_v0 = vsub.f32 %v3792_v23, %v1510_v9  ;;  %3257 = vpow2.f32 %v1694_v30  ;;  %v1845_v4 = vmul.f32 %v3242_v62, %v3853_v29 }
 0x88c   : > { %v4060_v56 = vpop.eup %3243  ;;  %3259 = vrcp.f32 %v1729_v1  ;;  %1785 = vadd.xlane.f32.xlu0 %v1784_v24  ;;  %v1844_v63 = vmul.f32 %v3242_v62, %v3848_v18 }
 0x88d   : > { %v1696_v58 = vmul.f32 1.442695, %v1576_v14  ;;  %v1698_v61 = vmul.f32 1.442695, %v1577_v0  ;;  %v4062_v41 = vpop.eup %3245  ;;  %v1513_v53 = vpop.xlane.xlu1 %1512 }
 0x88e   : > { %v1732_v36 = vpop.xlane.xlu0 %1731  ;;  %v3248_v22 = vpop.eup %3247  ;;  %v1578_v23 = vsub.f32 %v3796_v25, %v1513_v53  ;;  %v1579_v45 = vsub.f32 %v3798_v33, %v1513_v53  ;;  %v1787_v13 = vadd.f32 %v4062_v41, %v4060_v56 }
 0x88f   : > { %3261 = vpow2.f32 %v1696_v58  ;;  %v1847_v50 = vmul.f32 %v3248_v22, %v3864_v12  ;;  %v1846_v48 = vmul.f32 %v3248_v22, %v3859_v10 }
 0x890   : > { %3263 = vpow2.f32 %v1698_v61  ;;  %v4072_v37 = vpop.eup %3249  ;;  %v1700_v46 = vmul.f32 1.442695, %v1578_v23  ;;  %v1702_v29 = vmul.f32 1.442695, %v1579_v45  ;;  %1788 = vadd.xlane.f32.xlu1 %v1787_v13 }
 0x891   : > { %v4074_v7 = vpop.eup %3251  ;;  %3265 = vrcp.f32 %v1732_v36  ;;  %v2996_v25 = vpack.c.bf16 %v1847_v50, %v1845_v4  ;;  %v1735_v33 = vpop.xlane.xlu1 %1734  ;;  %v2998_v35 = vpack.c.bf16 %v1846_v48, %v1844_v63 }
 0x892   : > { %v1516_v38 = vpop.xlane.xlu0 %1515  ;;  %v3254_v30 = vpop.eup %3253  ;;  %3267 = vpow2.f32 %v1700_v46  ;;  %v1790_v10 = vadd.f32 %v4074_v7, %v4072_v37 }
 0x893   : > { %v1580_v12 = vsub.f32 %v3802_v31, %v1516_v38  ;;  %v1581_v18 = vsub.f32 %v3804_v52, %v1516_v38  ;;  %3269 = vpow2.f32 %v1702_v29  ;;  %2997 = vmatprep.subr.bf16.mxu1 %v2996_v25  ;;  %v1849_v24 = vmul.f32 %v3254_v30, %v3875_v17 }
 0x894   : > { %v4080_v1 = vpop.eup %3255  ;;  %3271 = vrcp.f32 %v1735_v33  ;;  %2999 = vmatpush1.bf16.xpose.msra.mxu1 %v2998_v35  ;;  %1791 = vadd.xlane.f32.xlu0 %v1790_v10  ;;  %v1848_v4 = vmul.f32 %v3254_v30, %v3870_v2 }
 0x895   : > { %v1704_v9 = vmul.f32 1.442695, %v1580_v12  ;;  %v1706_v62 = vmul.f32 1.442695, %v1581_v18  ;;  %v4082_v14 = vpop.eup %3257  ;;  %v1519_v0 = vpop.xlane.xlu1 %1518 }
 0x896   : > { %v3260_v31 = vpop.eup %3259  ;;  %v1738_v52 = vpop.xlane.xlu0 %1737  ;;  %v1582_v58 = vsub.f32 %v3808_v49, %v1519_v0  ;;  %v1583_v61 = vsub.f32 %v3810_v43, %v1519_v0  ;;  %v1793_v36 = vadd.f32 %v4082_v14, %v4080_v1 }
 0x897   : > { %3273 = vpow2.f32 %v1704_v9  ;;  %v1851_v53 = vmul.f32 %v3260_v31, %v3886_v8  ;;  %v1850_v22 = vmul.f32 %v3260_v31, %v3881_v6 }
 0x898   : > { %3275 = vpow2.f32 %v1706_v62  ;;  %v1708_v17 = vmul.f32 1.442695, %v1582_v58  ;;  %v1710_v45 = vmul.f32 1.442695, %v1583_v61  ;;  %1794 = vadd.xlane.f32.xlu1 %v1793_v36 }
 0x899   : > { %v4092_v23 = vpop.eup %3261  ;;  %3277 = vrcp.f32 %v1738_v52  ;;  %v3000_v49 = vpack.c.bf16 %v1851_v53, %v1849_v24  ;;  %v1741_v43 = vpop.xlane.xlu1 %1740  ;;  %v3002_v50 = vpack.c.bf16 %v1850_v22, %v1848_v4 }
 0x89a   : > { %v4094_v13 = vpop.eup %3263  ;;  %3279 = vpow2.f32 %v1708_v17 }
 0x89b   : > { %v1796_v63 = vadd.f32 %v4094_v13, %v4092_v23  ;;  %v3266_v8 = vpop.eup %3265  ;;  %3281 = vpow2.f32 %v1710_v45  ;;  %3001 = vmatprep.subr.bf16.mxu1 %v3000_v49 }
 0x89c   : > { %v4098_v2 = vpop.eup %3267  ;;  %3283 = vrcp.f32 %v1741_v43  ;;  %3003 = vmatpush1.bf16.xpose.msra.mxu1 %v3002_v50  ;;  %v1853_v25 = vmul.f32 %v3266_v8, %v3897_v15  ;;  %v1852_v38 = vmul.f32 %v3266_v8, %v3892_v11 }
 0x89d   : > { %1797 = vadd.xlane.f32.xlu0 %v1796_v63  ;;  %v4100_v6 = vpop.eup %3269  ;;  %v1744_v48 = vpop.xlane.xlu0 %1743 }
 0x89e   : > { %v3272_v46 = vpop.eup %3271  ;;  %v1799_v29 = vadd.f32 %v4100_v6, %v4098_v2  ;;  %3285 = vrcp.f32 %v1744_v48 }
 0x89f   : > { %v1855_v33 = vmul.f32 %v3272_v46, %v3908_v5  ;;  %v1854_v35 = vmul.f32 %v3272_v46, %v3903_v40 }
 0x8a0   : > { %1800 = vadd.xlane.f32.xlu1 %v1799_v29  ;;  %v4135_v29 = vpop.f32.mrb[16].mxu0 }
 0x8a1   : > { %v4108_v30 = vpop.eup %3273  ;;  %v3004_v18 = vpack.c.bf16 %v1855_v33, %v1853_v25  ;;  %v1747_v10 = vpop.xlane.xlu1 %1746  ;;  %v3006_v9 = vpack.c.bf16 %v1854_v35, %v1852_v38  ;;  %v888_v25 = vld [vmem:[%s4552_s6 + $0x8] sm:$0xff] }
 0x8a2   : > { %v4110_v12 = vpop.eup %3275  ;;  %3287 = vrcp.f32 %v1747_v10  ;;  %v4140_v38 = vpop.f32.mrb[17].mxu0 }
 0x8a3   : > { %v1802_v62 = vadd.f32 %v4110_v12, %v4108_v30  ;;  %v3278_v15 = vpop.eup %3277  ;;  %3005 = vmatprep.subr.bf16.mxu1 %v3004_v18 }
 0x8a4   : > { %v4114_v5 = vpop.eup %3279  ;;  %3007 = vmatpush1.bf16.xpose.msra.mxu1 %v3006_v9  ;;  %v1857_v31 = vmul.f32 %v3278_v15, %v3919_v3  ;;  %v1856_v58 = vmul.f32 %v3278_v15, %v3914_v21  ;;  %v4651_v15 = vld [vmem:[#allocation12_spill] sm:$0xff] }
 0x8a5   : > { %1803 = vadd.xlane.f32.xlu0 %v1802_v62  ;;  %v4116_v11 = vpop.eup %3281  ;;  %v1750_v40 = vpop.xlane.xlu0 %1749 }
 0x8a6   : > { %v3284_v0 = vpop.eup %3283  ;;  %v1805_v24 = vadd.f32 %v4116_v11, %v4114_v5  ;;  %3289 = vrcp.f32 %v1750_v40 }
 0x8a7   : > { %v1859_v52 = vmul.f32 %v3284_v0, %v3930_v55  ;;  %v1858_v61 = vmul.f32 %v3284_v0, %v3925_v28  ;;  %v4652_v0 = vld [vmem:[#allocation11_spill] sm:$0xff] }
 0x8a8   : > { %1806 = vadd.xlane.f32.xlu1 %v1805_v24  ;;  %v3286_v22 = vpop.eup %3285 }
 0x8a9   : > { %v3008_v36 = vpack.c.bf16 %v1859_v52, %v1857_v31  ;;  %v1753_v53 = vpop.xlane.xlu1 %1752  ;;  %v3010_v4 = vpack.c.bf16 %v1858_v61, %v1856_v58  ;;  %v1861_v49 = vmul.f32 %v3286_v22, %v3938_v42  ;;  %v1860_v21 = vmul.f32 %v3286_v22, %v3936_v32  ;;  %v889_v32 = vld [vmem:[%s4552_s6 + $0x10] sm:$0xf] }
 0x8aa   : > { %3291 = vrcp.f32 %v1753_v53 }
 0x8ab   : > { %3009 = vmatprep.subr.bf16.mxu1 %v3008_v36 }
 0x8ac   : > { %v3288_v17 = vpop.eup %3287  ;;  %3011 = vmatpush1.bf16.xpose.msra.mxu1 %v3010_v4  ;;  %v4653_v4 = vld [vmem:[#allocation14_spill] sm:$0xff] }
 0x8ad   : > { %v1756_v45 = vpop.xlane.xlu0 %1755  ;;  %v1863_v3 = vmul.f32 %v3288_v17, %v3946_v44  ;;  %v1862_v55 = vmul.f32 %v3288_v17, %v3944_v51  ;;  %v4654_v17 = vld [vmem:[#allocation16_spill] sm:$0xff] }
 0x8ae   : > { %3293 = vrcp.f32 %v1756_v45  ;;  %v4655_v45 = vld [vmem:[#allocation15_spill] sm:$0xff] }
 0x8af   : > { %v3012_v28 = vpack.c.bf16 %v1863_v3, %v1861_v49  ;;  %v3014_v43 = vpack.c.bf16 %v1862_v55, %v1860_v21  ;;  %v4656_v49 = vld [vmem:[#allocation13_spill] sm:$0xff] }
 0x8b0   : > { %v3290_v63 = vpop.eup %3289 }
 0x8b1   : > { %3013 = vmatprep.subr.bf16.mxu1 %v3012_v28  ;;  %v1759_v50 = vpop.xlane.xlu1 %1758  ;;  %v1865_v46 = vmul.f32 %v3290_v63, %v3954_v34  ;;  %v1864_v51 = vmul.f32 %v3290_v63, %v3952_v54 }
 0x8b2   : > { %3295 = vrcp.f32 %v1759_v50 }
 0x8b4   : > { %v3292_v8 = vpop.eup %3291  ;;  %3015 = vmatpush1.bf16.xpose.msra.mxu1 %v3014_v43 }
 0x8b5   : > { %v1762_v48 = vpop.xlane.xlu0 %1761  ;;  %v1867_v42 = vmul.f32 %v3292_v8, %v3962_v20  ;;  %v1866_v44 = vmul.f32 %v3292_v8, %v3960_v57  ;;  %v4142_v20 = vpop.f32.mrb[18].mxu0 }
 0x8b6   : > { %3297 = vrcp.f32 %v1762_v48  ;;  %v4144_v35 = vpop.f32.mrb[19].mxu0 }
 0x8b7   : > { %v3016_v33 = vpack.c.bf16 %v1867_v42, %v1865_v46  ;;  %v3018_v34 = vpack.c.bf16 %v1866_v44, %v1864_v51 }
 0x8b8   : > { %v3294_v18 = vpop.eup %3293 }
 0x8b9   : > { %902 = vperm.xlu1 %3120, %v889_v32   ;;  %3017 = vmatprep.subr.bf16.mxu1 %v3016_v33  ;;  %v1765_v57 = vpop.xlane.xlu1 %1764  ;;  %v1869_v9 = vmul.f32 %v3294_v18, %v3970_v27  ;;  %v1868_v24 = vmul.f32 %v3294_v18, %v4652_v0  ;;  %v4658_v18 = vld [vmem:[#allocation20_spill] sm:$0xff] }
 0x8ba   : > { %3299 = vrcp.f32 %v1765_v57 }
 0x8bb   : > { %897 = vperm.xlu0 %3119, %v888_v25  }
 0x8bc   : > { %v3296_v54 = vpop.eup %3295  ;;  %3019 = vmatpush1.bf16.xpose.msra.mxu1 %v3018_v34  ;;  %v4657_v34 = vld [vmem:[#allocation18_spill] sm:$0xff] }
 0x8bd   : > { %v1768_v10 = vpop.xlane.xlu0 %1767  ;;  %v1871_v62 = vmul.f32 %v3296_v54, %v3978_v19  ;;  %v1870_v40 = vmul.f32 %v3296_v54, %v4651_v15 }
 0x8be   : > { %3301 = vrcp.f32 %v1768_v10 }
 0x8bf   : > { %v3020_v31 = vpack.c.bf16 %v1871_v62, %v1869_v9  ;;  %v3022_v52 = vpack.c.bf16 %v1870_v40, %v1868_v24  ;;  %v4661_v40 = vld [vmem:[#allocation22_spill] sm:$0xff]  ;;  %v4662_v24 = vld [vmem:[#allocation24_spill] sm:$0xff] }
 0x8c0   : > { %v3298_v61 = vpop.eup %3297 }
 0x8c1   : > { %3021 = vmatprep.subr.bf16.mxu1 %v3020_v31  ;;  %v1771_v58 = vpop.xlane.xlu1 %1770  ;;  %v1873_v22 = vmul.f32 %v3298_v61, %v4653_v4  ;;  %v1872_v3 = vmul.f32 %v3298_v61, %v4656_v49  ;;  %v4664_v61 = vld [vmem:[#allocation21_spill] sm:$0xff] }
 0x8c2   : > { %3303 = vrcp.f32 %v1771_v58 }
 0x8c4   : > { %v3300_v36 = vpop.eup %3299  ;;  %3023 = vmatpush1.bf16.xpose.msra.mxu1 %v3022_v52  ;;  %v4663_v52 = vld [vmem:[#allocation23_spill] sm:$0xff] }
 0x8c5   : > { %v1774_v53 = vpop.xlane.xlu0 %1773  ;;  %v1875_v27 = vmul.f32 %v3300_v36, %v4654_v17  ;;  %v1874_v19 = vmul.f32 %v3300_v36, %v4655_v45 }
 0x8c6   : > { %3305 = vrcp.f32 %v1774_v53 }
 0x8c7   : > { %v3024_v55 = vpack.c.bf16 %v1875_v27, %v1873_v22  ;;  %v3026_v21 = vpack.c.bf16 %v1874_v19, %v1872_v3 }
 0x8c8   : > { %v3302_v43 = vpop.eup %3301 }
 0x8c9   : > { %3025 = vmatprep.subr.bf16.mxu1 %v3024_v55  ;;  %v1777_v28 = vpop.xlane.xlu1 %1776  ;;  %v1877_v8 = vmul.f32 %v3302_v43, %v4002_v47  ;;  %v1876_v42 = vmul.f32 %v3302_v43, %v4000_v39  ;;  %v4659_v47 = vld [vmem:[#allocation19_spill] sm:$0xff] }
 0x8ca   : > { %3307 = vrcp.f32 %v1777_v28 }
 0x8cc   : > { %v3304_v50 = vpop.eup %3303  ;;  %3027 = vmatpush1.bf16.xpose.msra.mxu1 %v3026_v21 }
 0x8cd   : > { %v1780_v63 = vpop.xlane.xlu0 %1779  ;;  %v1879_v48 = vmul.f32 %v3304_v50, %v4010_v60  ;;  %v1878_v46 = vmul.f32 %v3304_v50, %v4008_v59  ;;  %v4660_v60 = vld [vmem:[#allocation17_spill] sm:$0xff] }
 0x8ce   : > { %3309 = vrcp.f32 %v1780_v63 }
 0x8cf   : > { %v3028_v44 = vpack.c.bf16 %v1879_v48, %v1877_v8  ;;  %v3030_v32 = vpack.c.bf16 %v1878_v46, %v1876_v42 }
 0x8d0   : > { %v3306_v25 = vpop.eup %3305 }
 0x8d1   : > { %3029 = vmatprep.subr.bf16.mxu1 %v3028_v44  ;;  %v1783_v51 = vpop.xlane.xlu1 %1782  ;;  %v1881_v57 = vmul.f32 %v3306_v25, %v4657_v34  ;;  %v1880_v9 = vmul.f32 %v3306_v25, %v4660_v60  ;;  %v4665_v34 = vld [vmem:[#allocation9_spill] sm:$0xff] }
 0x8d2   : > { %3311 = vrcp.f32 %v1783_v51 }
 0x8d4   : > { %v3308_v33 = vpop.eup %3307  ;;  %3031 = vmatpush1.bf16.xpose.msra.mxu1 %v3030_v32 }
 0x8d5   : > { %v1883_v54 = vmul.f32 %v3308_v33, %v4658_v18  ;;  %v1882_v10 = vmul.f32 %v3308_v33, %v4659_v47 }
 0x8d7   : > { %v3032_v59 = vpack.c.bf16 %v1883_v54, %v1881_v57  ;;  %v3034_v62 = vpack.c.bf16 %v1882_v10, %v1880_v9  ;;  %v1909_v57 = vrot.slane %v4665_v34, 4 }
 0x8d8   : > { %v3310_v39 = vpop.eup %3309 }
 0x8d9   : > { %3033 = vmatprep.subr.bf16.mxu1 %v3032_v59  ;;  %v1885_v0 = vmul.f32 %v3310_v39, %v4661_v40  ;;  %v1884_v36 = vmul.f32 %v3310_v39, %v4664_v61  ;;  %v4666_v59 = vld [vmem:[#allocation10_spill] sm:$0xff] }
 0x8dc   : > { %v3312_v15 = vpop.eup %3311  ;;  %3035 = vmatpush1.bf16.xpose.msra.mxu1 %v3034_v62  ;;  %v1912_v62 = vrot.slane %v4666_v59, 4 }
 0x8dd   : > { %v1887_v31 = vmul.f32 %v3312_v15, %v4662_v24  ;;  %v1886_v58 = vmul.f32 %v3312_v15, %v4663_v52 }
 0x8df   : > { %v3036_v53 = vpack.c.bf16 %v1887_v31, %v1885_v0  ;;  %v3038_v4 = vpack.c.bf16 %v1886_v58, %v1884_v36 }
 0x8e1   : > { %3037 = vmatprep.subr.bf16.mxu1 %v3036_v53  ;;  %v2001_v53 = vstv %s2000_s28  ;;  %s3348_s28 = smov 33  }
 0x8e4   : > { %3039 = vmatpush1.bf16.xpose.msra.mxu1 %v3038_v4 }
 0x919   : > { %v1786_v22 = vpop.xlane.xlu0 %1785 }
 0x91a   : > { %3313 = vrcp.f32 %v1786_v22 }
 0x91d   : > { %v1789_v17 = vpop.xlane.xlu1 %1788 }
 0x91e   : > { %3315 = vrcp.f32 %v1789_v17 }
 0x921   : > { %v1792_v27 = vpop.xlane.xlu0 %1791 }
 0x922   : > { %3317 = vrcp.f32 %v1792_v27 }
 0x924   : > { %v3314_v19 = vpop.eup %3313 }
 0x925   : > { %v1795_v45 = vpop.xlane.xlu1 %1794  ;;  %v1889_v55 = vmul.f32 %v3314_v19, %v4054_v16  ;;  %v1888_v28 = vmul.f32 %v3314_v19, %v4052_v26 }
 0x926   : > { %3319 = vrcp.f32 %v1795_v45 }
 0x928   : > { %v3316_v49 = vpop.eup %3315 }
 0x929   : > { %v1891_v21 = vmul.f32 %v3316_v49, %v4062_v41  ;;  %v1890_v43 = vmul.f32 %v3316_v49, %v4060_v56 }
 0x92a   : > { %v1798_v3 = vpop.xlane.xlu0 %1797 }
 0x92b   : > { %v3040_v50 = vpack.c.bf16 %v1891_v21, %v1889_v55  ;;  %v3042_v63 = vpack.c.bf16 %v1890_v43, %v1888_v28  ;;  %3321 = vrcp.f32 %v1798_v3  ;;  %v4669_v55 = vld [vmem:[#allocation5_spill] sm:$0xff]  ;;  %v4670_v28 = vld [vmem:[#allocation7_spill] sm:$0xff] }
 0x92c   : > { %v3318_v48 = vpop.eup %3317 }
 0x92d   : > { %3041 = vmatprep.subr.bf16.mxu1 %v3040_v50  ;;  %v1801_v8 = vpop.xlane.xlu1 %1800  ;;  %v1893_v44 = vmul.f32 %v3318_v48, %v4074_v7  ;;  %v1892_v41 = vmul.f32 %v3318_v48, %v4072_v37  ;;  %v4671_v48 = vmov 0.0  }
 0x92e   : > { %3323 = vrcp.f32 %v1801_v8  ;;  %3043 = vmatpush1.bf16.xpose.msra.mxu1 %v3042_v63  ;;  %v2014_v8 = vld [vmem:[%s4553_s7] sm:$0xff] }
 0x930   : > { %v3320_v46 = vpop.eup %3319 }
 0x931   : > { %v1895_v16 = vmul.f32 %v3320_v46, %v4082_v14  ;;  %v1894_v26 = vmul.f32 %v3320_v46, %v4080_v1  ;;  %v2015_v46 = vld [vmem:[%s4553_s7 + $0x8] sm:$0xff] }
 0x932   : > { %v1804_v42 = vpop.xlane.xlu0 %1803 }
 0x933   : > { %v3044_v32 = vpack.c.bf16 %v1895_v16, %v1893_v44  ;;  %v3046_v56 = vpack.c.bf16 %v1894_v26, %v1892_v41  ;;  %3325 = vrcp.f32 %v1804_v42  ;;  %v2016_v42 = vld [vmem:[%s4553_s7 + $0x10] sm:$0xff]  ;;  %v2017_v44 = vld [vmem:[%s4553_s7 + $0x18] sm:$0xff]  ;;  %v2018_v16 = vld [vmem:[%s4553_s7 + $0x20] sm:$0xff] }
 0x934   : > { %v2019_v41 = vld [vmem:[%s4553_s7 + $0x28] sm:$0xff]  ;;  %v2020_v26 = vld [vmem:[%s4553_s7 + $0x30] sm:$0x1] }
 0x935   : > { %3045 = vmatprep.subr.bf16.mxu1 %v3044_v32  ;;  %v1807_v51 = vpop.xlane.xlu1 %1806  ;;  %v3322_v25 = vpop.eup %3321  ;;  %v2149_v32 = vld [vmem:[%s4554_s8] sm:$0xff] }
 0x936   : > { %3327 = vrcp.f32 %v1807_v51  ;;  %3047 = vmatpush1.bf16.xpose.msra.mxu1 %v3046_v56  ;;  %v1897_v7 = vmul.f32 %v3322_v25, %v4094_v13  ;;  %v1896_v37 = vmul.f32 %v3322_v25, %v4092_v23 }
 0x938   : > { %v3324_v33 = vpop.eup %3323 }
 0x939   : > { %v903_v54 = vpop.permute.xlu1 %902  ;;  %v1899_v14 = vmul.f32 %v3324_v33, %v4100_v6  ;;  %v1898_v1 = vmul.f32 %v3324_v33, %v4098_v2  ;;  %v2150_v33 = vld [vmem:[%s4554_s8 + $0x8] sm:$0xff] }
 0x93a   : > { %v898_v18 = vpop.permute.xlu0 %897  ;;  %v993_v60 = vadd.f32 %v4142_v20, %v903_v54  ;;  %v995_v9 = vadd.f32 %v4144_v35, %v903_v54 }
 0x93b   : > { %v987_v47 = vadd.f32 %v4135_v29, %v898_v18  ;;  %v989_v10 = vadd.f32 %v4140_v38, %v898_v18  ;;  %v3048_v39 = vpack.c.bf16 %v1899_v14, %v1897_v7  ;;  %v3050_v15 = vpack.c.bf16 %v1898_v1, %v1896_v37 }
 0x93c   : > { %v1915_v6 = vrot.slane %v993_v60, 4  ;;  %v1917_v0 = vrot.slane %v995_v9, 4 }
 0x93d   : > { %v1910_v13 = vrot.slane %v987_v47, 4  ;;  %v1913_v40 = vrot.slane %v989_v10, 4  ;;  %3049 = vmatprep.subr.bf16.mxu1 %v3048_v39  ;;  %v3326_v23 = vpop.eup %3325 }
 0x93e   : > { %3051 = vmatpush1.bf16.xpose.msra.mxu1 %v3050_v15  ;;  %v1901_v35 = vmul.f32 %v3326_v23, %v4110_v12  ;;  %v1900_v52 = vmul.f32 %v3326_v23, %v4108_v30  ;;  %v4667_v12 = vld [vmem:[#allocation8_spill] sm:$0xff]  ;;  %v2151_v23 = vld [vmem:[%s4554_s8 + $0x10] sm:$0xff] }
 0x93f   : > { %v1914_v2 = vsel %vm1908_vm4, %v1912_v62, %v1913_v40  ;;  %v1911_v29 = vsel %vm1908_vm4, %v1909_v57, %v1910_v13  ;;  %v1918_v24 = vsel %vm1908_vm4, %v1913_v40, %v1917_v0  ;;  %v1916_v38 = vsel %vm1908_vm4, %v1910_v13, %v1915_v6 }
 0x940   : > { %1987 = vmatprep.mubr.f32.mxu1 %v1914_v2  ;;  %v3328_v20 = vpop.eup %3327 }
 0x941   : > { %v1903_v31 = vmul.f32 %v3328_v20, %v4116_v11  ;;  %v1902_v58 = vmul.f32 %v3328_v20, %v4114_v5  ;;  %v4668_v11 = vld [vmem:[#allocation6_spill] sm:$0xff] }
 0x943   : > { %v3052_v61 = vpack.c.bf16 %v1903_v31, %v1901_v35  ;;  %v3054_v36 = vpack.c.bf16 %v1902_v58, %v1900_v52  ;;  %v2152_v35 = vld [vmem:[%s4554_s8 + $0x18] sm:$0xff] }
 0x945   : > { %3053 = vmatprep.subr.bf16.mxu1 %v3052_v61 }
 0x946   : > { %3055 = vmatpush1.bf16.xpose.msra.mxu1 %v3054_v36 }
 0x94d   : > { %1988 = vmatmul.mubr.f32.vlgmr.msra.gmra.mrb[64].mxu1 %v1911_v29 }
 0x94e   : > { %1993 = vmatprep.mubr.f32.mxu1 %v1918_v24 }
 0x951   : > { %1994 = vmatmul.mubr.f32.gmra.mrb[66].mxu1 %v1916_v38 }
 0xa20   : > { %v1989_v4 = vpop.f32.mrb[64].mxu1 }
 0xa21   : > { %v2002_v22 = vmul.f32 %v2001_v53, %v1989_v4  ;;  %v1991_v17 = vpop.f32.mrb[65].mxu1 }
 0xa22   : > { %v2003_v30 = vmul.f32 %v2001_v53, %v1991_v17 }
 0xa23   : > { %v2006_v5 = vadd.f32 %v2002_v22, %v4667_v12 }
 0xa24   : > { %v2007_v27 = vadd.f32 %v2003_v30, %v4668_v11  ;;  %v1995_v45 = vpop.f32.mrb[66].mxu1 }
 0xa25   : > { %2010 = vst [vmem:[%s450_s10] sm:$0xff] %v2006_v5  ;;  %v2004_v19 = vmul.f32 %v2001_v53, %v1995_v45  ;;  %v1997_v49 = vpop.f32.mrb[67].mxu1 }
 0xa26   : > { %2011 = vst [vmem:[%s450_s10 + $0x8] sm:$0xff] %v2007_v27  ;;  %v2005_v3 = vmul.f32 %v2001_v53, %v1997_v49 }
 0xa27   : > { %v2008_v21 = vadd.f32 %v2004_v19, %v4669_v55  ;;  %v2154_v55 = vld [vmem:[%s4554_s8 + $0x28] sm:$0xff] }
 0xa28   : > { %v2009_v43 = vadd.f32 %v2005_v3, %v4670_v28 }
 0xa29   : > { %2012 = vst [vmem:[%s450_s10 + $0x10] sm:$0xff] %v2008_v21  ;;  %v3058_v50 = vpack.c.bf16 %v2008_v21, %v2006_v5 }
 0xa2a   : > { %2013 = vst [vmem:[%s450_s10 + $0x18] sm:$0xff] %v2009_v43  ;;  %v3056_v63 = vpack.c.bf16 %v2009_v43, %v2007_v27  ;;  %s3352_s10 = smov 29   ;;  %v2153_v27 = vld [vmem:[%s4554_s8 + $0x20] sm:$0xff] }
 0xa2c   : > { %3057 = vmatprep.subr.bf16.mxu0 %v3056_v63 }
 0xa2d   : > { %3059 = vmatpush1.bf16.msra.mxu0 %v3058_v50 }
 0xa30   : > { %2961 = vmatmul.mubr.msk.f32.vlgmr.msra.gmra.mrb[20].mxu0 %vm768_vm1, %v2014_v8 }
 0xa31   : > { %2112 = vmatprep.mubr.f32.mxu0 %v4671_v48 }
 0xa34   : > { %2962 = vmatmul.mubr.msk.f32.gmra.mrb[22].mxu0 %vm768_vm1, %v2015_v46 }
 0xa35   : > { %2118 = vmatprep.mubr.f32.mxu0 %v4671_v48 }
 0xa38   : > { %2963 = vmatmul.mubr.msk.f32.gmra.mrb[24].mxu0 %vm768_vm1, %v2016_v42 }
 0xa39   : > { %2124 = vmatprep.mubr.f32.mxu0 %v4671_v48 }
 0xa3c   : > { %2964 = vmatmul.mubr.msk.f32.gmra.mrb[26].mxu0 %vm768_vm1, %v2017_v44 }
 0xa3d   : > { %2130 = vmatprep.mubr.f32.mxu0 %v4671_v48 }
 0xa40   : > { %2965 = vmatmul.mubr.msk.f32.gmra.mrb[28].mxu0 %vm768_vm1, %v2018_v16 }
 0xa41   : > { %2136 = vmatprep.mubr.f32.mxu0 %v4671_v48 }
 0xa44   : > { %2966 = vmatmul.mubr.msk.f32.gmra.mrb[30].mxu0 %vm768_vm1, %v2019_v41 }
 0xa45   : > { %2142 = vmatprep.mubr.f32.mxu0 %v4671_v48 }
 0xa48   : > { %2967 = vmatmul.mubr.msk.f32.gmra.mrb[32].mxu0 %vm768_vm1, %v2020_v26  ;;  %v2155_v26 = vld [vmem:[%s4554_s8 + $0x30] sm:$0xff] }
 0xb03   : > { %v2108_v56 = vpop.f32.mrb[20].mxu0 }
 0xb04   : > { %v2163_v51 = vmul.f32 %v2149_v32, %v2108_v56  ;;  %v2110_v25 = vpop.f32.mrb[21].mxu0 }
 0xb05   : > { %v2164_v18 = vmul.f32 %v2150_v33, %v2110_v25  ;;  %v2156_v33 = vld [vmem:[%s4554_s8 + $0x38] sm:$0xff] }
 0xb06   : > { %2177 = vrot.lane.b32.xlu1 %v2163_v51, %s3339_s11  ;;  %v2190_v34 = vrot.slane %v2163_v51, 1  ;;  %v2203_v7 = vrot.slane %v2163_v51, 2  ;;  %v2216_v47 = vrot.slane %v2163_v51, 3  ;;  %v2229_v59 = vrot.slane %v2163_v51, 4 }
 0xb07   : > { %v2114_v57 = vpop.f32.mrb[22].mxu0  ;;  %v2191_v37 = vrot.slane %v2164_v18, 1  ;;  %v2204_v60 = vrot.slane %v2164_v18, 2  ;;  %v2217_v39 = vrot.slane %v2164_v18, 3  ;;  %v2242_v13 = vrot.slane %v2163_v51, 5 }
 0xb08   : > { %2194 = vrot.lane.b32.xlu0 %v2190_v34, %s3340_s16  ;;  %v2116_v54 = vpop.f32.mrb[23].mxu0  ;;  %v2230_v40 = vrot.slane %v2164_v18, 4  ;;  %v2255_v6 = vrot.slane %v2163_v51, 6  ;;  %v2243_v0 = vrot.slane %v2164_v18, 5  ;;  %v2268_v2 = vrot.slane %v2163_v51, 7 }
 0xb09   : > { %v2165_v24 = vmul.f32 %v2151_v23, %v2114_v57  ;;  %v2256_v38 = vrot.slane %v2164_v18, 6  ;;  %v2269_v31 = vrot.slane %v2164_v18, 7  ;;  %v2166_v58 = vmul.f32 %v2152_v35, %v2116_v54 }
 0xb0a   : > { %2179 = vrot.lane.b32.xlu1 %v2164_v18, %s3339_s11  ;;  %s3353_s11 = smov 19  }
 0xb0b   : > { %v4236_v14 = vpop.f32.mrb[24].mxu0  ;;  %v2292_v52 = vrot.slane %v2165_v24, 1  ;;  %v2305_v61 = vrot.slane %v2165_v24, 2  ;;  %v2293_v36 = vrot.slane %v2166_v58, 1  ;;  %v2318_v53 = vrot.slane %v2165_v24, 3 }
 0xb0c   : > { %2207 = vrot.lane.b32.xlu0 %v2203_v7, %s3341_s17  ;;  %v4238_v1 = vpop.f32.mrb[25].mxu0  ;;  %v2306_v4 = vrot.slane %v2166_v58, 2  ;;  %v2331_v22 = vrot.slane %v2165_v24, 4  ;;  %v2319_v17 = vrot.slane %v2166_v58, 3  ;;  %v2344_v30 = vrot.slane %v2165_v24, 5 }
 0xb0d   : > { %v2332_v12 = vrot.slane %v2166_v58, 4  ;;  %v2357_v5 = vrot.slane %v2165_v24, 6  ;;  %v2345_v11 = vrot.slane %v2166_v58, 5  ;;  %v2370_v45 = vrot.slane %v2165_v24, 7 }
 0xb0e   : > { %2196 = vrot.lane.b32.xlu1 %v2191_v37, %s3340_s16  ;;  %v2167_v19 = vmul.f32 %v2153_v27, %v4236_v14  ;;  %v2358_v49 = vrot.slane %v2166_v58, 6  ;;  %v2371_v28 = vrot.slane %v2166_v58, 7  ;;  %v2168_v50 = vmul.f32 %v2154_v55, %v4238_v1  ;;  %s3364_s16 = smov 126  }
 0xb0f   : > { %v4240_v10 = vpop.f32.mrb[26].mxu0 }
 0xb10   : > { %2220 = vrot.lane.b32.xlu0 %v2216_v47, %s3342_s18  ;;  %v4242_v9 = vpop.f32.mrb[27].mxu0  ;;  %v2394_v43 = vrot.slane %v2167_v19, 1  ;;  %v2407_v63 = vrot.slane %v2167_v19, 2  ;;  %v2395_v8 = vrot.slane %v2168_v50, 1  ;;  %v2420_v48 = vrot.slane %v2167_v19, 3 }
 0xb11   : > { %v2408_v46 = vrot.slane %v2168_v50, 2  ;;  %v2433_v42 = vrot.slane %v2167_v19, 4  ;;  %v2421_v44 = vrot.slane %v2168_v50, 3  ;;  %v2446_v16 = vrot.slane %v2167_v19, 5 }
 0xb12   : > { %2209 = vrot.lane.b32.xlu1 %v2204_v60, %s3341_s17  ;;  %v2434_v41 = vrot.slane %v2168_v50, 4  ;;  %v2459_v32 = vrot.slane %v2167_v19, 6  ;;  %v2447_v56 = vrot.slane %v2168_v50, 5  ;;  %v4274_v51 = vmul.f32 %v2155_v26, %v4240_v10  ;;  %s3365_s17 = smov 125  }
 0xb13   : > { %v4244_v62 = vpop.f32.mrb[28].mxu0  ;;  %v2472_v25 = vrot.slane %v2167_v19, 7  ;;  %v2460_v34 = vrot.slane %v2168_v50, 6  ;;  %v4281_v18 = vmul.f32 %v2156_v33, %v4242_v9  ;;  %v2473_v54 = vrot.slane %v2168_v50, 7 }
 0xb14   : > { %2233 = vrot.lane.b32.xlu0 %v2229_v59, %s3343_s19  ;;  %v4246_v15 = vpop.f32.mrb[29].mxu0  ;;  %v2489_v57 = vrot.slane %v4274_v51, 1  ;;  %v2502_v7 = vrot.slane %v4274_v51, 2  ;;  %v2515_v37 = vrot.slane %v4274_v51, 3  ;;  %v2528_v47 = vrot.slane %v4274_v51, 4 }
 0xb15   : > { %v2490_v14 = vrot.slane %v4281_v18, 1  ;;  %v2503_v1 = vrot.slane %v4281_v18, 2  ;;  %v2516_v10 = vrot.slane %v4281_v18, 3  ;;  %v2541_v60 = vrot.slane %v4274_v51, 5 }
 0xb16   : > { %2222 = vrot.lane.b32.xlu1 %v2217_v39, %s3342_s18  ;;  %s3354_s18 = smov 18   ;;  %v2181_v9 = vlaneseq  ;;  %v2529_v59 = vrot.slane %v4281_v18, 4  ;;  %v2554_v39 = vrot.slane %v4274_v51, 6  ;;  %v2555_v35 = vrot.slane %v4281_v18, 6 }
 0xb17   : > { %v4251_v29 = vpop.f32.mrb[30].mxu0 }
 0xb18   : > { %2246 = vrot.lane.b32.xlu0 %v2242_v13, %s3344_s20  ;;  %v4253_v20 = vpop.f32.mrb[31].mxu0  ;;  %v4293_v13 = vand.u32 127, %v2181_v9 }
 0xb1a   : > { %2235 = vrot.lane.b32.xlu1 %v2230_v40, %s3343_s19  ;;  %s3367_s19 = smov 114   ;;  %vm2183_vm5 = vcmp.lt.s32.totalorder %v4293_v13, 51  ;;  %vm2198_vm6 = vcmp.lt.s32.totalorder %v4293_v13, 50  ;;  %vm2211_vm7 = vcmp.lt.s32.totalorder %v4293_v13, 49  ;;  %vm2224_vm8 = vcmp.lt.s32.totalorder %v4293_v13, 48 }
 0xb1b   : > { %v4262_v3 = vpop.f32.mrb[32].mxu0  ;;  %vm2237_vm9 = vcmp.lt.s32.totalorder %v4293_v13, 47  ;;  %vm2250_vm10 = vcmp.lt.s32.totalorder %v4293_v13, 46  ;;  %vm2263_vm11 = vcmp.lt.s32.totalorder %v4293_v13, 45  ;;  %vm2276_vm12 = vcmp.lt.s32.totalorder %v4293_v13, 35 }
 0xb1c   : > { %2259 = vrot.lane.b32.xlu0 %v2255_v6, %s3345_s21  ;;  %v4267_v21 = vpop.f32.mrb[33].mxu0  ;;  %v2542_v6 = vrot.slane %v4281_v18, 5  ;;  %vm2285_vm13 = vcmp.lt.s32.totalorder %v4293_v13, 34  ;;  %vm2300_vm14 = vcmp.lt.s32.totalorder %v4293_v13, 33  ;;  %vm2313_vm15 = vcmp.lt.s32.totalorder %v4293_v13, 32 }
 0xb1d   : > { %vm2326_vm0 = vcmp.lt.s32.totalorder %v4293_v13, 31  ;;  %vm2339_vm1 = vcmp.lt.s32.totalorder %v4293_v13, 30  ;;  %vm2352_vm2 = vcmp.lt.s32.totalorder %v4293_v13, 29  ;;  %vm2365_vm3 = vcmp.lt.s32.totalorder %v4293_v13, 19 }
 0xb1e   : > { %2248 = vrot.lane.b32.xlu1 %v2243_v0, %s3344_s20  ;;  %s3368_s20 = smov 113   ;;  %v2157_v0 = vld [vmem:[%s4554_s8 + $0x40] sm:$0xff]  ;;  %vm2378_vm4 = vcmp.lt.s32.totalorder %v4293_v13, 18 }
 0xb20   : > { %2272 = vrot.lane.b32.xlu0 %v2268_v2, %s3346_s24  ;;  %v2567_v2 = vrot.slane %v4274_v51, 7 }
 0xb22   : > { %2261 = vrot.lane.b32.xlu1 %v2256_v38, %s3345_s21  ;;  %s3355_s21 = smov 17   ;;  %v4302_v38 = vmul.f32 %v2157_v0, %v4244_v62 }
 0xb24   : > { %2281 = vrot.lane.b32.xlu0 %v2165_v24, %s3347_s27  ;;  %v2591_v62 = vrot.slane %v4302_v38, 1  ;;  %v2604_v27 = vrot.slane %v4302_v38, 2  ;;  %v2630_v33 = vrot.slane %v4302_v38, 4 }
 0xb26   : > { %2274 = vrot.lane.b32.xlu1 %v2269_v31, %s3346_s24  ;;  %s3358_s24 = smov 14  }
 0xb28   : > { %2296 = vrot.lane.b32.xlu0 %v2292_v52, %s3348_s28 }
 0xb2a   : > { %2283 = vrot.lane.b32.xlu1 %v2166_v58, %s3347_s27  ;;  %s3371_s27 = smov 110  }
 0xb2c   : > { %2309 = vrot.lane.b32.xlu0 %v2305_v61, %s3349_s29  ;;  %v2158_v61 = vld [vmem:[%s4554_s8 + $0x48] sm:$0xff] }
 0xb2e   : > { %2298 = vrot.lane.b32.xlu1 %v2293_v36, %s3348_s28  ;;  %s3372_s28 = smov 109  }
 0xb30   : > { %2322 = vrot.lane.b32.xlu0 %v2318_v53, %s3350_s30  ;;  %v2568_v53 = vrot.slane %v4281_v18, 7 }
 0xb32   : > { %2311 = vrot.lane.b32.xlu1 %v2306_v4, %s3349_s29  ;;  %s3361_s29 = smov 2  }
 0xb34   : > { %2335 = vrot.lane.b32.xlu0 %v2331_v22, %s3351_s9 }
 0xb36   : > { %2324 = vrot.lane.b32.xlu1 %v2319_v17, %s3350_s30  ;;  %s3374_s30 = smov 98  }
 0xb38   : > { %2348 = vrot.lane.b32.xlu0 %v2344_v30, %s3352_s10 }
 0xb3a   : > { %2337 = vrot.lane.b32.xlu1 %v2332_v12, %s3351_s9  ;;  %s3375_s9 = smov 97  }
 0xb3c   : > { %2361 = vrot.lane.b32.xlu0 %v2357_v5, %s3353_s11  ;;  %v4313_v5 = vmul.f32 %v2158_v61, %v4246_v15 }
 0xb3e   : > { %2350 = vrot.lane.b32.xlu1 %v2345_v11, %s3352_s10  ;;  %s3362_s10 = smov 1   ;;  %v2592_v15 = vrot.slane %v4313_v5, 1 }
 0xb40   : > { %2374 = vrot.lane.b32.xlu0 %v2370_v45, %s3354_s18 }
 0xb42   : > { %2363 = vrot.lane.b32.xlu1 %v2358_v49, %s3353_s11  ;;  %s3363_s11 = smov 127  }
 0xb44   : > { %2383 = vrot.lane.b32.xlu0 %v2167_v19, %s3355_s21 }
 0xb46   : > { %2376 = vrot.lane.b32.xlu1 %v2371_v28, %s3354_s18  ;;  %s3366_s18 = smov 115  }
 0xb48   : > { %2398 = vrot.lane.b32.xlu0 %v2394_v43, %s3356_s22 }
 0xb4a   : > { %2385 = vrot.lane.b32.xlu1 %v2168_v50, %s3355_s21  ;;  %s3379_s21 = smov 93  }
 0xb4c   : > { %2411 = vrot.lane.b32.xlu0 %v2407_v63, %s3357_s23 }
 0xb4e   : > { %2400 = vrot.lane.b32.xlu1 %v2395_v8, %s3356_s22  ;;  %s3380_s22 = smov 83  }
 0xb50   : > { %2424 = vrot.lane.b32.xlu0 %v2420_v48, %s3358_s24 }
 0xb52   : > { %2413 = vrot.lane.b32.xlu1 %v2408_v46, %s3357_s23  ;;  %s3369_s23 = smov 112  }
 0xb54   : > { %2437 = vrot.lane.b32.xlu0 %v2433_v42, %s3359_s25  ;;  %v2617_v42 = vrot.slane %v4302_v38, 3 }
 0xb56   : > { %2426 = vrot.lane.b32.xlu1 %v2421_v44, %s3358_s24  ;;  %s3382_s24 = smov 81  }
 0xb58   : > { %2450 = vrot.lane.b32.xlu0 %v2446_v16, %s3360_s26  ;;  %v2605_v16 = vrot.slane %v4313_v5, 2 }
 0xb5a   : > { %2439 = vrot.lane.b32.xlu1 %v2434_v41, %s3359_s25  ;;  %s3383_s25 = smov 80  }
 0xb5c   : > { %2463 = vrot.lane.b32.xlu0 %v2459_v32, %s3361_s29 }
 0xb5e   : > { %2452 = vrot.lane.b32.xlu1 %v2447_v56, %s3360_s26  ;;  %s3370_s26 = smov 111  }
 0xb60   : > { %2476 = vrot.lane.b32.xlu0 %v2472_v25, %s3362_s10 }
 0xb62   : > { %2465 = vrot.lane.b32.xlu1 %v2460_v34, %s3361_s29  ;;  %s3373_s29 = smov 99  }
 0xb64   : > { %2493 = vrot.lane.b32.xlu0 %v2489_v57, %s3363_s11  ;;  %v2618_v57 = vrot.slane %v4313_v5, 3 }
 0xb66   : > { %2478 = vrot.lane.b32.xlu1 %v2473_v54, %s3362_s10  ;;  %s3376_s10 = smov 96  }
 0xb68   : > { %2506 = vrot.lane.b32.xlu0 %v2502_v7, %s3364_s16 }
 0xb6a   : > { %2495 = vrot.lane.b32.xlu1 %v2490_v14, %s3363_s11  ;;  %s2793_s11 = sld [smem:[#allocation4]] }
 0xb6c   : > { %2519 = vrot.lane.b32.xlu0 %v2515_v37, %s3365_s17 }
 0xb6e   : > { %2508 = vrot.lane.b32.xlu1 %v2503_v1, %s3364_s16  ;;  %s2915_s16 = sshll.u32 %s4673_s15, 1 }
 0xb70   : > { %2532 = vrot.lane.b32.xlu0 %v2528_v47, %s3366_s18  ;;  %v2643_v47 = vrot.slane %v4302_v38, 5 }
 0xb72   : > { %2521 = vrot.lane.b32.xlu1 %v2516_v10, %s3365_s17  ;;  %s3377_s17 = smov 95  }
 0xb74   : > { %2545 = vrot.lane.b32.xlu0 %v2541_v60, %s3367_s19  ;;  %v2631_v60 = vrot.slane %v4313_v5, 4 }
 0xb76   : > { %2534 = vrot.lane.b32.xlu1 %v2529_v59, %s3366_s18 }
 0xb78   : > { %v2178_v40 = vpop.permute.xlu1 %2177  ;;  %2558 = vrot.lane.b32.xlu0 %v2554_v39, %s3368_s20 }
 0xb7a   : > { %v2195_v23 = vpop.permute.xlu0 %2194  ;;  %2547 = vrot.lane.b32.xlu1 %v2542_v6, %s3367_s19  ;;  %s454_s19 = scalar_lea.vmem %s4559_s13, %s2915_s16 }
 0xb7c   : > { %v2180_v24 = vpop.permute.xlu1 %2179  ;;  %2571 = vrot.lane.b32.xlu0 %v2567_v2, %s3369_s23 }
 0xb7d   : > { %v2184_v31 = vsel %vm2183_vm5, %v2178_v40, %v2180_v24  ;;  %v2185_v52 = vsel %vm2183_vm5, %v2180_v24, %v2178_v40  ;;  %v2644_v24 = vrot.slane %v4313_v5, 5  ;;  %vm2387_vm5 = vcmp.lt.s32.totalorder %v4293_v13, 17 }
 0xb7e   : > { %v2208_v58 = vpop.permute.xlu0 %2207  ;;  %2560 = vrot.lane.b32.xlu1 %v2555_v35, %s3368_s20  ;;  %s3378_s20 = smov 94  }
 0xb80   : > { %v2197_v36 = vpop.permute.xlu1 %2196  ;;  %2580 = vrot.lane.b32.xlu0 %v4302_v38, %s3370_s26 }
 0xb81   : > { %v2199_v4 = vsel %vm2198_vm6, %v2195_v23, %v2197_v36  ;;  %v2200_v22 = vsel %vm2198_vm6, %v2197_v36, %v2195_v23  ;;  %v2656_v23 = vrot.slane %v4302_v38, 6  ;;  %vm2402_vm6 = vcmp.lt.s32.totalorder %v4293_v13, 16 }
 0xb82   : > { %v2201_v17 = vadd.f32 %v2200_v22, %v2185_v52  ;;  %v2202_v30 = vadd.f32 %v2199_v4, %v2184_v31  ;;  %v2221_v12 = vpop.permute.xlu0 %2220  ;;  %2573 = vrot.lane.b32.xlu1 %v2568_v53, %s3369_s23  ;;  %v2159_v52 = vld [vmem:[%s4554_s8 + $0x50] sm:$0xff]  ;;  %v2669_v53 = vrot.slane %v4302_v38, 7  ;;  %v2657_v22 = vrot.slane %v4313_v5, 6  ;;  %v2160_v38 = vld [vmem:[%s4554_s8 + $0x58] sm:$0xff]  ;;  %s3381_s23 = smov 82  }
 0xb83   : > { %v4338_v4 = vmul.f32 %v2159_v52, %v4251_v29  ;;  %v2670_v29 = vrot.slane %v4313_v5, 7 }
 0xb84   : > { %v2210_v11 = vpop.permute.xlu1 %2209  ;;  %2595 = vrot.lane.b32.xlu0 %v2591_v62, %s3371_s27 }
 0xb85   : > { %v2212_v45 = vsel %vm2211_vm7, %v2208_v58, %v2210_v11  ;;  %v2213_v19 = vsel %vm2211_vm7, %v2210_v11, %v2208_v58  ;;  %vm2415_vm7 = vcmp.lt.s32.totalorder %v4293_v13, 15 }
 0xb86   : > { %v2214_v49 = vadd.f32 %v2213_v19, %v2201_v17  ;;  %v2215_v55 = vadd.f32 %v2212_v45, %v2202_v30  ;;  %v2234_v28 = vpop.permute.xlu0 %2233  ;;  %2582 = vrot.lane.b32.xlu1 %v4313_v5, %s3370_s26  ;;  %v2693_v19 = vrot.slane %v4338_v4, 1  ;;  %s3384_s26 = smov 79  }
 0xb88   : > { %v2223_v43 = vpop.permute.xlu1 %2222  ;;  %2608 = vrot.lane.b32.xlu0 %v2604_v27, %s3372_s28 }
 0xb89   : > { %v2225_v50 = vsel %vm2224_vm8, %v2221_v12, %v2223_v43  ;;  %v2226_v63 = vsel %vm2224_vm8, %v2223_v43, %v2221_v12  ;;  %vm2428_vm8 = vcmp.lt.s32.totalorder %v4293_v13, 14 }
 0xb8a   : > { %v2227_v8 = vadd.f32 %v2226_v63, %v2214_v49  ;;  %v2228_v48 = vadd.f32 %v2225_v50, %v2215_v55  ;;  %v2247_v46 = vpop.permute.xlu0 %2246  ;;  %2597 = vrot.lane.b32.xlu1 %v2592_v15, %s3371_s27  ;;  %v4349_v50 = vmul.f32 %v2160_v38, %v4253_v20 }
 0xb8c   : > { %v2236_v44 = vpop.permute.xlu1 %2235  ;;  %2621 = vrot.lane.b32.xlu0 %v2617_v42, %s3373_s29  ;;  %v2694_v20 = vrot.slane %v4349_v50, 1 }
 0xb8d   : > { %v2238_v41 = vsel %vm2237_vm9, %v2234_v28, %v2236_v44  ;;  %v2239_v26 = vsel %vm2237_vm9, %v2236_v44, %v2234_v28  ;;  %vm2441_vm9 = vcmp.lt.s32.totalorder %v4293_v13, 13 }
 0xb8e   : > { %v2240_v32 = vadd.f32 %v2239_v26, %v2227_v8  ;;  %v2241_v56 = vadd.f32 %v2238_v41, %v2228_v48  ;;  %v2260_v25 = vpop.permute.xlu0 %2259  ;;  %2610 = vrot.lane.b32.xlu1 %v2605_v16, %s3372_s28  ;;  %v2706_v8 = vrot.slane %v4338_v4, 2 }
 0xb90   : > { %v2249_v34 = vpop.permute.xlu1 %2248  ;;  %2634 = vrot.lane.b32.xlu0 %v2630_v33, %s3374_s30  ;;  %v2719_v33 = vrot.slane %v4338_v4, 3 }
 0xb91   : > { %v2251_v54 = vsel %vm2250_vm10, %v2247_v46, %v2249_v34  ;;  %v2252_v7 = vsel %vm2250_vm10, %v2249_v34, %v2247_v46  ;;  %vm2454_vm10 = vcmp.lt.s32.totalorder %v4293_v13, 3 }
 0xb92   : > { %v2253_v14 = vadd.f32 %v2252_v7, %v2240_v32  ;;  %v2254_v37 = vadd.f32 %v2251_v54, %v2241_v56  ;;  %v2273_v1 = vpop.permute.xlu0 %2272  ;;  %2623 = vrot.lane.b32.xlu1 %v2618_v57, %s3373_s29  ;;  %v2707_v57 = vrot.slane %v4349_v50, 2  ;;  %s3385_s29 = smov 78  }
 0xb94   : > { %v2262_v10 = vpop.permute.xlu1 %2261  ;;  %2647 = vrot.lane.b32.xlu0 %v2643_v47, %s3375_s9  ;;  %v2732_v47 = vrot.slane %v4338_v4, 4 }
 0xb95   : > { %v2264_v59 = vsel %vm2263_vm11, %v2260_v25, %v2262_v10  ;;  %v2265_v39 = vsel %vm2263_vm11, %v2262_v10, %v2260_v25  ;;  %vm2467_vm11 = vcmp.lt.s32.totalorder %v4293_v13, 2 }
 0xb96   : > { %v2266_v40 = vadd.f32 %v2265_v39, %v2253_v14  ;;  %v2267_v6 = vadd.f32 %v2264_v59, %v2254_v37  ;;  %v2282_v0 = vpop.permute.xlu0 %2281  ;;  %2636 = vrot.lane.b32.xlu1 %v2631_v60, %s3374_s30  ;;  %v2720_v60 = vrot.slane %v4349_v50, 3 }
 0xb98   : > { %v2275_v2 = vpop.permute.xlu1 %2274  ;;  %2660 = vrot.lane.b32.xlu0 %v2656_v23, %s3376_s10  ;;  %v2745_v23 = vrot.slane %v4338_v4, 5 }
 0xb99   : > { %v2277_v35 = vsel %vm2276_vm12, %v2273_v1, %v2275_v2  ;;  %v2278_v31 = vsel %vm2276_vm12, %v2275_v2, %v2273_v1  ;;  %vm2480_vm12 = vcmp.lt.s32.totalorder %v4293_v13, 1 }
 0xb9a   : > { %v2279_v58 = vadd.f32 %v2278_v31, %v2266_v40  ;;  %v2280_v61 = vadd.f32 %v2277_v35, %v2267_v6  ;;  %v2297_v36 = vpop.permute.xlu0 %2296  ;;  %2649 = vrot.lane.b32.xlu1 %v2644_v24, %s3375_s9  ;;  %v2733_v24 = vrot.slane %v4349_v50, 4 }
 0xb9c   : > { %v2284_v62 = vpop.permute.xlu1 %2283  ;;  %2673 = vrot.lane.b32.xlu0 %v2669_v53, %s3377_s17 }
 0xb9d   : > { %v2286_v17 = vsel %vm2285_vm13, %v2282_v0, %v2284_v62  ;;  %v2287_v30 = vsel %vm2285_vm13, %v2284_v62, %v2282_v0  ;;  %v2746_v62 = vrot.slane %v4349_v50, 5  ;;  %vm2497_vm13 = vcmp.lt.s32.totalorder %v4293_v13, 127 }
 0xb9e   : > { %v2288_v12 = vadd.f32 %v2287_v30, %v2279_v58  ;;  %v2289_v11 = vadd.f32 %v2286_v17, %v2280_v61  ;;  %v2310_v27 = vpop.permute.xlu0 %2309  ;;  %2662 = vrot.lane.b32.xlu1 %v2657_v22, %s3376_s10  ;;  %v2161_v22 = vld [vmem:[%s4554_s8 + $0x60] sm:$0x1]  ;;  %v2771_v30 = vrot.slane %v4338_v4, 7  ;;  %s3386_s10 = smov 77  }
 0xba0   : > { %v2299_v45 = vpop.permute.xlu1 %2298  ;;  %2682 = vrot.lane.b32.xlu0 %v4338_v4, %s3378_s20 }
 0xba1   : > { %v2301_v49 = vsel %vm2300_vm14, %v2297_v36, %v2299_v45  ;;  %v2302_v55 = vsel %vm2300_vm14, %v2299_v45, %v2297_v36  ;;  %v2758_v36 = vrot.slane %v4338_v4, 6  ;;  %v2162_v45 = vld [vmem:[%s4554_s8 + $0x68] sm:$0x1]  ;;  %vm2510_vm14 = vcmp.lt.s32.totalorder %v4293_v13, 126 }
 0xba2   : > { %v2303_v28 = vadd.f32 %v2302_v55, %v2288_v12  ;;  %v2304_v43 = vadd.f32 %v2301_v49, %v2289_v11  ;;  %v2323_v15 = vpop.permute.xlu0 %2322  ;;  %2675 = vrot.lane.b32.xlu1 %v2670_v29, %s3377_s17  ;;  %v2759_v11 = vrot.slane %v4349_v50, 6  ;;  %v2176_v4 = vmul.f32 %v2162_v45, %v4267_v21 }
 0xba4   : > { %v2312_v63 = vpop.permute.xlu1 %2311  ;;  %2697 = vrot.lane.b32.xlu0 %v2693_v19, %s3379_s21  ;;  %v2772_v19 = vrot.slane %v4349_v50, 7 }
 0xba5   : > { %v2314_v48 = vsel %vm2313_vm15, %v2310_v27, %v2312_v63  ;;  %v2315_v5 = vsel %vm2313_vm15, %v2312_v63, %v2310_v27  ;;  %v2175_v27 = vmul.f32 %v2161_v22, %v4262_v3  ;;  %vm2523_vm15 = vcmp.lt.s32.totalorder %v4293_v13, 125 }
 0xba6   : > { %v2316_v46 = vadd.f32 %v2315_v5, %v2303_v28  ;;  %v2317_v42 = vadd.f32 %v2314_v48, %v2304_v43  ;;  %v2336_v44 = vpop.permute.xlu0 %2335  ;;  %2684 = vrot.lane.b32.xlu1 %v4349_v50, %s3378_s20 }
 0xba8   : > { %v2325_v16 = vpop.permute.xlu1 %2324  ;;  %2710 = vrot.lane.b32.xlu0 %v2706_v8, %s3380_s22 }
 0xba9   : > { %v2327_v41 = vsel %vm2326_vm0, %v2323_v15, %v2325_v16  ;;  %v2328_v26 = vsel %vm2326_vm0, %v2325_v16, %v2323_v15  ;;  %vm2536_vm0 = vcmp.lt.s32.totalorder %v4293_v13, 115 }
 0xbaa   : > { %v2329_v32 = vadd.f32 %v2328_v26, %v2316_v46  ;;  %v2330_v56 = vadd.f32 %v2327_v41, %v2317_v42  ;;  %v2349_v25 = vpop.permute.xlu0 %2348  ;;  %2699 = vrot.lane.b32.xlu1 %v2694_v20, %s3379_s21 }
 0xbac   : > { %v2338_v34 = vpop.permute.xlu1 %2337  ;;  %2723 = vrot.lane.b32.xlu0 %v2719_v33, %s3381_s23 }
 0xbad   : > { %v2340_v54 = vsel %vm2339_vm1, %v2336_v44, %v2338_v34  ;;  %v2341_v7 = vsel %vm2339_vm1, %v2338_v34, %v2336_v44  ;;  %vm2549_vm1 = vcmp.lt.s32.totalorder %v4293_v13, 114 }
 0xbae   : > { %v2342_v14 = vadd.f32 %v2341_v7, %v2329_v32  ;;  %v2343_v37 = vadd.f32 %v2340_v54, %v2330_v56  ;;  %v2362_v1 = vpop.permute.xlu0 %2361  ;;  %2712 = vrot.lane.b32.xlu1 %v2707_v57, %s3380_s22 }
 0xbb0   : > { %v2351_v10 = vpop.permute.xlu1 %2350  ;;  %2736 = vrot.lane.b32.xlu0 %v2732_v47, %s3382_s24 }
 0xbb1   : > { %v2353_v59 = vsel %vm2352_vm2, %v2349_v25, %v2351_v10  ;;  %v2354_v39 = vsel %vm2352_vm2, %v2351_v10, %v2349_v25  ;;  %vm2562_vm2 = vcmp.lt.s32.totalorder %v4293_v13, 113 }
 0xbb2   : > { %v2355_v40 = vadd.f32 %v2354_v39, %v2342_v14  ;;  %v2356_v6 = vadd.f32 %v2353_v59, %v2343_v37  ;;  %v4362_v0 = vpop.permute.xlu0 %2374  ;;  %2725 = vrot.lane.b32.xlu1 %v2720_v60, %s3381_s23 }
 0xbb4   : > { %v2364_v2 = vpop.permute.xlu1 %2363  ;;  %2749 = vrot.lane.b32.xlu0 %v2745_v23, %s3383_s25 }
 0xbb5   : > { %v2366_v35 = vsel %vm2365_vm3, %v2362_v1, %v2364_v2  ;;  %v2367_v31 = vsel %vm2365_vm3, %v2364_v2, %v2362_v1  ;;  %vm2575_vm3 = vcmp.lt.s32.totalorder %v4293_v13, 112 }
 0xbb6   : > { %v2368_v52 = vadd.f32 %v2367_v31, %v2355_v40  ;;  %v2369_v58 = vadd.f32 %v2366_v35, %v2356_v6  ;;  %v2384_v61 = vpop.permute.xlu0 %2383  ;;  %2738 = vrot.lane.b32.xlu1 %v2733_v24, %s3382_s24 }
 0xbb8   : > { %v2377_v53 = vpop.permute.xlu1 %2376  ;;  %2762 = vrot.lane.b32.xlu0 %v2758_v36, %s3384_s26 }
 0xbb9   : > { %v2379_v57 = vsel %vm2378_vm4, %v4362_v0, %v2377_v53  ;;  %v2380_v54 = vsel %vm2378_vm4, %v2377_v53, %v4362_v0  ;;  %vm2584_vm4 = vcmp.lt.s32.totalorder %v4293_v13, 111 }
 0xbba   : > { %v2399_v17 = vpop.permute.xlu0 %2398  ;;  %2751 = vrot.lane.b32.xlu1 %v2746_v62, %s3383_s25  ;;  %v2381_v1 = vadd.f32 %v2380_v54, %v2368_v52  ;;  %v2382_v47 = vadd.f32 %v2379_v57, %v2369_v58 }
 0xbbc   : > { %v2386_v12 = vpop.permute.xlu1 %2385  ;;  %2775 = vrot.lane.b32.xlu0 %v2771_v30, %s3385_s29 }
 0xbbd   : > { %v2388_v14 = vsel %vm2387_vm5, %v2384_v61, %v2386_v12  ;;  %v2389_v37 = vsel %vm2387_vm5, %v2386_v12, %v2384_v61  ;;  %vm2599_vm5 = vcmp.lt.s32.totalorder %v4293_v13, 110 }
 0xbbe   : > { %v2412_v38 = vpop.permute.xlu0 %2411  ;;  %2764 = vrot.lane.b32.xlu1 %v2759_v11, %s3384_s26  ;;  %v2390_v39 = vadd.f32 %v2389_v37, %v2381_v1  ;;  %v2391_v40 = vadd.f32 %v2388_v14, %v2382_v47 }
 0xbc0   : > { %v2401_v29 = vpop.permute.xlu1 %2400  ;;  %2784 = vrot.lane.b32.xlu0 %v2175_v27, %s3386_s10 }
 0xbc1   : > { %v2403_v60 = vsel %vm2402_vm6, %v2399_v17, %v2401_v29  ;;  %v2404_v59 = vsel %vm2402_vm6, %v2401_v29, %v2399_v17  ;;  %vm2612_vm6 = vcmp.lt.s32.totalorder %v4293_v13, 109 }
 0xbc2   : > { %v2425_v49 = vpop.permute.xlu0 %2424  ;;  %2777 = vrot.lane.b32.xlu1 %v2772_v19, %s3385_s29  ;;  %v2405_v2 = vadd.f32 %v2404_v59, %v2390_v39  ;;  %v2406_v24 = vadd.f32 %v2403_v60, %v2391_v40 }
 0xbc4   : > { %v2414_v55 = vpop.permute.xlu1 %2413 }
 0xbc5   : > { %v2416_v0 = vsel %vm2415_vm7, %v2412_v38, %v2414_v55  ;;  %v2417_v23 = vsel %vm2415_vm7, %v2414_v55, %v2412_v38  ;;  %vm2625_vm7 = vcmp.lt.s32.totalorder %v4293_v13, 99 }
 0xbc6   : > { %v2438_v28 = vpop.permute.xlu0 %2437  ;;  %2786 = vrot.lane.b32.xlu1 %v2176_v4, %s3386_s10  ;;  %v2418_v58 = vadd.f32 %v2417_v23, %v2405_v2  ;;  %v2419_v61 = vadd.f32 %v2416_v0, %v2406_v24 }
 0xbc8   : > { %v2427_v43 = vpop.permute.xlu1 %2426 }
 0xbc9   : > { %v2429_v31 = vsel %vm2428_vm8, %v2425_v49, %v2427_v43  ;;  %v2430_v52 = vsel %vm2428_vm8, %v2427_v43, %v2425_v49  ;;  %vm2638_vm8 = vcmp.lt.s32.totalorder %v4293_v13, 98 }
 0xbca   : > { %v2451_v3 = vpop.permute.xlu0 %2450  ;;  %v2431_v22 = vadd.f32 %v2430_v52, %v2418_v58  ;;  %v2432_v17 = vadd.f32 %v2429_v31, %v2419_v61 }
 0xbcc   : > { %v2440_v15 = vpop.permute.xlu1 %2439 }
 0xbcd   : > { %v2442_v53 = vsel %vm2441_vm9, %v2438_v28, %v2440_v15  ;;  %v2443_v62 = vsel %vm2441_vm9, %v2440_v15, %v2438_v28  ;;  %vm2651_vm9 = vcmp.lt.s32.totalorder %v4293_v13, 97 }
 0xbce   : > { %v2464_v63 = vpop.permute.xlu0 %2463  ;;  %v2444_v27 = vadd.f32 %v2443_v62, %v2431_v22  ;;  %v2445_v38 = vadd.f32 %v2442_v53, %v2432_v17 }
 0xbd0   : > { %v2453_v8 = vpop.permute.xlu1 %2452 }
 0xbd1   : > { %v2455_v12 = vsel %vm2454_vm10, %v2451_v3, %v2453_v8  ;;  %v2456_v11 = vsel %vm2454_vm10, %v2453_v8, %v2451_v3  ;;  %vm2664_vm10 = vcmp.lt.s32.totalorder %v4293_v13, 96 }
 0xbd2   : > { %v4380_v48 = vpop.permute.xlu0 %2476  ;;  %v2457_v49 = vadd.f32 %v2456_v11, %v2444_v27  ;;  %v2458_v4 = vadd.f32 %v2455_v12, %v2445_v38 }
 0xbd4   : > { %v2466_v5 = vpop.permute.xlu1 %2465 }
 0xbd5   : > { %v2468_v29 = vsel %vm2467_vm11, %v2464_v63, %v2466_v5  ;;  %v2469_v19 = vsel %vm2467_vm11, %v2466_v5, %v2464_v63  ;;  %vm2677_vm11 = vcmp.lt.s32.totalorder %v4293_v13, 95 }
 0xbd6   : > { %v4382_v46 = vpop.permute.xlu0 %2493  ;;  %v2470_v15 = vadd.f32 %v2469_v19, %v2457_v49  ;;  %v2471_v57 = vadd.f32 %v2468_v29, %v2458_v4 }
 0xbd8   : > { %v2479_v50 = vpop.permute.xlu1 %2478 }
 0xbd9   : > { %v2481_v28 = vsel %vm2480_vm12, %v4380_v48, %v2479_v50  ;;  %v2482_v43 = vsel %vm2480_vm12, %v2479_v50, %v4380_v48  ;;  %vm2686_vm12 = vcmp.lt.s32.totalorder %v4293_v13, 94 }
 0xbda   : > { %v4384_v42 = vpop.permute.xlu0 %2506  ;;  %v2483_v3 = vadd.f32 %v2482_v43, %v2470_v15  ;;  %v2484_v8 = vadd.f32 %v2481_v28, %v2471_v57 }
 0xbdc   : > { %v4386_v44 = vpop.permute.xlu1 %2495  ;;  %v2485_v63 = vadd.f32 %v2483_v3, %v4274_v51  ;;  %v2486_v5 = vadd.f32 %v2484_v8, %v4281_v18 }
 0xbdd   : > { %v2498_v48 = vsel %vm2497_vm13, %v4382_v46, %v4386_v44  ;;  %v2499_v50 = vsel %vm2497_vm13, %v4386_v44, %v4382_v46  ;;  %vm2701_vm13 = vcmp.lt.s32.totalorder %v4293_v13, 93 }
 0xbde   : > { %v4388_v16 = vpop.permute.xlu0 %2519  ;;  %v2500_v18 = vadd.f32 %v2498_v48, %v2485_v63  ;;  %v2501_v59 = vadd.f32 %v2499_v50, %v2486_v5 }
 0xbe0   : > { %v4390_v21 = vpop.permute.xlu1 %2508 }
 0xbe1   : > { %v2511_v60 = vsel %vm2510_vm14, %v4384_v42, %v4390_v21  ;;  %v2512_v51 = vsel %vm2510_vm14, %v4390_v21, %v4384_v42  ;;  %vm2714_vm14 = vcmp.lt.s32.totalorder %v4293_v13, 83 }
 0xbe2   : > { %v4392_v20 = vpop.permute.xlu0 %2532  ;;  %v2513_v44 = vadd.f32 %v2511_v60, %v2500_v18  ;;  %v2514_v0 = vadd.f32 %v2512_v51, %v2501_v59 }
 0xbe4   : > { %v4394_v41 = vpop.permute.xlu1 %2521 }
 0xbe5   : > { %v2524_v40 = vsel %vm2523_vm15, %v4388_v16, %v4394_v41  ;;  %v2525_v46 = vsel %vm2523_vm15, %v4394_v41, %v4388_v16  ;;  %vm2727_vm15 = vcmp.lt.s32.totalorder %v4293_v13, 82 }
 0xbe6   : > { %v4396_v26 = vpop.permute.xlu0 %2545  ;;  %v2526_v2 = vadd.f32 %v2524_v40, %v2513_v44  ;;  %v2527_v24 = vadd.f32 %v2525_v46, %v2514_v0 }
 0xbe8   : > { %v4398_v32 = vpop.permute.xlu1 %2534 }
 0xbe9   : > { %v2537_v42 = vsel %vm2536_vm0, %v4392_v20, %v4398_v32  ;;  %v2538_v21 = vsel %vm2536_vm0, %v4398_v32, %v4392_v20  ;;  %vm2740_vm0 = vcmp.lt.s32.totalorder %v4293_v13, 81 }
 0xbea   : > { %v4400_v56 = vpop.permute.xlu0 %2558  ;;  %v2539_v52 = vadd.f32 %v2537_v42, %v2526_v2  ;;  %v2540_v58 = vadd.f32 %v2538_v21, %v2527_v24 }
 0xbec   : > { %v4402_v25 = vpop.permute.xlu1 %2547 }
 0xbed   : > { %v2550_v16 = vsel %vm2549_vm1, %v4396_v26, %v4402_v25  ;;  %v2551_v41 = vsel %vm2549_vm1, %v4402_v25, %v4396_v26  ;;  %vm2753_vm1 = vcmp.lt.s32.totalorder %v4293_v13, 80 }
 0xbee   : > { %v4405_v33 = vpop.permute.xlu0 %2571  ;;  %v2552_v53 = vadd.f32 %v2550_v16, %v2539_v52  ;;  %v2553_v62 = vadd.f32 %v2551_v41, %v2540_v58 }
 0xbf0   : > { %v4408_v34 = vpop.permute.xlu1 %2560 }
 0xbf1   : > { %v2563_v20 = vsel %vm2562_vm2, %v4400_v56, %v4408_v34  ;;  %v2564_v32 = vsel %vm2562_vm2, %v4408_v34, %v4400_v56  ;;  %vm2766_vm2 = vcmp.lt.s32.totalorder %v4293_v13, 79 }
 0xbf2   : > { %v4413_v7 = vpop.permute.xlu0 %2580  ;;  %v2565_v17 = vadd.f32 %v2563_v20, %v2552_v53  ;;  %v2566_v12 = vadd.f32 %v2564_v32, %v2553_v62 }
 0xbf4   : > { %v4416_v10 = vpop.permute.xlu1 %2573 }
 0xbf5   : > { %v2576_v26 = vsel %vm2575_vm3, %v4405_v33, %v4416_v10  ;;  %v2577_v25 = vsel %vm2575_vm3, %v4416_v10, %v4405_v33  ;;  %vm2779_vm3 = vcmp.lt.s32.totalorder %v4293_v13, 78 }
 0xbf6   : > { %v4419_v6 = vpop.permute.xlu0 %2595  ;;  %v2578_v34 = vadd.f32 %v2576_v26, %v2565_v17  ;;  %v2579_v38 = vadd.f32 %v2577_v25, %v2566_v12 }
 0xbf8   : > { %v4422_v35 = vpop.permute.xlu1 %2582 }
 0xbf9   : > { %v2585_v27 = vsel %vm2584_vm4, %v4413_v7, %v4422_v35  ;;  %v2586_v56 = vsel %vm2584_vm4, %v4422_v35, %v4413_v7  ;;  %vm2788_vm4 = vcmp.lt.s32.totalorder %v4293_v13, 77 }
 0xbfa   : > { %v4425_v36 = vpop.permute.xlu0 %2608  ;;  %v2587_v10 = vadd.f32 %v2585_v27, %v2578_v34  ;;  %v2588_v49 = vadd.f32 %v2586_v56, %v2579_v38 }
 0xbfc   : > { %v4428_v30 = vpop.permute.xlu1 %2597 }
 0xbfd   : > { %v2600_v19 = vsel %vm2599_vm5, %v4419_v6, %v4428_v30  ;;  %v2601_v33 = vsel %vm2599_vm5, %v4428_v30, %v4419_v6  ;;  %vm2817_vm5 = vcmp.lt.s32.totalorder %v2181_v9, 256 }
 0xbfe   : > { %v4431_v45 = vpop.permute.xlu0 %2621  ;;  %v2602_v35 = vadd.f32 %v2600_v19, %v2587_v10  ;;  %v2603_v43 = vadd.f32 %v2601_v33, %v2588_v49 }
 0xc00   : > { %v4433_v55 = vpop.permute.xlu1 %2610 }
 0xc01   : > { %v2613_v28 = vsel %vm2612_vm6, %v4425_v36, %v4433_v55  ;;  %v2614_v7 = vsel %vm2612_vm6, %v4433_v55, %v4425_v36 }
 0xc02   : > { %v4437_v54 = vpop.permute.xlu0 %2634  ;;  %v2615_v30 = vadd.f32 %v2613_v28, %v2602_v35  ;;  %v2616_v3 = vadd.f32 %v2614_v7, %v2603_v43  ;;  %v3387_v35 = vmov 1966171168  }
 0xc03   : > { %v2801_v43 = vunpack.c.l.s4 %v3387_v35 }
 0xc04   : > { %v4439_v14 = vpop.permute.xlu1 %2623 }
 0xc05   : > { %v2626_v57 = vsel %vm2625_vm7, %v4431_v45, %v4439_v14  ;;  %v2627_v6 = vsel %vm2625_vm7, %v4439_v14, %v4431_v45 }
 0xc06   : > { %v4442_v37 = vpop.permute.xlu0 %2647  ;;  %v2628_v55 = vadd.f32 %v2626_v57, %v2615_v30  ;;  %v2629_v5 = vadd.f32 %v2627_v6, %v2616_v3 }
 0xc08   : > { %v4447_v1 = vpop.permute.xlu1 %2636 }
 0xc09   : > { %v2639_v63 = vsel %vm2638_vm8, %v4437_v54, %v4447_v1  ;;  %v2640_v36 = vsel %vm2638_vm8, %v4447_v1, %v4437_v54 }
 0xc0a   : > { %v4454_v47 = vpop.permute.xlu0 %2660  ;;  %v2641_v14 = vadd.f32 %v2639_v63, %v2628_v55  ;;  %v2642_v60 = vadd.f32 %v2640_v36, %v2629_v5  ;;  %v2802_v36 = vunpack.c.0.s8 %v2801_v43  ;;  %v2804_v55 = vshrl.u32 %v2181_v9, 7 }
 0xc0c   : > { %v4461_v39 = vpop.permute.xlu1 %2649 }
 0xc0d   : > { %v2652_v50 = vsel %vm2651_vm9, %v4442_v37, %v4461_v39  ;;  %v2653_v45 = vsel %vm2651_vm9, %v4461_v39, %v4442_v37 }
 0xc0e   : > { %v4468_v23 = vpop.permute.xlu0 %2673  ;;  %v2654_v1 = vadd.f32 %v2652_v50, %v2641_v14  ;;  %v2655_v59 = vadd.f32 %v2653_v45, %v2642_v60 }
 0xc10   : > { %v2663_v31 = vpop.permute.xlu1 %2662 }
 0xc11   : > { %v2665_v18 = vsel %vm2664_vm10, %v4454_v47, %v2663_v31  ;;  %v2666_v54 = vsel %vm2664_vm10, %v2663_v31, %v4454_v47 }
 0xc12   : > { %v4480_v61 = vpop.permute.xlu0 %2682  ;;  %v2667_v0 = vadd.f32 %v2665_v18, %v2654_v1  ;;  %v2668_v37 = vadd.f32 %v2666_v54, %v2655_v59 }
 0xc14   : > { %v2676_v22 = vpop.permute.xlu1 %2675 }
 0xc15   : > { %v2678_v46 = vsel %vm2677_vm11, %v4468_v23, %v2676_v22  ;;  %v2679_v44 = vsel %vm2677_vm11, %v2676_v22, %v4468_v23 }
 0xc16   : > { %v2698_v11 = vpop.permute.xlu0 %2697  ;;  %v2680_v2 = vadd.f32 %v2678_v46, %v2667_v0  ;;  %v2681_v47 = vadd.f32 %v2679_v44, %v2668_v37 }
 0xc18   : > { %v2685_v29 = vpop.permute.xlu1 %2684 }
 0xc19   : > { %v2687_v42 = vsel %vm2686_vm12, %v4480_v61, %v2685_v29  ;;  %v2688_v21 = vsel %vm2686_vm12, %v2685_v29, %v4480_v61 }
 0xc1a   : > { %v2711_v4 = vpop.permute.xlu0 %2710  ;;  %v2689_v41 = vadd.f32 %v2687_v42, %v2680_v2  ;;  %v2690_v52 = vadd.f32 %v2688_v21, %v2681_v47 }
 0xc1c   : > { %v2700_v15 = vpop.permute.xlu1 %2699 }
 0xc1d   : > { %v2702_v31 = vsel %vm2701_vm13, %v2698_v11, %v2700_v15  ;;  %v2703_v16 = vsel %vm2701_vm13, %v2700_v15, %v2698_v11 }
 0xc1e   : > { %v2724_v8 = vpop.permute.xlu0 %2723  ;;  %v2704_v20 = vadd.f32 %v2702_v31, %v2689_v41  ;;  %v2705_v32 = vadd.f32 %v2703_v16, %v2690_v52 }
 0xc20   : > { %v2713_v48 = vpop.permute.xlu1 %2712 }
 0xc21   : > { %v2715_v23 = vsel %vm2714_vm14, %v2711_v4, %v2713_v48  ;;  %v2716_v58 = vsel %vm2714_vm14, %v2713_v48, %v2711_v4  ;;  %v2794_v48 = vstv %s2793_s11 }
 0xc22   : > { %v2737_v51 = vpop.permute.xlu0 %2736  ;;  %v2717_v26 = vadd.f32 %v2715_v23, %v2704_v20  ;;  %v2718_v25 = vadd.f32 %v2716_v58, %v2705_v32 }
 0xc24   : > { %v2726_v40 = vpop.permute.xlu1 %2725 }
 0xc25   : > { %v2728_v61 = vsel %vm2727_vm15, %v2724_v8, %v2726_v40  ;;  %v2729_v22 = vsel %vm2727_vm15, %v2726_v40, %v2724_v8 }
 0xc26   : > { %v2750_v39 = vpop.permute.xlu0 %2749  ;;  %v2730_v11 = vadd.f32 %v2728_v61, %v2717_v26  ;;  %v2731_v27 = vadd.f32 %v2729_v22, %v2718_v25 }
 0xc28   : > { %v2739_v24 = vpop.permute.xlu1 %2738 }
 0xc29   : > { %v2741_v17 = vsel %vm2740_vm0, %v2737_v51, %v2739_v24  ;;  %v2742_v12 = vsel %vm2740_vm0, %v2739_v24, %v2737_v51  ;;  %v2805_v51 = vsub.s32 %v2802_v36, %v2804_v55 }
 0xc2a   : > { %v2763_v53 = vpop.permute.xlu0 %2762  ;;  %v2743_v29 = vadd.f32 %v2741_v17, %v2730_v11  ;;  %v2744_v19 = vadd.f32 %v2742_v12, %v2731_v27 }
 0xc2c   : > { %v2752_v62 = vpop.permute.xlu1 %2751 }
 0xc2d   : > { %v2754_v34 = vsel %vm2753_vm1, %v2750_v39, %v2752_v62  ;;  %v2755_v38 = vsel %vm2753_vm1, %v2752_v62, %v2750_v39 }
 0xc2e   : > { %v2776_v33 = vpop.permute.xlu0 %2775  ;;  %v2756_v4 = vadd.f32 %v2754_v34, %v2743_v29  ;;  %v2757_v28 = vadd.f32 %v2755_v38, %v2744_v19 }
 0xc30   : > { %v2765_v56 = vpop.permute.xlu1 %2764 }
 0xc31   : > { %v2767_v10 = vsel %vm2766_vm2, %v2763_v53, %v2765_v56  ;;  %v2768_v49 = vsel %vm2766_vm2, %v2765_v56, %v2763_v53 }
 0xc32   : > { %v2769_v6 = vadd.f32 %v2767_v10, %v2756_v4  ;;  %v2770_v30 = vadd.f32 %v2768_v49, %v2757_v28  ;;  %v2785_v3 = vpop.permute.xlu0 %2784 }
 0xc34   : > { %v2778_v7 = vpop.permute.xlu1 %2777 }
 0xc35   : > { %v2780_v15 = vsel %vm2779_vm3, %v2776_v33, %v2778_v7  ;;  %v2781_v57 = vsel %vm2779_vm3, %v2778_v7, %v2776_v33 }
 0xc36   : > { %v2782_v8 = vadd.f32 %v2780_v15, %v2769_v6  ;;  %v2783_v63 = vadd.f32 %v2781_v57, %v2770_v30 }
 0xc38   : > { %v2787_v5 = vpop.permute.xlu1 %2786 }
 0xc39   : > { %v2789_v50 = vsel %vm2788_vm4, %v2785_v3, %v2787_v5  ;;  %v2790_v45 = vsel %vm2788_vm4, %v2787_v5, %v2785_v3 }
 0xc3a   : > { %v2791_v14 = vadd.f32 %v2789_v50, %v2782_v8  ;;  %v2792_v60 = vadd.f32 %v2790_v45, %v2783_v63 }
 0xc3c   : > { %v2795_v18 = vadd.f32 %v2794_v48, %v2791_v14  ;;  %v2796_v54 = vadd.f32 %v2794_v48, %v2792_v60 }
 0xc3e   : > { %v2799_v1 = vcombine.low %v2795_v18, %v2796_v54 }
 0xc40   : > { %v2806_v59 = vrot.slane %v2799_v1, %v2805_v51 }
 0xc42   : > { %v2813_v13 = vrot.slane %v2806_v59, %v2805_v51 }
 0xc44   : > { %2819 = vst.msk [vmem:[%s454_s19] sm:$0x3] %vm2817_vm5, %v2813_v13 }
 0xc45 PF: > { %s27_s14 = sadd.s32 1, %s3335_s14  }
 0xc46   : > { %p24_p4 = scmp.ge.s32.totalorder %s27_s14, 4  }
 0xc48   :  { %26 = sbr.rel (!%p24_p4) target bundleno = 4 (0x4), region = 110 }

</bundles_post_ra>
